<compile_context>
chip_gen: v5e
topology: v5e:2x2
jax: 0.10.0
libtpu: 0.0.40
codegen_flags: <defaults>
</compile_context>

<pallas_src>
import functools

import jax
import jax.numpy as jnp
import numpy as np
from jax.experimental import pallas as pl
from jax.experimental.pallas import tpu as pltpu

LATENT_DIM = 8
SEQ_LEN = 150
IN_CH = 4
CONV_CH = 32
HIDDEN = 64
KSIZE = 3

GRP = 8                          # sequence positions folded into one conv matmul group
SEQ_PAD = 152                    # SEQ_LEN rounded up to a multiple of GRP (2 junk pos.)
NGRP = SEQ_PAD // GRP            # 19 conv groups
TAPS = KSIZE * IN_CH             # 12 (tap, channel) pairs per position
GRP_K = 128                      # GRP*TAPS = 96, zero-padded to one full lane tile
GRP_N = GRP * CONV_CH            # 256 conv output columns per group (2 lane tiles)
FC1_K = NGRP * GRP_N             # 4864 (includes the 2 zero-weighted junk positions)
STATS_PAD = 128                  # [mean | logvar | zeros] lane-dense stats slab
AUX_PAD = 128                    # [eps | cond | zeros]  lane-dense aux slab
OUT_RAW = SEQ_LEN * IN_CH        # 600
OUT_PAD = 640                    # lane-dense recon columns (5 * 128)


def _round_up(v, m):
    return (v + m - 1) // m * m


# ---------------------------------------------------------------------------
# Fused kernel: conv + ReLU + flatten + MLP encoder + reparameterize + decoder.
# ---------------------------------------------------------------------------
def _cvae_kernel(x_ref, wc_ref, bc_ref, w1_ref, b1_ref, w2_ref, b2_ref,
                 aux_ref, wd1_ref, bd1_ref, wd2_ref, bd2_ref,
                 recon_ref, stats_ref, fc1in_ref, *, blk):
    # ---- Conv1d(4 -> 32, k=3, pad=1) + ReLU -------------------------------------
    # 19 matmuls of (blk, 128) x (128, 256): 8 sequence positions per matmul via a
    # block-diagonal weight.  The ReLU'd activation goes straight into the fc1
    # operand scratch at 256-lane-aligned offsets (the flatten relayout is fused
    # into the conv epilogue; every store is an unmasked, lane-aligned store).
    for g in range(NGRP):
        pre = jnp.dot(x_ref[0, g * blk:(g + 1) * blk, :], wc_ref[...],
                      preferred_element_type=jnp.float32) + bc_ref[...]
        fc1in_ref[:, g * GRP_N:(g + 1) * GRP_N] = (
            jnp.maximum(pre, 0.0).astype(jnp.bfloat16))

    # ---- Linear(4800 -> 64) + ReLU: one K=4864 bf16 MXU matmul, f32 accumulation --
    h1 = jnp.dot(fc1in_ref[...], w1_ref[...],
                 preferred_element_type=jnp.float32) + b1_ref[...]
    h1 = jnp.maximum(h1, 0.0)                                          # (blk, 64) f32

    # ---- Linear(64 -> 2*latent): emitted as a lane-dense (blk, 128) stats slab ----
    h2 = jnp.dot(h1, w2_ref[...], preferred_element_type=jnp.float32) + b2_ref[...]
    stats_ref[0] = h2                                                  # [mean|logvar|0]
    mean = h2[:, :LATENT_DIM]
    logvar = h2[:, LATENT_DIM:2 * LATENT_DIM]

    # ---- reparameterize: z = eps * exp(0.5 * logvar) + mean (f32 elementwise) ----
    eps = aux_ref[0, :, :LATENT_DIM]
    cond = aux_ref[0, :, LATENT_DIM:LATENT_DIM + 1]
    z = eps * jnp.exp(0.5 * logvar) + mean                             # (blk, 8)

    # ---- decoder Linear(latent+1 -> 64) + ReLU; concat([z, cond]) as split matmul --
    d1 = (jnp.dot(z, wd1_ref[:LATENT_DIM, :], preferred_element_type=jnp.float32)
          + cond * wd1_ref[LATENT_DIM:LATENT_DIM + 1, :] + bd1_ref[...])
    d1 = jnp.maximum(d1, 0.0)                                          # (blk, 64)

    # ---- decoder Linear(64 -> 600, padded to 640) + Sigmoid, bf16 MXU operands ----
    logits = jnp.dot(d1.astype(jnp.bfloat16), wd2_ref[...],
                     preferred_element_type=jnp.float32) + bd2_ref[...]
    recon_ref[0] = jax.nn.sigmoid(logits)                              # (blk, 640)


# ---------------------------------------------------------------------------
# Parameter setup (deterministic, synthetic — torch layouts kept for the reference).
# ---------------------------------------------------------------------------
def init_params(key):
    ks = jax.random.split(key, 10)

    def w(k, shape, scale=0.05):
        return (scale * jax.random.normal(k, shape)).astype(jnp.float32)

    return {
        "conv_w": w(ks[0], (CONV_CH, IN_CH, KSIZE)),          # torch (out, in, k)
        "conv_b": w(ks[1], (CONV_CH,)),
        "fc1_w":  w(ks[2], (HIDDEN, CONV_CH * SEQ_LEN)),      # torch (out, in)
        "fc1_b":  w(ks[3], (HIDDEN,)),
        "fc2_w":  w(ks[4], (2 * LATENT_DIM, HIDDEN)),
        "fc2_b":  w(ks[5], (2 * LATENT_DIM,)),
        "dec1_w": w(ks[6], (HIDDEN, LATENT_DIM + 1)),
        "dec1_b": w(ks[7], (HIDDEN,)),
        "dec2_w": w(ks[8], (SEQ_LEN * IN_CH, HIDDEN)),
        "dec2_b": w(ks[9], (SEQ_LEN * IN_CH,)),
    }


def to_kernel_params(p):
    kp = {}
    # conv: torch (out, in, k) -> (k*4+c, out) tap matrix, then block-diagonal over the
    # 8 folded positions, zero-padded to a full 128-deep contraction; bf16 MXU operand.
    wc = p["conv_w"].transpose(2, 1, 0).reshape(TAPS, CONV_CH)            # row = k*4 + c
    wc_big = jnp.kron(jnp.eye(GRP, dtype=wc.dtype), wc)                   # (96, 256)
    kp["conv_w"] = jnp.pad(wc_big, ((0, GRP_K - GRP * TAPS), (0, 0))).astype(jnp.bfloat16)
    kp["conv_b"] = jnp.tile(p["conv_b"], GRP).reshape(1, GRP_N).astype(jnp.float32)
    # fc1: torch flat index = c*150 + l  ->  kernel index g*256 + t*32 + c (l = g*8 + t),
    # with zero rows for the two padded junk positions l = 150, 151; bf16 weight.
    w1 = p["fc1_w"].reshape(HIDDEN, CONV_CH, SEQ_LEN)                     # (h, c, l)
    w1 = jnp.pad(w1, ((0, 0), (0, 0), (0, SEQ_PAD - SEQ_LEN)))
    w1 = w1.transpose(2, 1, 0).reshape(FC1_K, HIDDEN)                     # row = l*32 + c
    kp["fc1_w"] = w1.astype(jnp.bfloat16)
    kp["fc1_b"] = p["fc1_b"].reshape(1, HIDDEN).astype(jnp.float32)
    # fc2: pad 16 -> 128 output columns so the stats store is lane-dense.
    w2 = p["fc2_w"].T.astype(jnp.float32)                                 # (64, 16)
    kp["fc2_w"] = jnp.pad(w2, ((0, 0), (0, STATS_PAD - 2 * LATENT_DIM)))
    kp["fc2_b"] = jnp.pad(p["fc2_b"].reshape(1, 2 * LATENT_DIM).astype(jnp.float32),
                          ((0, 0), (0, STATS_PAD - 2 * LATENT_DIM)))
    kp["dec1_w"] = p["dec1_w"].T.astype(jnp.float32)                      # (9, 64)
    kp["dec1_b"] = p["dec1_b"].reshape(1, HIDDEN).astype(jnp.float32)
    # dec2: pad 600 -> 640 output columns (zero weights/bias) -> lane-dense recon store.
    wd2 = p["dec2_w"].T                                                   # (64, 600)
    kp["dec2_w"] = jnp.pad(wd2, ((0, 0), (0, OUT_PAD - OUT_RAW))).astype(jnp.bfloat16)
    kp["dec2_b"] = jnp.pad(p["dec2_b"].reshape(1, OUT_RAW).astype(jnp.float32),
                           ((0, 0), (0, OUT_PAD - OUT_RAW)))
    return kp


# ---------------------------------------------------------------------------
# Forward pass: one fused pallas_call, batch split over a parallel grid.
# ---------------------------------------------------------------------------
def cvae_forward(kp, x, condition, eps, *, max_blk=128):
    B = x.shape[0]
    # Batch rows per grid step: biggest multiple of 8 up to max_blk.  128 fills the
    # v5e MXU rows; on v6e/v7x max_blk=256 is also valid (VMEM stays < 10 MB).
    blk = min(max_blk, _round_up(B, 8))
    b_pad = _round_up(B, blk)
    nb = b_pad // blk
    rows = NGRP * blk

    xf = x.astype(jnp.float32)
    cf = condition.astype(jnp.float32)
    ef = eps.astype(jnp.float32)
    if b_pad != B:
        xf = jnp.pad(xf, ((0, b_pad - B), (0, 0), (0, 0)))
        cf = jnp.pad(cf, ((0, b_pad - B), (0, 0)))
        ef = jnp.pad(ef, ((0, b_pad - B), (0, 0)))

    # Im2col + group folding, built once on the XLA side (~10 KB/sample, one fused
    # producer pass) so the kernel never touches conv padding or shifted windows.
    xpad = jnp.pad(xf, ((0, 0), (1, 1), (0, 0)))                                # seq zero pad
    taps = jnp.concatenate([xpad[:, k:k + SEQ_LEN, :] for k in range(KSIZE)],
                           axis=2)                                              # (B,150,12)
    taps = jnp.pad(taps, ((0, 0), (0, SEQ_PAD - SEQ_LEN), (0, 0)))              # (B,152,12)
    taps = taps.reshape(b_pad, NGRP, GRP * TAPS)                                # col=t*12+k*4+c
    taps = jnp.pad(taps, ((0, 0), (0, 0), (0, GRP_K - GRP * TAPS)))             # (B,19,128)
    x_k = (taps.reshape(nb, blk, NGRP, GRP_K)
               .transpose(0, 2, 1, 3)
               .reshape(nb, rows, GRP_K)
               .astype(jnp.bfloat16))                                           # row=g*blk+j

    # Pack eps (8 lanes) + condition (1 lane) into one lane-dense aux block.
    aux = jnp.zeros((b_pad, AUX_PAD), jnp.float32)
    aux = aux.at[:, :LATENT_DIM].set(ef).at[:, LATENT_DIM:LATENT_DIM + 1].set(cf)
    aux_k = aux.reshape(nb, blk, AUX_PAD)

    kernel = functools.partial(_cvae_kernel, blk=blk)
    const2 = lambda i: (0, 0)

    grid_spec = pltpu.PrefetchScalarGridSpec(
        num_scalar_prefetch=0,
        grid=(nb,),
        in_specs=[
            pl.BlockSpec((1, rows, GRP_K), lambda i: (i, 0, 0)),           # im2col x (bf16)
            pl.BlockSpec((GRP_K, GRP_N), const2),                          # conv w (bf16)
            pl.BlockSpec((1, GRP_N), const2),                              # conv b
            pl.BlockSpec((FC1_K, HIDDEN), const2),                         # fc1 w (bf16)
            pl.BlockSpec((1, HIDDEN), const2),                             # fc1 b
            pl.BlockSpec((HIDDEN, STATS_PAD), const2),                     # fc2 w
            pl.BlockSpec((1, STATS_PAD), const2),                          # fc2 b
            pl.BlockSpec((1, blk, AUX_PAD), lambda i: (i, 0, 0)),          # [eps | cond]
            pl.BlockSpec((LATENT_DIM + 1, HIDDEN), const2),                # dec1 w
            pl.BlockSpec((1, HIDDEN), const2),                             # dec1 b
            pl.BlockSpec((HIDDEN, OUT_PAD), const2),                       # dec2 w (bf16)
            pl.BlockSpec((1, OUT_PAD), const2),                            # dec2 b
        ],
        out_specs=[
            pl.BlockSpec((1, blk, OUT_PAD), lambda i: (i, 0, 0)),          # recon (padded)
            pl.BlockSpec((1, blk, STATS_PAD), lambda i: (i, 0, 0)),        # [mean|logvar|0]
        ],
        scratch_shapes=[pltpu.VMEM((blk, FC1_K), jnp.bfloat16)],           # fc1 operand
    )

    recon_k, stats_k = pl.pallas_call(
        kernel,
        out_shape=(
            jax.ShapeDtypeStruct((nb, blk, OUT_PAD), jnp.float32),
            jax.ShapeDtypeStruct((nb, blk, STATS_PAD), jnp.float32),
        ),
        grid_spec=grid_spec,
        compiler_params=pltpu.CompilerParams(dimension_semantics=("parallel",)),
    )(x_k, kp["conv_w"], kp["conv_b"], kp["fc1_w"], kp["fc1_b"],
      kp["fc2_w"], kp["fc2_b"], aux_k, kp["dec1_w"], kp["dec1_b"],
      kp["dec2_w"], kp["dec2_b"])

    recon = recon_k.reshape(b_pad, OUT_PAD)[:B, :OUT_RAW].reshape(B, SEQ_LEN, IN_CH)
    stats = stats_k.reshape(b_pad, STATS_PAD)[:B]
    mean = stats[:, :LATENT_DIM]
    logvar = stats[:, LATENT_DIM:2 * LATENT_DIM]
    return recon, mean, logvar


# ---------------------------------------------------------------------------
# Pure-JAX reference mimicking the PyTorch module exactly (torch-layout weights, f32).
# ---------------------------------------------------------------------------
def ref_forward(p, x, condition, eps):
    B = x.shape[0]
    xt = jnp.transpose(x, (0, 2, 1))                                   # (B, 4, 150)
    xp = jnp.pad(xt, ((0, 0), (0, 0), (1, 1)))
    conv = jnp.zeros((B, CONV_CH, SEQ_LEN), jnp.float32)
    for k in range(KSIZE):
        conv = conv + jnp.einsum("bcl,oc->bol", xp[:, :, k:k + SEQ_LEN],
                                 p["conv_w"][:, :, k])
    conv = jax.nn.relu(conv + p["conv_b"][None, :, None])
    flat = conv.reshape(B, CONV_CH * SEQ_LEN)
    h1 = jax.nn.relu(flat @ p["fc1_w"].T + p["fc1_b"])
    h2 = h1 @ p["fc2_w"].T + p["fc2_b"]
    mean, logvar = h2[:, :LATENT_DIM], h2[:, LATENT_DIM:]
    z = eps * jnp.exp(0.5 * logvar) + mean
    zc = jnp.concatenate([z, condition], axis=1)
    d1 = jax.nn.relu(zc @ p["dec1_w"].T + p["dec1_b"])
    recon = jax.nn.sigmoid(d1 @ p["dec2_w"].T + p["dec2_b"]).reshape(B, SEQ_LEN, IN_CH)
    return recon, mean, logvar


if __name__ == "__main__":
    key = jax.random.PRNGKey(0)
    k_param, k_x, k_c, k_eps = jax.random.split(key, 4)

    B = 2
    x = jax.random.normal(k_x, (B, SEQ_LEN, IN_CH), dtype=jnp.float32)
    condition = jax.random.normal(k_c, (B, 1), dtype=jnp.float32)
    # TODO(synk): torch.randn_like eps is hoisted to a host-provided input for determinism.
    eps = jax.random.normal(k_eps, (B, LATENT_DIM), dtype=jnp.float32)

    params = init_params(k_param)
    kparams = to_kernel_params(params)

    recon, mean, logvar = jax.jit(cvae_forward)(kparams, x, condition, eps)
    jax.block_until_ready((recon, mean, logvar))

    r_ref, m_ref, lv_ref = ref_forward(params, x, condition, eps)
    # bf16 MXU operands (im2col x, conv/fc1/dec2 weights) with f32 accumulation:
    # expected relative error a few 1e-3 on the encoder head, far smaller on recon.
    np.testing.assert_allclose(np.asarray(recon), np.asarray(r_ref), rtol=5e-3, atol=5e-3)
    np.testing.assert_allclose(np.asarray(mean), np.asarray(m_ref), rtol=5e-3, atol=5e-3)
    np.testing.assert_allclose(np.asarray(logvar), np.asarray(lv_ref), rtol=5e-3, atol=5e-3)

    print("KERNEL_OK")
</pallas_src>

<mosaic_0001>
module attributes {stable_mosaic.version = 11 : i64} {
  func.func @_cvae_kernel(%arg0: i32, %arg1: memref<1x152x128xbf16, #tpu.memory_space<vmem>>, %arg2: memref<128x256xbf16, #tpu.memory_space<vmem>>, %arg3: memref<1x256xf32, #tpu.memory_space<vmem>>, %arg4: memref<4864x64xbf16, #tpu.memory_space<vmem>>, %arg5: memref<1x64xf32, #tpu.memory_space<vmem>>, %arg6: memref<64x128xf32, #tpu.memory_space<vmem>>, %arg7: memref<1x128xf32, #tpu.memory_space<vmem>>, %arg8: memref<1x8x128xf32, #tpu.memory_space<vmem>>, %arg9: memref<9x64xf32, #tpu.memory_space<vmem>>, %arg10: memref<1x64xf32, #tpu.memory_space<vmem>>, %arg11: memref<64x640xbf16, #tpu.memory_space<vmem>>, %arg12: memref<1x640xf32, #tpu.memory_space<vmem>>, %arg13: memref<1x8x640xf32, #tpu.memory_space<vmem>>, %arg14: memref<1x8x128xf32, #tpu.memory_space<vmem>>, %arg15: memref<8x4864xbf16, #tpu.memory_space<vmem>>) attributes {dimension_semantics = [#tpu.dimension_semantics<parallel>], iteration_bounds = array<i64: 1>, scalar_prefetch = 0 : i64, scratch_operands = 1 : i64, tpu.core_type = #tpu.core_type<tc>, window_params = [{transform_indices = @transform_0, window_bounds = array<i64: 1, 152, 128>}, {pipeline_mode = #tpu.pipeline_mode<synchronous>, transform_indices = @transform_1, window_bounds = array<i64: 128, 256>}, {pipeline_mode = #tpu.pipeline_mode<synchronous>, transform_indices = @transform_2, window_bounds = array<i64: 1, 256>}, {pipeline_mode = #tpu.pipeline_mode<synchronous>, transform_indices = @transform_3, window_bounds = array<i64: 4864, 64>}, {pipeline_mode = #tpu.pipeline_mode<synchronous>, transform_indices = @transform_4, window_bounds = array<i64: 1, 64>}, {pipeline_mode = #tpu.pipeline_mode<synchronous>, transform_indices = @transform_5, window_bounds = array<i64: 64, 128>}, {pipeline_mode = #tpu.pipeline_mode<synchronous>, transform_indices = @transform_6, window_bounds = array<i64: 1, 128>}, {transform_indices = @transform_7, window_bounds = array<i64: 1, 8, 128>}, {pipeline_mode = #tpu.pipeline_mode<synchronous>, transform_indices = @transform_8, window_bounds = array<i64: 9, 64>}, {pipeline_mode = #tpu.pipeline_mode<synchronous>, transform_indices = @transform_9, window_bounds = array<i64: 1, 64>}, {pipeline_mode = #tpu.pipeline_mode<synchronous>, transform_indices = @transform_10, window_bounds = array<i64: 64, 640>}, {pipeline_mode = #tpu.pipeline_mode<synchronous>, transform_indices = @transform_11, window_bounds = array<i64: 1, 640>}, {transform_indices = @transform_12, window_bounds = array<i64: 1, 8, 640>}, {transform_indices = @transform_13, window_bounds = array<i64: 1, 8, 128>}]} {
    %c0 = arith.constant 0 : index
    %c0_0 = arith.constant 0 : index
    %c0_1 = arith.constant 0 : index
    %0 = vector.load %arg1[%c0, %c0_0, %c0_1] : memref<1x152x128xbf16, #tpu.memory_space<vmem>>, vector<1x8x128xbf16>
    %1 = vector.shape_cast %0 : vector<1x8x128xbf16> to vector<8x128xbf16>
    %c0_2 = arith.constant 0 : index
    %c0_3 = arith.constant 0 : index
    %2 = vector.load %arg2[%c0_2, %c0_3] : memref<128x256xbf16, #tpu.memory_space<vmem>>, vector<128x256xbf16>
    %cst = arith.constant dense<0.000000e+00> : vector<8x256xf32>
    %3 = tpu.matmul %1, %2, %cst {dimension_numbers = #tpu.dot_dimension_numbers<[1], [0], [0], [1], [0, 0, 1, 1], [], []>} : vector<8x128xbf16>, vector<128x256xbf16>, vector<8x256xf32> -> vector<8x256xf32>
    %c0_4 = arith.constant 0 : index
    %c0_5 = arith.constant 0 : index
    %4 = vector.load %arg3[%c0_4, %c0_5] : memref<1x256xf32, #tpu.memory_space<vmem>>, vector<1x256xf32>
    %5 = vector.broadcast %4 : vector<1x256xf32> to vector<8x256xf32>
    %6 = arith.addf %3, %5 : vector<8x256xf32>
    %cst_6 = arith.constant 0.000000e+00 : f32
    %7 = vector.broadcast %cst_6 : f32 to vector<8x256xf32>
    %8 = arith.maximumf %6, %7 : vector<8x256xf32>
    %9 = arith.truncf %8 : vector<8x256xf32> to vector<8x256xbf16>
    %c0_7 = arith.constant 0 : index
    %c0_8 = arith.constant 0 : index
    %10 = vector.load %arg15[%c0_7, %c0_8] : memref<8x4864xbf16, #tpu.memory_space<vmem>>, vector<8x256xbf16>
    tpu.vector_store %arg15[%c0_7, %c0_8], %9 {strides = array<i32>} : memref<8x4864xbf16, #tpu.memory_space<vmem>>, vector<8x256xbf16>,
    %c0_9 = arith.constant 0 : index
    %c8 = arith.constant 8 : index
    %c0_10 = arith.constant 0 : index
    %11 = vector.load %arg1[%c0_9, %c8, %c0_10] : memref<1x152x128xbf16, #tpu.memory_space<vmem>>, vector<1x8x128xbf16>
    %12 = vector.shape_cast %11 : vector<1x8x128xbf16> to vector<8x128xbf16>
    %c0_11 = arith.constant 0 : index
    %c0_12 = arith.constant 0 : index
    %13 = vector.load %arg2[%c0_11, %c0_12] : memref<128x256xbf16, #tpu.memory_space<vmem>>, vector<128x256xbf16>
    %cst_13 = arith.constant dense<0.000000e+00> : vector<8x256xf32>
    %14 = tpu.matmul %12, %13, %cst_13 {dimension_numbers = #tpu.dot_dimension_numbers<[1], [0], [0], [1], [0, 0, 1, 1], [], []>} : vector<8x128xbf16>, vector<128x256xbf16>, vector<8x256xf32> -> vector<8x256xf32>
    %c0_14 = arith.constant 0 : index
    %c0_15 = arith.constant 0 : index
    %15 = vector.load %arg3[%c0_14, %c0_15] : memref<1x256xf32, #tpu.memory_space<vmem>>, vector<1x256xf32>
    %16 = vector.broadcast %15 : vector<1x256xf32> to vector<8x256xf32>
    %17 = arith.addf %14, %16 : vector<8x256xf32>
    %cst_16 = arith.constant 0.000000e+00 : f32
    %18 = vector.broadcast %cst_16 : f32 to vector<8x256xf32>
    %19 = arith.maximumf %17, %18 : vector<8x256xf32>
    %20 = arith.truncf %19 : vector<8x256xf32> to vector<8x256xbf16>
    %c0_17 = arith.constant 0 : index
    %c256 = arith.constant 256 : index
    %21 = vector.load %arg15[%c0_17, %c256] : memref<8x4864xbf16, #tpu.memory_space<vmem>>, vector<8x256xbf16>
    tpu.vector_store %arg15[%c0_17, %c256], %20 {strides = array<i32>} : memref<8x4864xbf16, #tpu.memory_space<vmem>>, vector<8x256xbf16>,
    %c0_18 = arith.constant 0 : index
    %c16 = arith.constant 16 : index
    %c0_19 = arith.constant 0 : index
    %22 = vector.load %arg1[%c0_18, %c16, %c0_19] : memref<1x152x128xbf16, #tpu.memory_space<vmem>>, vector<1x8x128xbf16>
    %23 = vector.shape_cast %22 : vector<1x8x128xbf16> to vector<8x128xbf16>
    %c0_20 = arith.constant 0 : index
    %c0_21 = arith.constant 0 : index
    %24 = vector.load %arg2[%c0_20, %c0_21] : memref<128x256xbf16, #tpu.memory_space<vmem>>, vector<128x256xbf16>
    %cst_22 = arith.constant dense<0.000000e+00> : vector<8x256xf32>
    %25 = tpu.matmul %23, %24, %cst_22 {dimension_numbers = #tpu.dot_dimension_numbers<[1], [0], [0], [1], [0, 0, 1, 1], [], []>} : vector<8x128xbf16>, vector<128x256xbf16>, vector<8x256xf32> -> vector<8x256xf32>
    %c0_23 = arith.constant 0 : index
    %c0_24 = arith.constant 0 : index
    %26 = vector.load %arg3[%c0_23, %c0_24] : memref<1x256xf32, #tpu.memory_space<vmem>>, vector<1x256xf32>
    %27 = vector.broadcast %26 : vector<1x256xf32> to vector<8x256xf32>
    %28 = arith.addf %25, %27 : vector<8x256xf32>
    %cst_25 = arith.constant 0.000000e+00 : f32
    %29 = vector.broadcast %cst_25 : f32 to vector<8x256xf32>
    %30 = arith.maximumf %28, %29 : vector<8x256xf32>
    %31 = arith.truncf %30 : vector<8x256xf32> to vector<8x256xbf16>
    %c0_26 = arith.constant 0 : index
    %c512 = arith.constant 512 : index
    %32 = vector.load %arg15[%c0_26, %c512] : memref<8x4864xbf16, #tpu.memory_space<vmem>>, vector<8x256xbf16>
    tpu.vector_store %arg15[%c0_26, %c512], %31 {strides = array<i32>} : memref<8x4864xbf16, #tpu.memory_space<vmem>>, vector<8x256xbf16>,
    %c0_27 = arith.constant 0 : index
    %c24 = arith.constant 24 : index
    %c0_28 = arith.constant 0 : index
    %33 = vector.load %arg1[%c0_27, %c24, %c0_28] : memref<1x152x128xbf16, #tpu.memory_space<vmem>>, vector<1x8x128xbf16>
    %34 = vector.shape_cast %33 : vector<1x8x128xbf16> to vector<8x128xbf16>
    %c0_29 = arith.constant 0 : index
    %c0_30 = arith.constant 0 : index
    %35 = vector.load %arg2[%c0_29, %c0_30] : memref<128x256xbf16, #tpu.memory_space<vmem>>, vector<128x256xbf16>
    %cst_31 = arith.constant dense<0.000000e+00> : vector<8x256xf32>
    %36 = tpu.matmul %34, %35, %cst_31 {dimension_numbers = #tpu.dot_dimension_numbers<[1], [0], [0], [1], [0, 0, 1, 1], [], []>} : vector<8x128xbf16>, vector<128x256xbf16>, vector<8x256xf32> -> vector<8x256xf32>
    %c0_32 = arith.constant 0 : index
    %c0_33 = arith.constant 0 : index
    %37 = vector.load %arg3[%c0_32, %c0_33] : memref<1x256xf32, #tpu.memory_space<vmem>>, vector<1x256xf32>
    %38 = vector.broadcast %37 : vector<1x256xf32> to vector<8x256xf32>
    %39 = arith.addf %36, %38 : vector<8x256xf32>
    %cst_34 = arith.constant 0.000000e+00 : f32
    %40 = vector.broadcast %cst_34 : f32 to vector<8x256xf32>
    %41 = arith.maximumf %39, %40 : vector<8x256xf32>
    %42 = arith.truncf %41 : vector<8x256xf32> to vector<8x256xbf16>
    %c0_35 = arith.constant 0 : index
    %c768 = arith.constant 768 : index
    %43 = vector.load %arg15[%c0_35, %c768] : memref<8x4864xbf16, #tpu.memory_space<vmem>>, vector<8x256xbf16>
    tpu.vector_store %arg15[%c0_35, %c768], %42 {strides = array<i32>} : memref<8x4864xbf16, #tpu.memory_space<vmem>>, vector<8x256xbf16>,
    %c0_36 = arith.constant 0 : index
    %c32 = arith.constant 32 : index
    %c0_37 = arith.constant 0 : index
    %44 = vector.load %arg1[%c0_36, %c32, %c0_37] : memref<1x152x128xbf16, #tpu.memory_space<vmem>>, vector<1x8x128xbf16>
    %45 = vector.shape_cast %44 : vector<1x8x128xbf16> to vector<8x128xbf16>
    %c0_38 = arith.constant 0 : index
    %c0_39 = arith.constant 0 : index
    %46 = vector.load %arg2[%c0_38, %c0_39] : memref<128x256xbf16, #tpu.memory_space<vmem>>, vector<128x256xbf16>
    %cst_40 = arith.constant dense<0.000000e+00> : vector<8x256xf32>
    %47 = tpu.matmul %45, %46, %cst_40 {dimension_numbers = #tpu.dot_dimension_numbers<[1], [0], [0], [1], [0, 0, 1, 1], [], []>} : vector<8x128xbf16>, vector<128x256xbf16>, vector<8x256xf32> -> vector<8x256xf32>
    %c0_41 = arith.constant 0 : index
    %c0_42 = arith.constant 0 : index
    %48 = vector.load %arg3[%c0_41, %c0_42] : memref<1x256xf32, #tpu.memory_space<vmem>>, vector<1x256xf32>
    %49 = vector.broadcast %48 : vector<1x256xf32> to vector<8x256xf32>
    %50 = arith.addf %47, %49 : vector<8x256xf32>
    %cst_43 = arith.constant 0.000000e+00 : f32
    %51 = vector.broadcast %cst_43 : f32 to vector<8x256xf32>
    %52 = arith.maximumf %50, %51 : vector<8x256xf32>
    %53 = arith.truncf %52 : vector<8x256xf32> to vector<8x256xbf16>
    %c0_44 = arith.constant 0 : index
    %c1024 = arith.constant 1024 : index
    %54 = vector.load %arg15[%c0_44, %c1024] : memref<8x4864xbf16, #tpu.memory_space<vmem>>, vector<8x256xbf16>
    tpu.vector_store %arg15[%c0_44, %c1024], %53 {strides = array<i32>} : memref<8x4864xbf16, #tpu.memory_space<vmem>>, vector<8x256xbf16>,
    %c0_45 = arith.constant 0 : index
    %c40 = arith.constant 40 : index
    %c0_46 = arith.constant 0 : index
    %55 = vector.load %arg1[%c0_45, %c40, %c0_46] : memref<1x152x128xbf16, #tpu.memory_space<vmem>>, vector<1x8x128xbf16>
    %56 = vector.shape_cast %55 : vector<1x8x128xbf16> to vector<8x128xbf16>
    %c0_47 = arith.constant 0 : index
    %c0_48 = arith.constant 0 : index
    %57 = vector.load %arg2[%c0_47, %c0_48] : memref<128x256xbf16, #tpu.memory_space<vmem>>, vector<128x256xbf16>
    %cst_49 = arith.constant dense<0.000000e+00> : vector<8x256xf32>
    %58 = tpu.matmul %56, %57, %cst_49 {dimension_numbers = #tpu.dot_dimension_numbers<[1], [0], [0], [1], [0, 0, 1, 1], [], []>} : vector<8x128xbf16>, vector<128x256xbf16>, vector<8x256xf32> -> vector<8x256xf32>
    %c0_50 = arith.constant 0 : index
    %c0_51 = arith.constant 0 : index
    %59 = vector.load %arg3[%c0_50, %c0_51] : memref<1x256xf32, #tpu.memory_space<vmem>>, vector<1x256xf32>
    %60 = vector.broadcast %59 : vector<1x256xf32> to vector<8x256xf32>
    %61 = arith.addf %58, %60 : vector<8x256xf32>
    %cst_52 = arith.constant 0.000000e+00 : f32
    %62 = vector.broadcast %cst_52 : f32 to vector<8x256xf32>
    %63 = arith.maximumf %61, %62 : vector<8x256xf32>
    %64 = arith.truncf %63 : vector<8x256xf32> to vector<8x256xbf16>
    %c0_53 = arith.constant 0 : index
    %c1280 = arith.constant 1280 : index
    %65 = vector.load %arg15[%c0_53, %c1280] : memref<8x4864xbf16, #tpu.memory_space<vmem>>, vector<8x256xbf16>
    tpu.vector_store %arg15[%c0_53, %c1280], %64 {strides = array<i32>} : memref<8x4864xbf16, #tpu.memory_space<vmem>>, vector<8x256xbf16>,
    %c0_54 = arith.constant 0 : index
    %c48 = arith.constant 48 : index
    %c0_55 = arith.constant 0 : index
    %66 = vector.load %arg1[%c0_54, %c48, %c0_55] : memref<1x152x128xbf16, #tpu.memory_space<vmem>>, vector<1x8x128xbf16>
    %67 = vector.shape_cast %66 : vector<1x8x128xbf16> to vector<8x128xbf16>
    %c0_56 = arith.constant 0 : index
    %c0_57 = arith.constant 0 : index
    %68 = vector.load %arg2[%c0_56, %c0_57] : memref<128x256xbf16, #tpu.memory_space<vmem>>, vector<128x256xbf16>
    %cst_58 = arith.constant dense<0.000000e+00> : vector<8x256xf32>
    %69 = tpu.matmul %67, %68, %cst_58 {dimension_numbers = #tpu.dot_dimension_numbers<[1], [0], [0], [1], [0, 0, 1, 1], [], []>} : vector<8x128xbf16>, vector<128x256xbf16>, vector<8x256xf32> -> vector<8x256xf32>
    %c0_59 = arith.constant 0 : index
    %c0_60 = arith.constant 0 : index
    %70 = vector.load %arg3[%c0_59, %c0_60] : memref<1x256xf32, #tpu.memory_space<vmem>>, vector<1x256xf32>
    %71 = vector.broadcast %70 : vector<1x256xf32> to vector<8x256xf32>
    %72 = arith.addf %69, %71 : vector<8x256xf32>
    %cst_61 = arith.constant 0.000000e+00 : f32
    %73 = vector.broadcast %cst_61 : f32 to vector<8x256xf32>
    %74 = arith.maximumf %72, %73 : vector<8x256xf32>
    %75 = arith.truncf %74 : vector<8x256xf32> to vector<8x256xbf16>
    %c0_62 = arith.constant 0 : index
    %c1536 = arith.constant 1536 : index
    %76 = vector.load %arg15[%c0_62, %c1536] : memref<8x4864xbf16, #tpu.memory_space<vmem>>, vector<8x256xbf16>
    tpu.vector_store %arg15[%c0_62, %c1536], %75 {strides = array<i32>} : memref<8x4864xbf16, #tpu.memory_space<vmem>>, vector<8x256xbf16>,
    %c0_63 = arith.constant 0 : index
    %c56 = arith.constant 56 : index
    %c0_64 = arith.constant 0 : index
    %77 = vector.load %arg1[%c0_63, %c56, %c0_64] : memref<1x152x128xbf16, #tpu.memory_space<vmem>>, vector<1x8x128xbf16>
    %78 = vector.shape_cast %77 : vector<1x8x128xbf16> to vector<8x128xbf16>
    %c0_65 = arith.constant 0 : index
    %c0_66 = arith.constant 0 : index
    %79 = vector.load %arg2[%c0_65, %c0_66] : memref<128x256xbf16, #tpu.memory_space<vmem>>, vector<128x256xbf16>
    %cst_67 = arith.constant dense<0.000000e+00> : vector<8x256xf32>
    %80 = tpu.matmul %78, %79, %cst_67 {dimension_numbers = #tpu.dot_dimension_numbers<[1], [0], [0], [1], [0, 0, 1, 1], [], []>} : vector<8x128xbf16>, vector<128x256xbf16>, vector<8x256xf32> -> vector<8x256xf32>
    %c0_68 = arith.constant 0 : index
    %c0_69 = arith.constant 0 : index
    %81 = vector.load %arg3[%c0_68, %c0_69] : memref<1x256xf32, #tpu.memory_space<vmem>>, vector<1x256xf32>
    %82 = vector.broadcast %81 : vector<1x256xf32> to vector<8x256xf32>
    %83 = arith.addf %80, %82 : vector<8x256xf32>
    %cst_70 = arith.constant 0.000000e+00 : f32
    %84 = vector.broadcast %cst_70 : f32 to vector<8x256xf32>
    %85 = arith.maximumf %83, %84 : vector<8x256xf32>
    %86 = arith.truncf %85 : vector<8x256xf32> to vector<8x256xbf16>
    %c0_71 = arith.constant 0 : index
    %c1792 = arith.constant 1792 : index
    %87 = vector.load %arg15[%c0_71, %c1792] : memref<8x4864xbf16, #tpu.memory_space<vmem>>, vector<8x256xbf16>
    tpu.vector_store %arg15[%c0_71, %c1792], %86 {strides = array<i32>} : memref<8x4864xbf16, #tpu.memory_space<vmem>>, vector<8x256xbf16>,
    %c0_72 = arith.constant 0 : index
    %c64 = arith.constant 64 : index
    %c0_73 = arith.constant 0 : index
    %88 = vector.load %arg1[%c0_72, %c64, %c0_73] : memref<1x152x128xbf16, #tpu.memory_space<vmem>>, vector<1x8x128xbf16>
    %89 = vector.shape_cast %88 : vector<1x8x128xbf16> to vector<8x128xbf16>
    %c0_74 = arith.constant 0 : index
    %c0_75 = arith.constant 0 : index
    %90 = vector.load %arg2[%c0_74, %c0_75] : memref<128x256xbf16, #tpu.memory_space<vmem>>, vector<128x256xbf16>
    %cst_76 = arith.constant dense<0.000000e+00> : vector<8x256xf32>
    %91 = tpu.matmul %89, %90, %cst_76 {dimension_numbers = #tpu.dot_dimension_numbers<[1], [0], [0], [1], [0, 0, 1, 1], [], []>} : vector<8x128xbf16>, vector<128x256xbf16>, vector<8x256xf32> -> vector<8x256xf32>
    %c0_77 = arith.constant 0 : index
    %c0_78 = arith.constant 0 : index
    %92 = vector.load %arg3[%c0_77, %c0_78] : memref<1x256xf32, #tpu.memory_space<vmem>>, vector<1x256xf32>
    %93 = vector.broadcast %92 : vector<1x256xf32> to vector<8x256xf32>
    %94 = arith.addf %91, %93 : vector<8x256xf32>
    %cst_79 = arith.constant 0.000000e+00 : f32
    %95 = vector.broadcast %cst_79 : f32 to vector<8x256xf32>
    %96 = arith.maximumf %94, %95 : vector<8x256xf32>
    %97 = arith.truncf %96 : vector<8x256xf32> to vector<8x256xbf16>
    %c0_80 = arith.constant 0 : index
    %c2048 = arith.constant 2048 : index
    %98 = vector.load %arg15[%c0_80, %c2048] : memref<8x4864xbf16, #tpu.memory_space<vmem>>, vector<8x256xbf16>
    tpu.vector_store %arg15[%c0_80, %c2048], %97 {strides = array<i32>} : memref<8x4864xbf16, #tpu.memory_space<vmem>>, vector<8x256xbf16>,
    %c0_81 = arith.constant 0 : index
    %c72 = arith.constant 72 : index
    %c0_82 = arith.constant 0 : index
    %99 = vector.load %arg1[%c0_81, %c72, %c0_82] : memref<1x152x128xbf16, #tpu.memory_space<vmem>>, vector<1x8x128xbf16>
    %100 = vector.shape_cast %99 : vector<1x8x128xbf16> to vector<8x128xbf16>
    %c0_83 = arith.constant 0 : index
    %c0_84 = arith.constant 0 : index
    %101 = vector.load %arg2[%c0_83, %c0_84] : memref<128x256xbf16, #tpu.memory_space<vmem>>, vector<128x256xbf16>
    %cst_85 = arith.constant dense<0.000000e+00> : vector<8x256xf32>
    %102 = tpu.matmul %100, %101, %cst_85 {dimension_numbers = #tpu.dot_dimension_numbers<[1], [0], [0], [1], [0, 0, 1, 1], [], []>} : vector<8x128xbf16>, vector<128x256xbf16>, vector<8x256xf32> -> vector<8x256xf32>
    %c0_86 = arith.constant 0 : index
    %c0_87 = arith.constant 0 : index
    %103 = vector.load %arg3[%c0_86, %c0_87] : memref<1x256xf32, #tpu.memory_space<vmem>>, vector<1x256xf32>
    %104 = vector.broadcast %103 : vector<1x256xf32> to vector<8x256xf32>
    %105 = arith.addf %102, %104 : vector<8x256xf32>
    %cst_88 = arith.constant 0.000000e+00 : f32
    %106 = vector.broadcast %cst_88 : f32 to vector<8x256xf32>
    %107 = arith.maximumf %105, %106 : vector<8x256xf32>
    %108 = arith.truncf %107 : vector<8x256xf32> to vector<8x256xbf16>
    %c0_89 = arith.constant 0 : index
    %c2304 = arith.constant 2304 : index
    %109 = vector.load %arg15[%c0_89, %c2304] : memref<8x4864xbf16, #tpu.memory_space<vmem>>, vector<8x256xbf16>
    tpu.vector_store %arg15[%c0_89, %c2304], %108 {strides = array<i32>} : memref<8x4864xbf16, #tpu.memory_space<vmem>>, vector<8x256xbf16>,
    %c0_90 = arith.constant 0 : index
    %c80 = arith.constant 80 : index
    %c0_91 = arith.constant 0 : index
    %110 = vector.load %arg1[%c0_90, %c80, %c0_91] : memref<1x152x128xbf16, #tpu.memory_space<vmem>>, vector<1x8x128xbf16>
    %111 = vector.shape_cast %110 : vector<1x8x128xbf16> to vector<8x128xbf16>
    %c0_92 = arith.constant 0 : index
    %c0_93 = arith.constant 0 : index
    %112 = vector.load %arg2[%c0_92, %c0_93] : memref<128x256xbf16, #tpu.memory_space<vmem>>, vector<128x256xbf16>
    %cst_94 = arith.constant dense<0.000000e+00> : vector<8x256xf32>
    %113 = tpu.matmul %111, %112, %cst_94 {dimension_numbers = #tpu.dot_dimension_numbers<[1], [0], [0], [1], [0, 0, 1, 1], [], []>} : vector<8x128xbf16>, vector<128x256xbf16>, vector<8x256xf32> -> vector<8x256xf32>
    %c0_95 = arith.constant 0 : index
    %c0_96 = arith.constant 0 : index
    %114 = vector.load %arg3[%c0_95, %c0_96] : memref<1x256xf32, #tpu.memory_space<vmem>>, vector<1x256xf32>
    %115 = vector.broadcast %114 : vector<1x256xf32> to vector<8x256xf32>
    %116 = arith.addf %113, %115 : vector<8x256xf32>
    %cst_97 = arith.constant 0.000000e+00 : f32
    %117 = vector.broadcast %cst_97 : f32 to vector<8x256xf32>
    %118 = arith.maximumf %116, %117 : vector<8x256xf32>
    %119 = arith.truncf %118 : vector<8x256xf32> to vector<8x256xbf16>
    %c0_98 = arith.constant 0 : index
    %c2560 = arith.constant 2560 : index
    %120 = vector.load %arg15[%c0_98, %c2560] : memref<8x4864xbf16, #tpu.memory_space<vmem>>, vector<8x256xbf16>
    tpu.vector_store %arg15[%c0_98, %c2560], %119 {strides = array<i32>} : memref<8x4864xbf16, #tpu.memory_space<vmem>>, vector<8x256xbf16>,
    %c0_99 = arith.constant 0 : index
    %c88 = arith.constant 88 : index
    %c0_100 = arith.constant 0 : index
    %121 = vector.load %arg1[%c0_99, %c88, %c0_100] : memref<1x152x128xbf16, #tpu.memory_space<vmem>>, vector<1x8x128xbf16>
    %122 = vector.shape_cast %121 : vector<1x8x128xbf16> to vector<8x128xbf16>
    %c0_101 = arith.constant 0 : index
    %c0_102 = arith.constant 0 : index
    %123 = vector.load %arg2[%c0_101, %c0_102] : memref<128x256xbf16, #tpu.memory_space<vmem>>, vector<128x256xbf16>
    %cst_103 = arith.constant dense<0.000000e+00> : vector<8x256xf32>
    %124 = tpu.matmul %122, %123, %cst_103 {dimension_numbers = #tpu.dot_dimension_numbers<[1], [0], [0], [1], [0, 0, 1, 1], [], []>} : vector<8x128xbf16>, vector<128x256xbf16>, vector<8x256xf32> -> vector<8x256xf32>
    %c0_104 = arith.constant 0 : index
    %c0_105 = arith.constant 0 : index
    %125 = vector.load %arg3[%c0_104, %c0_105] : memref<1x256xf32, #tpu.memory_space<vmem>>, vector<1x256xf32>
    %126 = vector.broadcast %125 : vector<1x256xf32> to vector<8x256xf32>
    %127 = arith.addf %124, %126 : vector<8x256xf32>
    %cst_106 = arith.constant 0.000000e+00 : f32
    %128 = vector.broadcast %cst_106 : f32 to vector<8x256xf32>
    %129 = arith.maximumf %127, %128 : vector<8x256xf32>
    %130 = arith.truncf %129 : vector<8x256xf32> to vector<8x256xbf16>
    %c0_107 = arith.constant 0 : index
    %c2816 = arith.constant 2816 : index
    %131 = vector.load %arg15[%c0_107, %c2816] : memref<8x4864xbf16, #tpu.memory_space<vmem>>, vector<8x256xbf16>
    tpu.vector_store %arg15[%c0_107, %c2816], %130 {strides = array<i32>} : memref<8x4864xbf16, #tpu.memory_space<vmem>>, vector<8x256xbf16>,
    %c0_108 = arith.constant 0 : index
    %c96 = arith.constant 96 : index
    %c0_109 = arith.constant 0 : index
    %132 = vector.load %arg1[%c0_108, %c96, %c0_109] : memref<1x152x128xbf16, #tpu.memory_space<vmem>>, vector<1x8x128xbf16>
    %133 = vector.shape_cast %132 : vector<1x8x128xbf16> to vector<8x128xbf16>
    %c0_110 = arith.constant 0 : index
    %c0_111 = arith.constant 0 : index
    %134 = vector.load %arg2[%c0_110, %c0_111] : memref<128x256xbf16, #tpu.memory_space<vmem>>, vector<128x256xbf16>
    %cst_112 = arith.constant dense<0.000000e+00> : vector<8x256xf32>
    %135 = tpu.matmul %133, %134, %cst_112 {dimension_numbers = #tpu.dot_dimension_numbers<[1], [0], [0], [1], [0, 0, 1, 1], [], []>} : vector<8x128xbf16>, vector<128x256xbf16>, vector<8x256xf32> -> vector<8x256xf32>
    %c0_113 = arith.constant 0 : index
    %c0_114 = arith.constant 0 : index
    %136 = vector.load %arg3[%c0_113, %c0_114] : memref<1x256xf32, #tpu.memory_space<vmem>>, vector<1x256xf32>
    %137 = vector.broadcast %136 : vector<1x256xf32> to vector<8x256xf32>
    %138 = arith.addf %135, %137 : vector<8x256xf32>
    %cst_115 = arith.constant 0.000000e+00 : f32
    %139 = vector.broadcast %cst_115 : f32 to vector<8x256xf32>
    %140 = arith.maximumf %138, %139 : vector<8x256xf32>
    %141 = arith.truncf %140 : vector<8x256xf32> to vector<8x256xbf16>
    %c0_116 = arith.constant 0 : index
    %c3072 = arith.constant 3072 : index
    %142 = vector.load %arg15[%c0_116, %c3072] : memref<8x4864xbf16, #tpu.memory_space<vmem>>, vector<8x256xbf16>
    tpu.vector_store %arg15[%c0_116, %c3072], %141 {strides = array<i32>} : memref<8x4864xbf16, #tpu.memory_space<vmem>>, vector<8x256xbf16>,
    %c0_117 = arith.constant 0 : index
    %c104 = arith.constant 104 : index
    %c0_118 = arith.constant 0 : index
    %143 = vector.load %arg1[%c0_117, %c104, %c0_118] : memref<1x152x128xbf16, #tpu.memory_space<vmem>>, vector<1x8x128xbf16>
    %144 = vector.shape_cast %143 : vector<1x8x128xbf16> to vector<8x128xbf16>
    %c0_119 = arith.constant 0 : index
    %c0_120 = arith.constant 0 : index
    %145 = vector.load %arg2[%c0_119, %c0_120] : memref<128x256xbf16, #tpu.memory_space<vmem>>, vector<128x256xbf16>
    %cst_121 = arith.constant dense<0.000000e+00> : vector<8x256xf32>
    %146 = tpu.matmul %144, %145, %cst_121 {dimension_numbers = #tpu.dot_dimension_numbers<[1], [0], [0], [1], [0, 0, 1, 1], [], []>} : vector<8x128xbf16>, vector<128x256xbf16>, vector<8x256xf32> -> vector<8x256xf32>
    %c0_122 = arith.constant 0 : index
    %c0_123 = arith.constant 0 : index
    %147 = vector.load %arg3[%c0_122, %c0_123] : memref<1x256xf32, #tpu.memory_space<vmem>>, vector<1x256xf32>
    %148 = vector.broadcast %147 : vector<1x256xf32> to vector<8x256xf32>
    %149 = arith.addf %146, %148 : vector<8x256xf32>
    %cst_124 = arith.constant 0.000000e+00 : f32
    %150 = vector.broadcast %cst_124 : f32 to vector<8x256xf32>
    %151 = arith.maximumf %149, %150 : vector<8x256xf32>
    %152 = arith.truncf %151 : vector<8x256xf32> to vector<8x256xbf16>
    %c0_125 = arith.constant 0 : index
    %c3328 = arith.constant 3328 : index
    %153 = vector.load %arg15[%c0_125, %c3328] : memref<8x4864xbf16, #tpu.memory_space<vmem>>, vector<8x256xbf16>
    tpu.vector_store %arg15[%c0_125, %c3328], %152 {strides = array<i32>} : memref<8x4864xbf16, #tpu.memory_space<vmem>>, vector<8x256xbf16>,
    %c0_126 = arith.constant 0 : index
    %c112 = arith.constant 112 : index
    %c0_127 = arith.constant 0 : index
    %154 = vector.load %arg1[%c0_126, %c112, %c0_127] : memref<1x152x128xbf16, #tpu.memory_space<vmem>>, vector<1x8x128xbf16>
    %155 = vector.shape_cast %154 : vector<1x8x128xbf16> to vector<8x128xbf16>
    %c0_128 = arith.constant 0 : index
    %c0_129 = arith.constant 0 : index
    %156 = vector.load %arg2[%c0_128, %c0_129] : memref<128x256xbf16, #tpu.memory_space<vmem>>, vector<128x256xbf16>
    %cst_130 = arith.constant dense<0.000000e+00> : vector<8x256xf32>
    %157 = tpu.matmul %155, %156, %cst_130 {dimension_numbers = #tpu.dot_dimension_numbers<[1], [0], [0], [1], [0, 0, 1, 1], [], []>} : vector<8x128xbf16>, vector<128x256xbf16>, vector<8x256xf32> -> vector<8x256xf32>
    %c0_131 = arith.constant 0 : index
    %c0_132 = arith.constant 0 : index
    %158 = vector.load %arg3[%c0_131, %c0_132] : memref<1x256xf32, #tpu.memory_space<vmem>>, vector<1x256xf32>
    %159 = vector.broadcast %158 : vector<1x256xf32> to vector<8x256xf32>
    %160 = arith.addf %157, %159 : vector<8x256xf32>
    %cst_133 = arith.constant 0.000000e+00 : f32
    %161 = vector.broadcast %cst_133 : f32 to vector<8x256xf32>
    %162 = arith.maximumf %160, %161 : vector<8x256xf32>
    %163 = arith.truncf %162 : vector<8x256xf32> to vector<8x256xbf16>
    %c0_134 = arith.constant 0 : index
    %c3584 = arith.constant 3584 : index
    %164 = vector.load %arg15[%c0_134, %c3584] : memref<8x4864xbf16, #tpu.memory_space<vmem>>, vector<8x256xbf16>
    tpu.vector_store %arg15[%c0_134, %c3584], %163 {strides = array<i32>} : memref<8x4864xbf16, #tpu.memory_space<vmem>>, vector<8x256xbf16>,
    %c0_135 = arith.constant 0 : index
    %c120 = arith.constant 120 : index
    %c0_136 = arith.constant 0 : index
    %165 = vector.load %arg1[%c0_135, %c120, %c0_136] : memref<1x152x128xbf16, #tpu.memory_space<vmem>>, vector<1x8x128xbf16>
    %166 = vector.shape_cast %165 : vector<1x8x128xbf16> to vector<8x128xbf16>
    %c0_137 = arith.constant 0 : index
    %c0_138 = arith.constant 0 : index
    %167 = vector.load %arg2[%c0_137, %c0_138] : memref<128x256xbf16, #tpu.memory_space<vmem>>, vector<128x256xbf16>
    %cst_139 = arith.constant dense<0.000000e+00> : vector<8x256xf32>
    %168 = tpu.matmul %166, %167, %cst_139 {dimension_numbers = #tpu.dot_dimension_numbers<[1], [0], [0], [1], [0, 0, 1, 1], [], []>} : vector<8x128xbf16>, vector<128x256xbf16>, vector<8x256xf32> -> vector<8x256xf32>
    %c0_140 = arith.constant 0 : index
    %c0_141 = arith.constant 0 : index
    %169 = vector.load %arg3[%c0_140, %c0_141] : memref<1x256xf32, #tpu.memory_space<vmem>>, vector<1x256xf32>
    %170 = vector.broadcast %169 : vector<1x256xf32> to vector<8x256xf32>
    %171 = arith.addf %168, %170 : vector<8x256xf32>
    %cst_142 = arith.constant 0.000000e+00 : f32
    %172 = vector.broadcast %cst_142 : f32 to vector<8x256xf32>
    %173 = arith.maximumf %171, %172 : vector<8x256xf32>
    %174 = arith.truncf %173 : vector<8x256xf32> to vector<8x256xbf16>
    %c0_143 = arith.constant 0 : index
    %c3840 = arith.constant 3840 : index
    %175 = vector.load %arg15[%c0_143, %c3840] : memref<8x4864xbf16, #tpu.memory_space<vmem>>, vector<8x256xbf16>
    tpu.vector_store %arg15[%c0_143, %c3840], %174 {strides = array<i32>} : memref<8x4864xbf16, #tpu.memory_space<vmem>>, vector<8x256xbf16>,
    %c0_144 = arith.constant 0 : index
    %c128 = arith.constant 128 : index
    %c0_145 = arith.constant 0 : index
    %176 = vector.load %arg1[%c0_144, %c128, %c0_145] : memref<1x152x128xbf16, #tpu.memory_space<vmem>>, vector<1x8x128xbf16>
    %177 = vector.shape_cast %176 : vector<1x8x128xbf16> to vector<8x128xbf16>
    %c0_146 = arith.constant 0 : index
    %c0_147 = arith.constant 0 : index
    %178 = vector.load %arg2[%c0_146, %c0_147] : memref<128x256xbf16, #tpu.memory_space<vmem>>, vector<128x256xbf16>
    %cst_148 = arith.constant dense<0.000000e+00> : vector<8x256xf32>
    %179 = tpu.matmul %177, %178, %cst_148 {dimension_numbers = #tpu.dot_dimension_numbers<[1], [0], [0], [1], [0, 0, 1, 1], [], []>} : vector<8x128xbf16>, vector<128x256xbf16>, vector<8x256xf32> -> vector<8x256xf32>
    %c0_149 = arith.constant 0 : index
    %c0_150 = arith.constant 0 : index
    %180 = vector.load %arg3[%c0_149, %c0_150] : memref<1x256xf32, #tpu.memory_space<vmem>>, vector<1x256xf32>
    %181 = vector.broadcast %180 : vector<1x256xf32> to vector<8x256xf32>
    %182 = arith.addf %179, %181 : vector<8x256xf32>
    %cst_151 = arith.constant 0.000000e+00 : f32
    %183 = vector.broadcast %cst_151 : f32 to vector<8x256xf32>
    %184 = arith.maximumf %182, %183 : vector<8x256xf32>
    %185 = arith.truncf %184 : vector<8x256xf32> to vector<8x256xbf16>
    %c0_152 = arith.constant 0 : index
    %c4096 = arith.constant 4096 : index
    %186 = vector.load %arg15[%c0_152, %c4096] : memref<8x4864xbf16, #tpu.memory_space<vmem>>, vector<8x256xbf16>
    tpu.vector_store %arg15[%c0_152, %c4096], %185 {strides = array<i32>} : memref<8x4864xbf16, #tpu.memory_space<vmem>>, vector<8x256xbf16>,
    %c0_153 = arith.constant 0 : index
    %c136 = arith.constant 136 : index
    %c0_154 = arith.constant 0 : index
    %187 = vector.load %arg1[%c0_153, %c136, %c0_154] : memref<1x152x128xbf16, #tpu.memory_space<vmem>>, vector<1x8x128xbf16>
    %188 = vector.shape_cast %187 : vector<1x8x128xbf16> to vector<8x128xbf16>
    %c0_155 = arith.constant 0 : index
    %c0_156 = arith.constant 0 : index
    %189 = vector.load %arg2[%c0_155, %c0_156] : memref<128x256xbf16, #tpu.memory_space<vmem>>, vector<128x256xbf16>
    %cst_157 = arith.constant dense<0.000000e+00> : vector<8x256xf32>
    %190 = tpu.matmul %188, %189, %cst_157 {dimension_numbers = #tpu.dot_dimension_numbers<[1], [0], [0], [1], [0, 0, 1, 1], [], []>} : vector<8x128xbf16>, vector<128x256xbf16>, vector<8x256xf32> -> vector<8x256xf32>
    %c0_158 = arith.constant 0 : index
    %c0_159 = arith.constant 0 : index
    %191 = vector.load %arg3[%c0_158, %c0_159] : memref<1x256xf32, #tpu.memory_space<vmem>>, vector<1x256xf32>
    %192 = vector.broadcast %191 : vector<1x256xf32> to vector<8x256xf32>
    %193 = arith.addf %190, %192 : vector<8x256xf32>
    %cst_160 = arith.constant 0.000000e+00 : f32
    %194 = vector.broadcast %cst_160 : f32 to vector<8x256xf32>
    %195 = arith.maximumf %193, %194 : vector<8x256xf32>
    %196 = arith.truncf %195 : vector<8x256xf32> to vector<8x256xbf16>
    %c0_161 = arith.constant 0 : index
    %c4352 = arith.constant 4352 : index
    %197 = vector.load %arg15[%c0_161, %c4352] : memref<8x4864xbf16, #tpu.memory_space<vmem>>, vector<8x256xbf16>
    tpu.vector_store %arg15[%c0_161, %c4352], %196 {strides = array<i32>} : memref<8x4864xbf16, #tpu.memory_space<vmem>>, vector<8x256xbf16>,
    %c0_162 = arith.constant 0 : index
    %c144 = arith.constant 144 : index
    %c0_163 = arith.constant 0 : index
    %198 = vector.load %arg1[%c0_162, %c144, %c0_163] : memref<1x152x128xbf16, #tpu.memory_space<vmem>>, vector<1x8x128xbf16>
    %199 = vector.shape_cast %198 : vector<1x8x128xbf16> to vector<8x128xbf16>
    %c0_164 = arith.constant 0 : index
    %c0_165 = arith.constant 0 : index
    %200 = vector.load %arg2[%c0_164, %c0_165] : memref<128x256xbf16, #tpu.memory_space<vmem>>, vector<128x256xbf16>
    %cst_166 = arith.constant dense<0.000000e+00> : vector<8x256xf32>
    %201 = tpu.matmul %199, %200, %cst_166 {dimension_numbers = #tpu.dot_dimension_numbers<[1], [0], [0], [1], [0, 0, 1, 1], [], []>} : vector<8x128xbf16>, vector<128x256xbf16>, vector<8x256xf32> -> vector<8x256xf32>
    %c0_167 = arith.constant 0 : index
    %c0_168 = arith.constant 0 : index
    %202 = vector.load %arg3[%c0_167, %c0_168] : memref<1x256xf32, #tpu.memory_space<vmem>>, vector<1x256xf32>
    %203 = vector.broadcast %202 : vector<1x256xf32> to vector<8x256xf32>
    %204 = arith.addf %201, %203 : vector<8x256xf32>
    %cst_169 = arith.constant 0.000000e+00 : f32
    %205 = vector.broadcast %cst_169 : f32 to vector<8x256xf32>
    %206 = arith.maximumf %204, %205 : vector<8x256xf32>
    %207 = arith.truncf %206 : vector<8x256xf32> to vector<8x256xbf16>
    %c0_170 = arith.constant 0 : index
    %c4608 = arith.constant 4608 : index
    %208 = vector.load %arg15[%c0_170, %c4608] : memref<8x4864xbf16, #tpu.memory_space<vmem>>, vector<8x256xbf16>
    tpu.vector_store %arg15[%c0_170, %c4608], %207 {strides = array<i32>} : memref<8x4864xbf16, #tpu.memory_space<vmem>>, vector<8x256xbf16>,
    %c0_171 = arith.constant 0 : index
    %c0_172 = arith.constant 0 : index
    %209 = vector.load %arg15[%c0_171, %c0_172] : memref<8x4864xbf16, #tpu.memory_space<vmem>>, vector<8x4864xbf16>
    %c0_173 = arith.constant 0 : index
    %c0_174 = arith.constant 0 : index
    %210 = vector.load %arg4[%c0_173, %c0_174] : memref<4864x64xbf16, #tpu.memory_space<vmem>>, vector<4864x64xbf16>
    %cst_175 = arith.constant dense<0.000000e+00> : vector<8x64xf32>
    %211 = tpu.matmul %209, %210, %cst_175 {dimension_numbers = #tpu.dot_dimension_numbers<[1], [0], [0], [1], [0, 0, 1, 1], [], []>} : vector<8x4864xbf16>, vector<4864x64xbf16>, vector<8x64xf32> -> vector<8x64xf32>
    %c0_176 = arith.constant 0 : index
    %c0_177 = arith.constant 0 : index
    %212 = vector.load %arg5[%c0_176, %c0_177] : memref<1x64xf32, #tpu.memory_space<vmem>>, vector<1x64xf32>
    %213 = vector.broadcast %212 : vector<1x64xf32> to vector<8x64xf32>
    %214 = arith.addf %211, %213 : vector<8x64xf32>
    %cst_178 = arith.constant 0.000000e+00 : f32
    %215 = vector.broadcast %cst_178 : f32 to vector<8x64xf32>
    %216 = arith.maximumf %214, %215 : vector<8x64xf32>
    %c0_179 = arith.constant 0 : index
    %c0_180 = arith.constant 0 : index
    %217 = vector.load %arg6[%c0_179, %c0_180] : memref<64x128xf32, #tpu.memory_space<vmem>>, vector<64x128xf32>
    %cst_181 = arith.constant dense<0.000000e+00> : vector<8x128xf32>
    %218 = tpu.matmul %216, %217, %cst_181 {dimension_numbers = #tpu.dot_dimension_numbers<[1], [0], [0], [1], [0, 0, 1, 1], [], []>} : vector<8x64xf32>, vector<64x128xf32>, vector<8x128xf32> -> vector<8x128xf32>
    %c0_182 = arith.constant 0 : index
    %c0_183 = arith.constant 0 : index
    %219 = vector.load %arg7[%c0_182, %c0_183] : memref<1x128xf32, #tpu.memory_space<vmem>>, vector<1x128xf32>
    %220 = vector.broadcast %219 : vector<1x128xf32> to vector<8x128xf32>
    %221 = arith.addf %218, %220 : vector<8x128xf32>
    %c0_184 = arith.constant 0 : index
    %c0_185 = arith.constant 0 : index
    %c0_186 = arith.constant 0 : index
    %222 = vector.load %arg14[%c0_184, %c0_185, %c0_186] : memref<1x8x128xf32, #tpu.memory_space<vmem>>, vector<1x8x128xf32>
    %223 = vector.shape_cast %222 : vector<1x8x128xf32> to vector<8x128xf32>
    %224 = vector.shape_cast %221 : vector<8x128xf32> to vector<1x8x128xf32>
    tpu.vector_store %arg14[%c0_184, %c0_185, %c0_186], %224 {strides = array<i32>} : memref<1x8x128xf32, #tpu.memory_space<vmem>>, vector<1x8x128xf32>,
    %225 = vector.extract_strided_slice %221 {offsets = [0, 0], sizes = [8, 8], strides = [1, 1]} : vector<8x128xf32> to vector<8x8xf32>
    %226 = vector.extract_strided_slice %221 {offsets = [0, 8], sizes = [8, 8], strides = [1, 1]} : vector<8x128xf32> to vector<8x8xf32>
    %c0_187 = arith.constant 0 : index
    %c0_188 = arith.constant 0 : index
    %c0_189 = arith.constant 0 : index
    %227 = vector.load %arg8[%c0_187, %c0_188, %c0_189] : memref<1x8x128xf32, #tpu.memory_space<vmem>>, vector<1x8x8xf32>
    %228 = vector.shape_cast %227 : vector<1x8x8xf32> to vector<8x8xf32>
    %c0_190 = arith.constant 0 : index
    %c0_191 = arith.constant 0 : index
    %c8_192 = arith.constant 8 : index
    %229 = vector.load %arg8[%c0_190, %c0_191, %c8_192] : memref<1x8x128xf32, #tpu.memory_space<vmem>>, vector<1x8x1xf32>
    %230 = vector.shape_cast %229 : vector<1x8x1xf32> to vector<8x1xf32>
    %cst_193 = arith.constant 5.000000e-01 : f32
    %231 = vector.broadcast %cst_193 : f32 to vector<8x8xf32>
    %232 = arith.mulf %231, %226 : vector<8x8xf32>
    %233 = math.exp %232 : vector<8x8xf32>
    %234 = arith.mulf %228, %233 : vector<8x8xf32>
    %235 = arith.addf %234, %225 : vector<8x8xf32>
    %c0_194 = arith.constant 0 : index
    %c0_195 = arith.constant 0 : index
    %236 = vector.load %arg9[%c0_194, %c0_195] : memref<9x64xf32, #tpu.memory_space<vmem>>, vector<8x64xf32>
    %cst_196 = arith.constant dense<0.000000e+00> : vector<8x64xf32>
    %237 = tpu.matmul %235, %236, %cst_196 {dimension_numbers = #tpu.dot_dimension_numbers<[1], [0], [0], [1], [0, 0, 1, 1], [], []>} : vector<8x8xf32>, vector<8x64xf32>, vector<8x64xf32> -> vector<8x64xf32>
    %c8_197 = arith.constant 8 : index
    %c0_198 = arith.constant 0 : index
    %238 = vector.load %arg9[%c8_197, %c0_198] : memref<9x64xf32, #tpu.memory_space<vmem>>, vector<1x64xf32>
    %239 = vector.broadcast %230 : vector<8x1xf32> to vector<8x64xf32>
    %240 = vector.broadcast %238 : vector<1x64xf32> to vector<8x64xf32>
    %241 = arith.mulf %239, %240 : vector<8x64xf32>
    %242 = arith.addf %237, %241 : vector<8x64xf32>
    %c0_199 = arith.constant 0 : index
    %c0_200 = arith.constant 0 : index
    %243 = vector.load %arg10[%c0_199, %c0_200] : memref<1x64xf32, #tpu.memory_space<vmem>>, vector<1x64xf32>
    %244 = vector.broadcast %243 : vector<1x64xf32> to vector<8x64xf32>
    %245 = arith.addf %242, %244 : vector<8x64xf32>
    %cst_201 = arith.constant 0.000000e+00 : f32
    %246 = vector.broadcast %cst_201 : f32 to vector<8x64xf32>
    %247 = arith.maximumf %245, %246 : vector<8x64xf32>
    %248 = arith.truncf %247 : vector<8x64xf32> to vector<8x64xbf16>
    %c0_202 = arith.constant 0 : index
    %c0_203 = arith.constant 0 : index
    %249 = vector.load %arg11[%c0_202, %c0_203] : memref<64x640xbf16, #tpu.memory_space<vmem>>, vector<64x640xbf16>
    %cst_204 = arith.constant dense<0.000000e+00> : vector<8x640xf32>
    %250 = tpu.matmul %248, %249, %cst_204 {dimension_numbers = #tpu.dot_dimension_numbers<[1], [0], [0], [1], [0, 0, 1, 1], [], []>} : vector<8x64xbf16>, vector<64x640xbf16>, vector<8x640xf32> -> vector<8x640xf32>
    %c0_205 = arith.constant 0 : index
    %c0_206 = arith.constant 0 : index
    %251 = vector.load %arg12[%c0_205, %c0_206] : memref<1x640xf32, #tpu.memory_space<vmem>>, vector<1x640xf32>
    %252 = vector.broadcast %251 : vector<1x640xf32> to vector<8x640xf32>
    %253 = arith.addf %250, %252 : vector<8x640xf32>
    %254 = arith.negf %253 : vector<8x640xf32>
    %255 = math.exp %254 : vector<8x640xf32>
    %cst_207 = arith.constant 1.000000e+00 : f32
    %256 = vector.broadcast %cst_207 : f32 to vector<8x640xf32>
    %257 = arith.addf %256, %255 : vector<8x640xf32>
    %258 = arith.divf %256, %257 : vector<8x640xf32>
    %c0_208 = arith.constant 0 : index
    %c0_209 = arith.constant 0 : index
    %c0_210 = arith.constant 0 : index
    %259 = vector.load %arg13[%c0_208, %c0_209, %c0_210] : memref<1x8x640xf32, #tpu.memory_space<vmem>>, vector<1x8x640xf32>
    %260 = vector.shape_cast %259 : vector<1x8x640xf32> to vector<8x640xf32>
    %261 = vector.shape_cast %258 : vector<8x640xf32> to vector<1x8x640xf32>
    tpu.vector_store %arg13[%c0_208, %c0_209, %c0_210], %261 {strides = array<i32>} : memref<1x8x640xf32, #tpu.memory_space<vmem>>, vector<1x8x640xf32>,
    return
  }
  func.func @transform_0(%arg0: i32) -> (i32, i32, i32) {
    %c0_i32 = arith.constant 0 : i32
    %c0_i32_0 = arith.constant 0 : i32
    %c0_i32_1 = arith.constant 0 : i32
    return %arg0, %c0_i32, %c0_i32_0 : i32, i32, i32
  }
  func.func @transform_1(%arg0: i32) -> (i32, i32) {
    %c0_i32 = arith.constant 0 : i32
    %c0_i32_0 = arith.constant 0 : i32
    %c0_i32_1 = arith.constant 0 : i32
    return %c0_i32, %c0_i32_0 : i32, i32
  }
  func.func @transform_2(%arg0: i32) -> (i32, i32) {
    %c0_i32 = arith.constant 0 : i32
    %c0_i32_0 = arith.constant 0 : i32
    %c0_i32_1 = arith.constant 0 : i32
    return %c0_i32, %c0_i32_0 : i32, i32
  }
  func.func @transform_3(%arg0: i32) -> (i32, i32) {
    %c0_i32 = arith.constant 0 : i32
    %c0_i32_0 = arith.constant 0 : i32
    %c0_i32_1 = arith.constant 0 : i32
    return %c0_i32, %c0_i32_0 : i32, i32
  }
  func.func @transform_4(%arg0: i32) -> (i32, i32) {
    %c0_i32 = arith.constant 0 : i32
    %c0_i32_0 = arith.constant 0 : i32
    %c0_i32_1 = arith.constant 0 : i32
    return %c0_i32, %c0_i32_0 : i32, i32
  }
  func.func @transform_5(%arg0: i32) -> (i32, i32) {
    %c0_i32 = arith.constant 0 : i32
    %c0_i32_0 = arith.constant 0 : i32
    %c0_i32_1 = arith.constant 0 : i32
    return %c0_i32, %c0_i32_0 : i32, i32
  }
  func.func @transform_6(%arg0: i32) -> (i32, i32) {
    %c0_i32 = arith.constant 0 : i32
    %c0_i32_0 = arith.constant 0 : i32
    %c0_i32_1 = arith.constant 0 : i32
    return %c0_i32, %c0_i32_0 : i32, i32
  }
  func.func @transform_7(%arg0: i32) -> (i32, i32, i32) {
    %c0_i32 = arith.constant 0 : i32
    %c0_i32_0 = arith.constant 0 : i32
    %c0_i32_1 = arith.constant 0 : i32
    return %arg0, %c0_i32, %c0_i32_0 : i32, i32, i32
  }
  func.func @transform_8(%arg0: i32) -> (i32, i32) {
    %c0_i32 = arith.constant 0 : i32
    %c0_i32_0 = arith.constant 0 : i32
    %c0_i32_1 = arith.constant 0 : i32
    return %c0_i32, %c0_i32_0 : i32, i32
  }
  func.func @transform_9(%arg0: i32) -> (i32, i32) {
    %c0_i32 = arith.constant 0 : i32
    %c0_i32_0 = arith.constant 0 : i32
    %c0_i32_1 = arith.constant 0 : i32
    return %c0_i32, %c0_i32_0 : i32, i32
  }
  func.func @transform_10(%arg0: i32) -> (i32, i32) {
    %c0_i32 = arith.constant 0 : i32
    %c0_i32_0 = arith.constant 0 : i32
    %c0_i32_1 = arith.constant 0 : i32
    return %c0_i32, %c0_i32_0 : i32, i32
  }
  func.func @transform_11(%arg0: i32) -> (i32, i32) {
    %c0_i32 = arith.constant 0 : i32
    %c0_i32_0 = arith.constant 0 : i32
    %c0_i32_1 = arith.constant 0 : i32
    return %c0_i32, %c0_i32_0 : i32, i32
  }
  func.func @transform_12(%arg0: i32) -> (i32, i32, i32) {
    %c0_i32 = arith.constant 0 : i32
    %c0_i32_0 = arith.constant 0 : i32
    %c0_i32_1 = arith.constant 0 : i32
    return %arg0, %c0_i32, %c0_i32_0 : i32, i32, i32
  }
  func.func @transform_13(%arg0: i32) -> (i32, i32, i32) {
    %c0_i32 = arith.constant 0 : i32
    %c0_i32_0 = arith.constant 0 : i32
    %c0_i32_1 = arith.constant 0 : i32
    return %arg0, %c0_i32, %c0_i32_0 : i32, i32, i32
  }
}

</mosaic_0001>

<bundles_post_ra>
// kernel: cvae_forward.1
= control target key start
LH: loop header
LB: loop body
LE: loop exit
PB: predicated region body
PF: predicated region fallthrough
CT: control target
= control target key end

     0   :  { %vm5666_vm0 = vcmask 523264   ;;  %vm5710_vm1 = vcmask 64512   ;;  %s12466_s1 = inlined_call_operand.vmem [shape: bf16[128,256], index: 1, kind: input, shape index: {}]   ;;  %s12467_s0 = inlined_call_operand.vmem [shape: bf16[1,152,128], index: 0, kind: input, shape index: {}]   ;;  %s12468_s2 = inlined_call_operand.vmem [shape: f32[1,256], index: 2, kind: input, shape index: {}]   ;;  %s12469_s3 = inlined_call_operand.vmem [shape: bf16[4864,64], index: 3, kind: input, shape index: {}]   ;;  %s12470_s4 = inlined_call_operand.vmem [shape: f32[1,64], index: 4, kind: input, shape index: {}]   ;;  %s12471_s6 = inlined_call_operand.vmem [shape: f32[1,128], index: 6, kind: input, shape index: {}]   ;;  %s12472_s5 = inlined_call_operand.vmem [shape: f32[64,128], index: 5, kind: input, shape index: {}]   ;;  %s12473_s8 = inlined_call_operand.vmem [shape: f32[9,64], index: 8, kind: input, shape index: {}]   ;;  %s12474_s13 = inlined_call_operand.vmem [shape: f32[1,8,128], index: 13, kind: output, shape index: {1}]   ;;  %s12475_s9 = inlined_call_operand.vmem [shape: f32[1,64], index: 9, kind: input, shape index: {}]   ;;  %s12476_s7 = inlined_call_operand.vmem [shape: f32[1,8,128], index: 7, kind: input, shape index: {}]   ;;  %s12477_s10 = inlined_call_operand.vmem [shape: bf16[64,640], index: 10, kind: input, shape index: {}]   ;;  %s12478_s11 = inlined_call_operand.vmem [shape: f32[1,640], index: 11, kind: input, shape index: {}]   ;;  %s12479_s12 = inlined_call_operand.vmem [shape: f32[1,8,640], index: 12, kind: output, shape index: {0}]  }
   0x1   :  { %v6115_v0 = vld [vmem:[%s12466_s1 + $0x70] sm:$0xf]  ;;  %v8596_v1 = vld [vmem:[%s12466_s1 + $0x74] sm:$0xf0]  ;;  %v8595_v2 = vld [vmem:[%s12466_s1 + $0x74] sm:$0xf] }
   0x2   :  { %v6116_v3 = vor.u32 %v8596_v1, %v6115_v0  ;;  %v6117_v4 = vld [vmem:[%s12466_s1 + $0x78] sm:$0xf0]  ;;  %v6179_v5 = vld [vmem:[%s12466_s1 + $0x70] sm:$0xf]  ;;  %v8612_v6 = vld [vmem:[%s12466_s1 + $0x74] sm:$0xf0] }
   0x3   :  { %v6120_v7 = vor.u32 %v8595_v2, %v6117_v4  ;;  %v6180_v8 = vor.u32 %v8612_v6, %v6179_v5  ;;  %v8611_v9 = vld [vmem:[%s12466_s1 + $0x74] sm:$0xf]  ;;  %v6181_v10 = vld [vmem:[%s12466_s1 + $0x78] sm:$0xf0]  ;;  %v6107_v11 = vld [vmem:[%s12466_s1 + $0x60] sm:$0xf] }
   0x4   :  { %147 = vmatpush.bf16.msra.mxu0 %v6116_v3  ;;  %v6184_v12 = vor.u32 %v8611_v9, %v6181_v10  ;;  %v8594_v13 = vld [vmem:[%s12466_s1 + $0x64] sm:$0xf0]  ;;  %v8593_v14 = vld [vmem:[%s12466_s1 + $0x64] sm:$0xf]  ;;  %v6109_v15 = vld [vmem:[%s12466_s1 + $0x68] sm:$0xf0] }
   0x5   :  { %160 = vmatpush.bf16.msra.mxu1 %v6120_v7  ;;  %280 = vmatpush.bf16.msra.mxu2 %v6180_v8  ;;  %v6108_v16 = vor.u32 %v8594_v13, %v6107_v11  ;;  %v6112_v17 = vor.u32 %v8593_v14, %v6109_v15  ;;  %v6171_v18 = vld [vmem:[%s12466_s1 + $0x60] sm:$0xf]  ;;  %v8610_v19 = vld [vmem:[%s12466_s1 + $0x64] sm:$0xf0]  ;;  %v8609_v20 = vld [vmem:[%s12466_s1 + $0x64] sm:$0xf] }
   0x6   :  { %293 = vmatpush.bf16.msra.mxu3 %v6184_v12  ;;  %v6172_v21 = vor.u32 %v8610_v19, %v6171_v18  ;;  %v6173_v22 = vld [vmem:[%s12466_s1 + $0x68] sm:$0xf0]  ;;  %v6099_v23 = vld [vmem:[%s12466_s1 + $0x50] sm:$0xf]  ;;  %v8592_v24 = vld [vmem:[%s12466_s1 + $0x54] sm:$0xf0] }
   0x7   :  { %v6176_v25 = vor.u32 %v8609_v20, %v6173_v22  ;;  %v8591_v26 = vld [vmem:[%s12466_s1 + $0x54] sm:$0xf]  ;;  %v6101_v27 = vld [vmem:[%s12466_s1 + $0x58] sm:$0xf0]  ;;  %v6163_v28 = vld [vmem:[%s12466_s1 + $0x50] sm:$0xf]  ;;  %v6100_v29 = vor.u32 %v8592_v24, %v6099_v23 }
   0x8   :  { %148 = vmatpush.bf16.msra.mxu0 %v6108_v16  ;;  %v8608_v30 = vld [vmem:[%s12466_s1 + $0x54] sm:$0xf0]  ;;  %v8607_v31 = vld [vmem:[%s12466_s1 + $0x54] sm:$0xf]  ;;  %v6165_v32 = vld [vmem:[%s12466_s1 + $0x58] sm:$0xf0]  ;;  %v6104_v33 = vor.u32 %v8591_v26, %v6101_v27 }
   0x9   :  { %161 = vmatpush.bf16.msra.mxu1 %v6112_v17  ;;  %281 = vmatpush.bf16.msra.mxu2 %v6172_v21  ;;  %v6164_v34 = vor.u32 %v8608_v30, %v6163_v28  ;;  %v6091_v35 = vld [vmem:[%s12466_s1 + $0x40] sm:$0xf]  ;;  %v8590_v36 = vld [vmem:[%s12466_s1 + $0x44] sm:$0xf0]  ;;  %v8589_v37 = vld [vmem:[%s12466_s1 + $0x44] sm:$0xf]  ;;  %v6168_v38 = vor.u32 %v8607_v31, %v6165_v32 }
   0xa   :  { %294 = vmatpush.bf16.msra.mxu3 %v6176_v25  ;;  %v6093_v39 = vld [vmem:[%s12466_s1 + $0x48] sm:$0xf0]  ;;  %v6155_v40 = vld [vmem:[%s12466_s1 + $0x40] sm:$0xf]  ;;  %v8606_v41 = vld [vmem:[%s12466_s1 + $0x44] sm:$0xf0]  ;;  %v6092_v44 = vor.u32 %v8590_v36, %v6091_v35 }
   0xb   :  { %v8605_v42 = vld [vmem:[%s12466_s1 + $0x44] sm:$0xf]  ;;  %v6157_v43 = vld [vmem:[%s12466_s1 + $0x48] sm:$0xf0]  ;;  %v6096_v45 = vor.u32 %v8589_v37, %v6093_v39  ;;  %v6156_v46 = vor.u32 %v8606_v41, %v6155_v40  ;;  %v6083_v47 = vld [vmem:[%s12466_s1 + $0x30] sm:$0xf] }
   0xc   :  { %149 = vmatpush.bf16.msra.mxu0 %v6100_v29  ;;  %v8588_v48 = vld [vmem:[%s12466_s1 + $0x34] sm:$0xf0]  ;;  %v8587_v49 = vld [vmem:[%s12466_s1 + $0x34] sm:$0xf]  ;;  %v6160_v50 = vor.u32 %v8605_v42, %v6157_v43  ;;  %v6085_v51 = vld [vmem:[%s12466_s1 + $0x38] sm:$0xf0] }
   0xd   :  { %162 = vmatpush.bf16.msra.mxu1 %v6104_v33  ;;  %282 = vmatpush.bf16.msra.mxu2 %v6164_v34  ;;  %v6147_v52 = vld [vmem:[%s12466_s1 + $0x30] sm:$0xf]  ;;  %v8604_v53 = vld [vmem:[%s12466_s1 + $0x34] sm:$0xf0]  ;;  %v8603_v54 = vld [vmem:[%s12466_s1 + $0x34] sm:$0xf]  ;;  %v6084_v56 = vor.u32 %v8588_v48, %v6083_v47  ;;  %v6088_v57 = vor.u32 %v8587_v49, %v6085_v51 }
   0xe   :  { %295 = vmatpush.bf16.msra.mxu3 %v6168_v38  ;;  %v6149_v55 = vld [vmem:[%s12466_s1 + $0x38] sm:$0xf0]  ;;  %v6148_v58 = vor.u32 %v8604_v53, %v6147_v52  ;;  %v6075_v59 = vld [vmem:[%s12466_s1 + $0x20] sm:$0xf]  ;;  %v8586_v60 = vld [vmem:[%s12466_s1 + $0x24] sm:$0xf0] }
   0xf   :  { %v8585_v61 = vld [vmem:[%s12466_s1 + $0x24] sm:$0xf]  ;;  %v6152_v62 = vor.u32 %v8603_v54, %v6149_v55  ;;  %v6077_v63 = vld [vmem:[%s12466_s1 + $0x28] sm:$0xf0]  ;;  %v6139_v0 = vld [vmem:[%s12466_s1 + $0x20] sm:$0xf]  ;;  %v6076_v4 = vor.u32 %v8586_v60, %v6075_v59 }
  0x10   :  { %150 = vmatpush.bf16.msra.mxu0 %v6092_v44  ;;  %v8602_v1 = vld [vmem:[%s12466_s1 + $0x24] sm:$0xf0]  ;;  %v8601_v2 = vld [vmem:[%s12466_s1 + $0x24] sm:$0xf]  ;;  %v6141_v3 = vld [vmem:[%s12466_s1 + $0x28] sm:$0xf0]  ;;  %v6080_v5 = vor.u32 %v8585_v61, %v6077_v63 }
  0x11   :  { %163 = vmatpush.bf16.msra.mxu1 %v6096_v45  ;;  %283 = vmatpush.bf16.msra.mxu2 %v6156_v46  ;;  %v6140_v6 = vor.u32 %v8602_v1, %v6139_v0  ;;  %v6067_v7 = vld [vmem:[%s12466_s1 + $0x10] sm:$0xf]  ;;  %v8584_v8 = vld [vmem:[%s12466_s1 + $0x14] sm:$0xf0]  ;;  %v8583_v9 = vld [vmem:[%s12466_s1 + $0x14] sm:$0xf]  ;;  %v6144_v10 = vor.u32 %v8601_v2, %v6141_v3 }
  0x12   :  { %296 = vmatpush.bf16.msra.mxu3 %v6160_v50  ;;  %v6069_v11 = vld [vmem:[%s12466_s1 + $0x18] sm:$0xf0]  ;;  %v6131_v12 = vld [vmem:[%s12466_s1 + $0x10] sm:$0xf]  ;;  %v8600_v13 = vld [vmem:[%s12466_s1 + $0x14] sm:$0xf0]  ;;  %v6068_v16 = vor.u32 %v8584_v8, %v6067_v7 }
  0x13   :  { %v8599_v14 = vld [vmem:[%s12466_s1 + $0x14] sm:$0xf]  ;;  %v6133_v15 = vld [vmem:[%s12466_s1 + $0x18] sm:$0xf0]  ;;  %v6059_v17 = vld [vmem:[%s12466_s1] sm:$0xf]  ;;  %v6072_v19 = vor.u32 %v8583_v9, %v6069_v11  ;;  %v6132_v20 = vor.u32 %v8600_v13, %v6131_v12 }
  0x14   :  { %151 = vmatpush.bf16.msra.mxu0 %v6084_v56  ;;  %v8582_v18 = vld [vmem:[%s12466_s1 + $0x4] sm:$0xf0]  ;;  %v8581_v21 = vld [vmem:[%s12466_s1 + $0x4] sm:$0xf]  ;;  %v6061_v22 = vld [vmem:[%s12466_s1 + $0x8] sm:$0xf0]  ;;  %v6136_v24 = vor.u32 %v8599_v14, %v6133_v15 }
  0x15   :  { %164 = vmatpush.bf16.msra.mxu1 %v6088_v57  ;;  %284 = vmatpush.bf16.msra.mxu2 %v6148_v58  ;;  %v6123_v23 = vld [vmem:[%s12466_s1] sm:$0xf]  ;;  %v8598_v25 = vld [vmem:[%s12466_s1 + $0x4] sm:$0xf0]  ;;  %v8597_v26 = vld [vmem:[%s12466_s1 + $0x4] sm:$0xf]  ;;  %v6060_v31 = vor.u32 %v8582_v18, %v6059_v17  ;;  %v6064_v35 = vor.u32 %v8581_v21, %v6061_v22 }
  0x16   :  { %297 = vmatpush.bf16.msra.mxu3 %v6152_v62  ;;  %v6125_v27 = vld [vmem:[%s12466_s1 + $0x8] sm:$0xf0]  ;;  %v6243_v28 = vld [vmem:[%s12466_s1 + $0x70] sm:$0xf]  ;;  %v8628_v29 = vld [vmem:[%s12466_s1 + $0x74] sm:$0xf0]  ;;  %v6124_v36 = vor.u32 %v8598_v25, %v6123_v23 }
  0x17   :  { %v8627_v30 = vld [vmem:[%s12466_s1 + $0x74] sm:$0xf]  ;;  %v6245_v32 = vld [vmem:[%s12466_s1 + $0x78] sm:$0xf0]  ;;  %v6307_v33 = vld [vmem:[%s12466_s1 + $0x70] sm:$0xf]  ;;  %v6128_v39 = vor.u32 %v8597_v26, %v6125_v27  ;;  %v6244_v40 = vor.u32 %v8628_v29, %v6243_v28 }
  0x18   :  { %152 = vmatpush.bf16.msra.mxu0 %v6076_v4  ;;  %v8644_v34 = vld [vmem:[%s12466_s1 + $0x74] sm:$0xf0]  ;;  %v8643_v37 = vld [vmem:[%s12466_s1 + $0x74] sm:$0xf]  ;;  %v6309_v38 = vld [vmem:[%s12466_s1 + $0x78] sm:$0xf0]  ;;  %v6248_v41 = vor.u32 %v8627_v30, %v6245_v32 }
  0x19   :  { %165 = vmatpush.bf16.msra.mxu1 %v6080_v5  ;;  %285 = vmatpush.bf16.msra.mxu2 %v6140_v6  ;;  %v6308_v42 = vor.u32 %v8644_v34, %v6307_v33  ;;  %v6235_v43 = vld [vmem:[%s12466_s1 + $0x60] sm:$0xf]  ;;  %v8626_v44 = vld [vmem:[%s12466_s1 + $0x64] sm:$0xf0]  ;;  %v8625_v45 = vld [vmem:[%s12466_s1 + $0x64] sm:$0xf]  ;;  %v6312_v46 = vor.u32 %v8643_v37, %v6309_v38 }
  0x1a   :  { %298 = vmatpush.bf16.msra.mxu3 %v6144_v10  ;;  %v6237_v47 = vld [vmem:[%s12466_s1 + $0x68] sm:$0xf0]  ;;  %v6299_v48 = vld [vmem:[%s12466_s1 + $0x60] sm:$0xf]  ;;  %v8642_v49 = vld [vmem:[%s12466_s1 + $0x64] sm:$0xf0]  ;;  %v6236_v52 = vor.u32 %v8626_v44, %v6235_v43 }
  0x1b   :  { %v8641_v50 = vld [vmem:[%s12466_s1 + $0x64] sm:$0xf]  ;;  %v6301_v51 = vld [vmem:[%s12466_s1 + $0x68] sm:$0xf0]  ;;  %v6240_v53 = vor.u32 %v8625_v45, %v6237_v47  ;;  %v6300_v54 = vor.u32 %v8642_v49, %v6299_v48  ;;  %v6227_v55 = vld [vmem:[%s12466_s1 + $0x50] sm:$0xf] }
  0x1c   :  { %153 = vmatpush.bf16.msra.mxu0 %v6068_v16  ;;  %v8624_v56 = vld [vmem:[%s12466_s1 + $0x54] sm:$0xf0]  ;;  %v8623_v57 = vld [vmem:[%s12466_s1 + $0x54] sm:$0xf]  ;;  %v6304_v58 = vor.u32 %v8641_v50, %v6301_v51  ;;  %v6229_v59 = vld [vmem:[%s12466_s1 + $0x58] sm:$0xf0] }
  0x1d   :  { %166 = vmatpush.bf16.msra.mxu1 %v6072_v19  ;;  %286 = vmatpush.bf16.msra.mxu2 %v6132_v20  ;;  %v6291_v60 = vld [vmem:[%s12466_s1 + $0x50] sm:$0xf]  ;;  %v8640_v61 = vld [vmem:[%s12466_s1 + $0x54] sm:$0xf0]  ;;  %v8639_v62 = vld [vmem:[%s12466_s1 + $0x54] sm:$0xf]  ;;  %v6228_v0 = vor.u32 %v8624_v56, %v6227_v55  ;;  %v6232_v3 = vor.u32 %v8623_v57, %v6229_v59 }
  0x1e   :  { %299 = vmatpush.bf16.msra.mxu3 %v6136_v24  ;;  %v6293_v63 = vld [vmem:[%s12466_s1 + $0x58] sm:$0xf0]  ;;  %v177_v1 = vld [vmem:[%s12467_s0 + $0x4] sm:$0xf]  ;;  %v44_v2 = vld [vmem:[%s12467_s0] sm:$0xf]  ;;  %v6292_v4 = vor.u32 %v8640_v61, %v6291_v60 }
  0x1f   :  { %v6219_v5 = vld [vmem:[%s12466_s1 + $0x40] sm:$0xf]  ;;  %v8622_v6 = vld [vmem:[%s12466_s1 + $0x44] sm:$0xf0]  ;;  %v8621_v7 = vld [vmem:[%s12466_s1 + $0x44] sm:$0xf]  ;;  %v6296_v8 = vor.u32 %v8639_v62, %v6293_v63 }
  0x20   :  { %154 = vmatpush.bf16.msra.mxu0 %v6060_v31  ;;  %v6221_v9 = vld [vmem:[%s12466_s1 + $0x48] sm:$0xf0]  ;;  %v6283_v10 = vld [vmem:[%s12466_s1 + $0x40] sm:$0xf]  ;;  %v8638_v11 = vld [vmem:[%s12466_s1 + $0x44] sm:$0xf0]  ;;  %v6220_v14 = vor.u32 %v8622_v6, %v6219_v5 }
  0x21   :  { %167 = vmatpush.bf16.msra.mxu1 %v6064_v35  ;;  %287 = vmatpush.bf16.msra.mxu2 %v6124_v36  ;;  %v8637_v12 = vld [vmem:[%s12466_s1 + $0x44] sm:$0xf]  ;;  %v6285_v13 = vld [vmem:[%s12466_s1 + $0x48] sm:$0xf0]  ;;  %v6224_v15 = vor.u32 %v8621_v7, %v6221_v9  ;;  %v6284_v16 = vor.u32 %v8638_v11, %v6283_v10  ;;  %v6211_v17 = vld [vmem:[%s12466_s1 + $0x30] sm:$0xf] }
  0x22   :  { %300 = vmatpush.bf16.msra.mxu3 %v6128_v39  ;;  %v8620_v18 = vld [vmem:[%s12466_s1 + $0x34] sm:$0xf0]  ;;  %v8619_v19 = vld [vmem:[%s12466_s1 + $0x34] sm:$0xf]  ;;  %v6288_v20 = vor.u32 %v8637_v12, %v6285_v13  ;;  %v6213_v21 = vld [vmem:[%s12466_s1 + $0x38] sm:$0xf0] }
  0x23   :  { %155 = vmatmul.bf16.vlgmr.msra.gmra.mxu0 %v44_v2  ;;  %v6275_v22 = vld [vmem:[%s12466_s1 + $0x30] sm:$0xf]  ;;  %v8636_v23 = vld [vmem:[%s12466_s1 + $0x34] sm:$0xf0]  ;;  %v8635_v24 = vld [vmem:[%s12466_s1 + $0x34] sm:$0xf]  ;;  %v6212_v26 = vor.u32 %v8620_v18, %v6211_v17  ;;  %v6216_v27 = vor.u32 %v8619_v19, %v6213_v21 }
  0x24   :  { %413 = vmatpush.bf16.msrb.mxu0 %v6244_v40  ;;  %288 = vmatmul.bf16.vlgmr.msra.gmra.mxu2 %v177_v1  ;;  %v6277_v25 = vld [vmem:[%s12466_s1 + $0x38] sm:$0xf0]  ;;  %v6276_v28 = vor.u32 %v8636_v23, %v6275_v22  ;;  %v6203_v29 = vld [vmem:[%s12466_s1 + $0x20] sm:$0xf]  ;;  %v8618_v30 = vld [vmem:[%s12466_s1 + $0x24] sm:$0xf0] }
  0x25   :  { %426 = vmatpush.bf16.msrb.mxu1 %v6248_v41  ;;  %546 = vmatpush.bf16.msrb.mxu2 %v6308_v42  ;;  %v8617_v31 = vld [vmem:[%s12466_s1 + $0x24] sm:$0xf]  ;;  %v6280_v32 = vor.u32 %v8635_v24, %v6277_v25  ;;  %v6205_v33 = vld [vmem:[%s12466_s1 + $0x28] sm:$0xf0]  ;;  %v6267_v34 = vld [vmem:[%s12466_s1 + $0x20] sm:$0xf]  ;;  %v6204_v38 = vor.u32 %v8618_v30, %v6203_v29 }
  0x26   :  { %559 = vmatpush.bf16.msrb.mxu3 %v6312_v46  ;;  %168 = vmatmul.bf16.vlgmr.msra.gmra.mxu1 %v44_v2  ;;  %v8634_v35 = vld [vmem:[%s12466_s1 + $0x24] sm:$0xf0]  ;;  %v8633_v36 = vld [vmem:[%s12466_s1 + $0x24] sm:$0xf]  ;;  %v6269_v37 = vld [vmem:[%s12466_s1 + $0x28] sm:$0xf0]  ;;  %v6208_v39 = vor.u32 %v8617_v31, %v6205_v33 }
  0x27   :  { %301 = vmatmul.bf16.vlgmr.msra.gmra.mxu3 %v177_v1  ;;  %v6268_v40 = vor.u32 %v8634_v35, %v6267_v34  ;;  %v6195_v41 = vld [vmem:[%s12466_s1 + $0x10] sm:$0xf]  ;;  %v8616_v42 = vld [vmem:[%s12466_s1 + $0x14] sm:$0xf0]  ;;  %v8615_v43 = vld [vmem:[%s12466_s1 + $0x14] sm:$0xf]  ;;  %v6272_v44 = vor.u32 %v8633_v36, %v6269_v37 }
  0x28   :  { %414 = vmatpush.bf16.msrb.mxu0 %v6236_v52  ;;  %v6197_v45 = vld [vmem:[%s12466_s1 + $0x18] sm:$0xf0]  ;;  %v6259_v46 = vld [vmem:[%s12466_s1 + $0x10] sm:$0xf]  ;;  %v8632_v47 = vld [vmem:[%s12466_s1 + $0x14] sm:$0xf0]  ;;  %v6196_v50 = vor.u32 %v8616_v42, %v6195_v41 }
  0x29   :  { %427 = vmatpush.bf16.msrb.mxu1 %v6240_v53  ;;  %547 = vmatpush.bf16.msrb.mxu2 %v6300_v54  ;;  %v8631_v48 = vld [vmem:[%s12466_s1 + $0x14] sm:$0xf]  ;;  %v6261_v49 = vld [vmem:[%s12466_s1 + $0x18] sm:$0xf0]  ;;  %v6187_v51 = vld [vmem:[%s12466_s1] sm:$0xf]  ;;  %v6200_v53 = vor.u32 %v8615_v43, %v6197_v45  ;;  %v6260_v54 = vor.u32 %v8632_v47, %v6259_v46 }
  0x2a   :  { %560 = vmatpush.bf16.msrb.mxu3 %v6304_v58  ;;  %v8614_v52 = vld [vmem:[%s12466_s1 + $0x4] sm:$0xf0]  ;;  %v8613_v55 = vld [vmem:[%s12466_s1 + $0x4] sm:$0xf]  ;;  %v6189_v56 = vld [vmem:[%s12466_s1 + $0x8] sm:$0xf0]  ;;  %v6264_v58 = vor.u32 %v8631_v48, %v6261_v49 }
  0x2b   :  { %v6251_v57 = vld [vmem:[%s12466_s1] sm:$0xf]  ;;  %v8630_v59 = vld [vmem:[%s12466_s1 + $0x4] sm:$0xf0]  ;;  %v8629_v60 = vld [vmem:[%s12466_s1 + $0x4] sm:$0xf]  ;;  %v6188_v1 = vor.u32 %v8614_v52, %v6187_v51  ;;  %v6192_v5 = vor.u32 %v8613_v55, %v6189_v56 }
  0x2c   :  { %415 = vmatpush.bf16.msrb.mxu0 %v6228_v0  ;;  %v6253_v61 = vld [vmem:[%s12466_s1 + $0x8] sm:$0xf0]  ;;  %v6371_v62 = vld [vmem:[%s12466_s1 + $0x70] sm:$0xf]  ;;  %v8660_v63 = vld [vmem:[%s12466_s1 + $0x74] sm:$0xf0]  ;;  %v6252_v6 = vor.u32 %v8630_v59, %v6251_v57 }
  0x2d   :  { %428 = vmatpush.bf16.msrb.mxu1 %v6232_v3  ;;  %548 = vmatpush.bf16.msrb.mxu2 %v6292_v4  ;;  %v8659_v0 = vld [vmem:[%s12466_s1 + $0x74] sm:$0xf]  ;;  %v6373_v2 = vld [vmem:[%s12466_s1 + $0x78] sm:$0xf0]  ;;  %v6435_v3 = vld [vmem:[%s12466_s1 + $0x70] sm:$0xf]  ;;  %v6256_v9 = vor.u32 %v8629_v60, %v6253_v61  ;;  %v6372_v10 = vor.u32 %v8660_v63, %v6371_v62 }
  0x2e   :  { %561 = vmatpush.bf16.msrb.mxu3 %v6296_v8  ;;  %v8676_v4 = vld [vmem:[%s12466_s1 + $0x74] sm:$0xf0]  ;;  %v8675_v7 = vld [vmem:[%s12466_s1 + $0x74] sm:$0xf]  ;;  %v6437_v8 = vld [vmem:[%s12466_s1 + $0x78] sm:$0xf0]  ;;  %v6376_v11 = vor.u32 %v8659_v0, %v6373_v2 }
  0x2f   :  { %v6436_v12 = vor.u32 %v8676_v4, %v6435_v3  ;;  %v6363_v13 = vld [vmem:[%s12466_s1 + $0x60] sm:$0xf]  ;;  %v6365_v17 = vld [vmem:[%s12466_s1 + $0x68] sm:$0xf0]  ;;  %v8674_v19 = vld [vmem:[%s12466_s1 + $0x64] sm:$0xf0] }
  0x30   :  { %416 = vmatpush.bf16.msrb.mxu0 %v6220_v14  ;;  %v8658_v14 = vld [vmem:[%s12466_s1 + $0x64] sm:$0xf0]  ;;  %v6427_v18 = vld [vmem:[%s12466_s1 + $0x60] sm:$0xf]  ;;  %v6429_v21 = vld [vmem:[%s12466_s1 + $0x68] sm:$0xf0] }
  0x31   :  { %429 = vmatpush.bf16.msrb.mxu1 %v6224_v15  ;;  %549 = vmatpush.bf16.msrb.mxu2 %v6284_v16  ;;  %v8657_v15 = vld [vmem:[%s12466_s1 + $0x64] sm:$0xf]  ;;  %v6440_v16 = vor.u32 %v8675_v7, %v6437_v8  ;;  %v443_v22 = vld [vmem:[%s12467_s0 + $0xc] sm:$0xf]  ;;  %v6364_v23 = vor.u32 %v8658_v14, %v6363_v13  ;;  %v310_v24 = vld [vmem:[%s12467_s0 + $0x8] sm:$0xf] }
  0x32   :  { %562 = vmatpush.bf16.msrb.mxu3 %v6288_v20  ;;  %v8673_v20 = vld [vmem:[%s12466_s1 + $0x64] sm:$0xf]  ;;  %v6368_v25 = vor.u32 %v8657_v15, %v6365_v17  ;;  %v8655_v29 = vld [vmem:[%s12466_s1 + $0x54] sm:$0xf]  ;;  %v6357_v31 = vld [vmem:[%s12466_s1 + $0x58] sm:$0xf0] }
  0x33   :  { %v6432_v30 = vor.u32 %v8673_v20, %v6429_v21  ;;  %v8672_v33 = vld [vmem:[%s12466_s1 + $0x54] sm:$0xf0]  ;;  %v8671_v34 = vld [vmem:[%s12466_s1 + $0x54] sm:$0xf]  ;;  %v6421_v35 = vld [vmem:[%s12466_s1 + $0x58] sm:$0xf0]  ;;  %v6360_v37 = vor.u32 %v8655_v29, %v6357_v31 }
  0x34   :  { %417 = vmatpush.bf16.msrb.mxu0 %v6212_v26  ;;  %v6428_v26 = vor.u32 %v8674_v19, %v6427_v18  ;;  %v8653_v41 = vld [vmem:[%s12466_s1 + $0x44] sm:$0xf]  ;;  %v6424_v42 = vor.u32 %v8671_v34, %v6421_v35  ;;  %v6349_v43 = vld [vmem:[%s12466_s1 + $0x48] sm:$0xf0]  ;;  %v8670_v45 = vld [vmem:[%s12466_s1 + $0x44] sm:$0xf0] }
  0x35   :  { %430 = vmatpush.bf16.msrb.mxu1 %v6216_v27  ;;  %550 = vmatpush.bf16.msrb.mxu2 %v6276_v28  ;;  %v6355_v27 = vld [vmem:[%s12466_s1 + $0x50] sm:$0xf]  ;;  %v8656_v28 = vld [vmem:[%s12466_s1 + $0x54] sm:$0xf0]  ;;  %v8669_v46 = vld [vmem:[%s12466_s1 + $0x44] sm:$0xf]  ;;  %v6352_v49 = vor.u32 %v8653_v41, %v6349_v43 }
  0x36   :  { %563 = vmatpush.bf16.msrb.mxu3 %v6280_v32  ;;  %v6419_v32 = vld [vmem:[%s12466_s1 + $0x50] sm:$0xf]  ;;  %v6356_v36 = vor.u32 %v8656_v28, %v6355_v27  ;;  %v6413_v47 = vld [vmem:[%s12466_s1 + $0x48] sm:$0xf0]  ;;  %v8652_v52 = vld [vmem:[%s12466_s1 + $0x34] sm:$0xf0] }
  0x37   :  { %v6339_v51 = vld [vmem:[%s12466_s1 + $0x30] sm:$0xf]  ;;  %v6341_v55 = vld [vmem:[%s12466_s1 + $0x38] sm:$0xf0]  ;;  %v8668_v57 = vld [vmem:[%s12466_s1 + $0x34] sm:$0xf0] }
  0x38   :  { %418 = vmatpush.bf16.msrb.mxu0 %v6204_v38  ;;  %v6420_v38 = vor.u32 %v8672_v33, %v6419_v32  ;;  %v6403_v56 = vld [vmem:[%s12466_s1 + $0x30] sm:$0xf]  ;;  %v6405_v59 = vld [vmem:[%s12466_s1 + $0x38] sm:$0xf0]  ;;  %v6340_v60 = vor.u32 %v8652_v52, %v6339_v51  ;;  %v6331_v63 = vld [vmem:[%s12466_s1 + $0x20] sm:$0xf] }
  0x39   :  { %431 = vmatpush.bf16.msrb.mxu1 %v6208_v39  ;;  %551 = vmatpush.bf16.msrb.mxu2 %v6268_v40  ;;  %v6347_v39 = vld [vmem:[%s12466_s1 + $0x40] sm:$0xf]  ;;  %v8654_v40 = vld [vmem:[%s12466_s1 + $0x44] sm:$0xf0]  ;;  %v6404_v62 = vor.u32 %v8668_v57, %v6403_v56  ;;  %v6333_v3 = vld [vmem:[%s12466_s1 + $0x28] sm:$0xf0] }
  0x3a   :  { %564 = vmatpush.bf16.msrb.mxu3 %v6272_v44  ;;  %v6411_v44 = vld [vmem:[%s12466_s1 + $0x40] sm:$0xf]  ;;  %v6348_v48 = vor.u32 %v8654_v40, %v6347_v39  ;;  %v8650_v0 = vld [vmem:[%s12466_s1 + $0x24] sm:$0xf0]  ;;  %v6397_v7 = vld [vmem:[%s12466_s1 + $0x28] sm:$0xf0] }
  0x3b   :  { %v6395_v4 = vld [vmem:[%s12466_s1 + $0x20] sm:$0xf]  ;;  %v6332_v8 = vor.u32 %v8650_v0, %v6331_v63  ;;  %v8647_v13 = vld [vmem:[%s12466_s1 + $0x14] sm:$0xf]  ;;  %v6325_v15 = vld [vmem:[%s12466_s1 + $0x18] sm:$0xf0] }
  0x3c   :  { %419 = vmatpush.bf16.msrb.mxu0 %v6196_v50  ;;  %v6412_v50 = vor.u32 %v8670_v45, %v6411_v44  ;;  %v8664_v17 = vld [vmem:[%s12466_s1 + $0x14] sm:$0xf0]  ;;  %v8663_v18 = vld [vmem:[%s12466_s1 + $0x14] sm:$0xf]  ;;  %v6389_v19 = vld [vmem:[%s12466_s1 + $0x18] sm:$0xf0] }
  0x3d   :  { %432 = vmatpush.bf16.msrb.mxu1 %v6200_v53  ;;  %552 = vmatpush.bf16.msrb.mxu2 %v6260_v54  ;;  %v8651_v53 = vld [vmem:[%s12466_s1 + $0x34] sm:$0xf]  ;;  %v6416_v54 = vor.u32 %v8669_v46, %v6413_v47  ;;  %v6315_v21 = vld [vmem:[%s12466_s1] sm:$0xf]  ;;  %v6392_v28 = vor.u32 %v8663_v18, %v6389_v19  ;;  %v8662_v29 = vld [vmem:[%s12466_s1 + $0x4] sm:$0xf0] }
  0x3e   :  { %565 = vmatpush.bf16.msrb.mxu3 %v6264_v58  ;;  %v8667_v58 = vld [vmem:[%s12466_s1 + $0x34] sm:$0xf]  ;;  %v6344_v61 = vor.u32 %v8651_v53, %v6341_v55  ;;  %v6379_v27 = vld [vmem:[%s12466_s1] sm:$0xf]  ;;  %v6381_v31 = vld [vmem:[%s12466_s1 + $0x8] sm:$0xf0] }
  0x3f   :  { %v6408_v2 = vor.u32 %v8667_v58, %v6405_v59  ;;  %v6499_v32 = vld [vmem:[%s12466_s1 + $0x70] sm:$0xf]  ;;  %v8692_v33 = vld [vmem:[%s12466_s1 + $0x74] sm:$0xf0]  ;;  %v8691_v34 = vld [vmem:[%s12466_s1 + $0x74] sm:$0xf]  ;;  %v6380_v40 = vor.u32 %v8662_v29, %v6379_v27 }
  0x40   :  { %420 = vmatpush.bf16.msrb.mxu0 %v6188_v1  ;;  %v8649_v1 = vld [vmem:[%s12466_s1 + $0x24] sm:$0xf]  ;;  %v8707_v41 = vld [vmem:[%s12466_s1 + $0x74] sm:$0xf]  ;;  %v6500_v44 = vor.u32 %v8692_v33, %v6499_v32  ;;  %v6491_v47 = vld [vmem:[%s12466_s1 + $0x60] sm:$0xf] }
  0x41   :  { %433 = vmatpush.bf16.msrb.mxu1 %v6192_v5  ;;  %553 = vmatpush.bf16.msrb.mxu2 %v6252_v6  ;;  %v8666_v5 = vld [vmem:[%s12466_s1 + $0x24] sm:$0xf0]  ;;  %v8665_v6 = vld [vmem:[%s12466_s1 + $0x24] sm:$0xf]  ;;  %v6493_v51 = vld [vmem:[%s12466_s1 + $0x68] sm:$0xf0] }
  0x42   :  { %566 = vmatpush.bf16.msrb.mxu3 %v6256_v9  ;;  %v6336_v9 = vor.u32 %v8649_v1, %v6333_v3  ;;  %v6400_v14 = vor.u32 %v8665_v6, %v6397_v7  ;;  %v6555_v52 = vld [vmem:[%s12466_s1 + $0x60] sm:$0xf]  ;;  %v8706_v53 = vld [vmem:[%s12466_s1 + $0x64] sm:$0xf0]  ;;  %v6557_v55 = vld [vmem:[%s12466_s1 + $0x68] sm:$0xf0] }
  0x43   :  { %421 = vmatmul.bf16.vlgmr.msrb.gmra.mxu0 %v310_v24  ;;  %v709_v56 = vld [vmem:[%s12467_s0 + $0x14] sm:$0xf]  ;;  %v576_v58 = vld [vmem:[%s12467_s0 + $0x10] sm:$0xf]  ;;  %v6485_v1 = vld [vmem:[%s12466_s1 + $0x58] sm:$0xf0] }
  0x44   :  { %679 = vmatpush.bf16.msra.mxu0 %v6372_v10  ;;  %554 = vmatmul.bf16.vlgmr.msrb.gmra.mxu2 %v443_v22  ;;  %v6396_v10 = vor.u32 %v8666_v5, %v6395_v4  ;;  %v8687_v63 = vld [vmem:[%s12466_s1 + $0x54] sm:$0xf]  ;;  %v8704_v3 = vld [vmem:[%s12466_s1 + $0x54] sm:$0xf0]  ;;  %v6549_v5 = vld [vmem:[%s12466_s1 + $0x58] sm:$0xf0] }
  0x45   :  { %692 = vmatpush.bf16.msra.mxu1 %v6376_v11  ;;  %812 = vmatpush.bf16.msra.mxu2 %v6436_v12  ;;  %v6323_v11 = vld [vmem:[%s12466_s1 + $0x10] sm:$0xf]  ;;  %v8648_v12 = vld [vmem:[%s12466_s1 + $0x14] sm:$0xf0]  ;;  %v8703_v4 = vld [vmem:[%s12466_s1 + $0x54] sm:$0xf]  ;;  %v6488_v7 = vor.u32 %v8687_v63, %v6485_v1 }
  0x46   :  { %825 = vmatpush.bf16.msra.mxu3 %v6440_v16  ;;  %434 = vmatmul.bf16.vlgmr.msrb.gmra.mxu1 %v310_v24  ;;  %v6387_v16 = vld [vmem:[%s12466_s1 + $0x10] sm:$0xf]  ;;  %v6324_v20 = vor.u32 %v8648_v12, %v6323_v11  ;;  %v8685_v11 = vld [vmem:[%s12466_s1 + $0x44] sm:$0xf]  ;;  %v6552_v12 = vor.u32 %v8703_v4, %v6549_v5  ;;  %v8700_v27 = vld [vmem:[%s12466_s1 + $0x34] sm:$0xf0] }
  0x47   :  { %567 = vmatmul.bf16.vlgmr.msrb.gmra.mxu3 %v443_v22  ;;  %v8646_v22 = vld [vmem:[%s12466_s1 + $0x4] sm:$0xf0]  ;;  %v6388_v24 = vor.u32 %v8664_v17, %v6387_v16  ;;  %v8701_v16 = vld [vmem:[%s12466_s1 + $0x44] sm:$0xf]  ;;  %v6541_v17 = vld [vmem:[%s12466_s1 + $0x48] sm:$0xf0] }
  0x48   :  { %680 = vmatpush.bf16.msra.mxu0 %v6364_v23  ;;  %v6328_v23 = vor.u32 %v8647_v13, %v6325_v15  ;;  %v6316_v35 = vor.u32 %v8646_v22, %v6315_v21  ;;  %v6477_v13 = vld [vmem:[%s12466_s1 + $0x48] sm:$0xf0]  ;;  %v8702_v15 = vld [vmem:[%s12466_s1 + $0x44] sm:$0xf0]  ;;  %v6467_v21 = vld [vmem:[%s12466_s1 + $0x30] sm:$0xf] }
  0x49   :  { %693 = vmatpush.bf16.msra.mxu1 %v6368_v25  ;;  %813 = vmatpush.bf16.msra.mxu2 %v6428_v26  ;;  %v8645_v25 = vld [vmem:[%s12466_s1 + $0x4] sm:$0xf]  ;;  %v6317_v26 = vld [vmem:[%s12466_s1 + $0x8] sm:$0xf0]  ;;  %v6480_v19 = vor.u32 %v8685_v11, %v6477_v13  ;;  %v8684_v22 = vld [vmem:[%s12466_s1 + $0x34] sm:$0xf0] }
  0x4a   :  { %826 = vmatpush.bf16.msra.mxu3 %v6432_v30  ;;  %v8661_v30 = vld [vmem:[%s12466_s1 + $0x4] sm:$0xf]  ;;  %v6320_v39 = vor.u32 %v8645_v25, %v6317_v26  ;;  %v6469_v25 = vld [vmem:[%s12466_s1 + $0x38] sm:$0xf0]  ;;  %v6531_v26 = vld [vmem:[%s12466_s1 + $0x30] sm:$0xf] }
  0x4b   :  { %v6384_v43 = vor.u32 %v8661_v30, %v6381_v31  ;;  %v6533_v29 = vld [vmem:[%s12466_s1 + $0x38] sm:$0xf0]  ;;  %v6468_v30 = vor.u32 %v8684_v22, %v6467_v21  ;;  %v6532_v32 = vor.u32 %v8700_v27, %v6531_v26  ;;  %v6459_v33 = vld [vmem:[%s12466_s1 + $0x20] sm:$0xf]  ;;  %v8694_v63 = vld [vmem:[%s12466_s1 + $0x4] sm:$0xf0] }
  0x4c   :  { %681 = vmatpush.bf16.msra.mxu0 %v6356_v36  ;;  %v6501_v36 = vld [vmem:[%s12466_s1 + $0x78] sm:$0xf0]  ;;  %v6509_v1 = vld [vmem:[%s12466_s1 + $0x8] sm:$0xf0]  ;;  %v8723_v4 = vld [vmem:[%s12466_s1 + $0x74] sm:$0xf] }
  0x4d   :  { %694 = vmatpush.bf16.msra.mxu1 %v6360_v37  ;;  %814 = vmatpush.bf16.msra.mxu2 %v6420_v38  ;;  %v6563_v37 = vld [vmem:[%s12466_s1 + $0x70] sm:$0xf]  ;;  %v8708_v38 = vld [vmem:[%s12466_s1 + $0x74] sm:$0xf0]  ;;  %v6504_v45 = vor.u32 %v8691_v34, %v6501_v36  ;;  %v8682_v34 = vld [vmem:[%s12466_s1 + $0x24] sm:$0xf0] }
  0x4e   :  { %827 = vmatpush.bf16.msra.mxu3 %v6424_v42  ;;  %v6565_v42 = vld [vmem:[%s12466_s1 + $0x78] sm:$0xf0]  ;;  %v6564_v46 = vor.u32 %v8708_v38, %v6563_v37  ;;  %v6461_v37 = vld [vmem:[%s12466_s1 + $0x28] sm:$0xf0]  ;;  %v6523_v38 = vld [vmem:[%s12466_s1 + $0x20] sm:$0xf] }
  0x4f   :  { %v8739_v11 = vld [vmem:[%s12466_s1 + $0x74] sm:$0xf]  ;;  %v6621_v21 = vld [vmem:[%s12466_s1 + $0x68] sm:$0xf0]  ;;  %v6683_v22 = vld [vmem:[%s12466_s1 + $0x60] sm:$0xf] }
  0x50   :  { %682 = vmatpush.bf16.msra.mxu0 %v6348_v48  ;;  %v8690_v48 = vld [vmem:[%s12466_s1 + $0x64] sm:$0xf0]  ;;  %v975_v26 = vld [vmem:[%s12467_s0 + $0x1c] sm:$0xf] }
  0x51   :  { %695 = vmatpush.bf16.msra.mxu1 %v6352_v49  ;;  %815 = vmatpush.bf16.msra.mxu2 %v6412_v50  ;;  %v8689_v49 = vld [vmem:[%s12466_s1 + $0x64] sm:$0xf]  ;;  %v6568_v50 = vor.u32 %v8707_v41, %v6565_v42  ;;  %v6492_v57 = vor.u32 %v8690_v48, %v6491_v47  ;;  %v6525_v41 = vld [vmem:[%s12466_s1 + $0x28] sm:$0xf0]  ;;  %v6460_v42 = vor.u32 %v8682_v34, %v6459_v33  ;;  %v8679_v47 = vld [vmem:[%s12466_s1 + $0x14] sm:$0xf] }
  0x52   :  { %828 = vmatpush.bf16.msra.mxu3 %v6416_v54  ;;  %v8705_v54 = vld [vmem:[%s12466_s1 + $0x64] sm:$0xf]  ;;  %v6496_v59 = vor.u32 %v8689_v49, %v6493_v51  ;;  %v6453_v49 = vld [vmem:[%s12466_s1 + $0x18] sm:$0xf0]  ;;  %v8696_v51 = vld [vmem:[%s12466_s1 + $0x14] sm:$0xf0] }
  0x53   :  { %v6560_v0 = vor.u32 %v8705_v54, %v6557_v55  ;;  %v6443_v55 = vld [vmem:[%s12466_s1] sm:$0xf]  ;;  %v8719_v33 = vld [vmem:[%s12466_s1 + $0x54] sm:$0xf] }
  0x54   :  { %683 = vmatpush.bf16.msra.mxu0 %v6340_v60  ;;  %v6556_v60 = vor.u32 %v8706_v53, %v6555_v52  ;;  %v8695_v52 = vld [vmem:[%s12466_s1 + $0x14] sm:$0xf]  ;;  %v6517_v53 = vld [vmem:[%s12466_s1 + $0x18] sm:$0xf0] }
  0x55   :  { %696 = vmatpush.bf16.msra.mxu1 %v6344_v61  ;;  %816 = vmatpush.bf16.msra.mxu2 %v6404_v62  ;;  %v6483_v61 = vld [vmem:[%s12466_s1 + $0x50] sm:$0xf]  ;;  %v8688_v62 = vld [vmem:[%s12466_s1 + $0x54] sm:$0xf0] }
  0x56   :  { %829 = vmatpush.bf16.msra.mxu3 %v6408_v2  ;;  %v6547_v2 = vld [vmem:[%s12466_s1 + $0x50] sm:$0xf]  ;;  %v6484_v6 = vor.u32 %v8688_v62, %v6483_v61  ;;  %v6507_v61 = vld [vmem:[%s12466_s1] sm:$0xf]  ;;  %v6520_v62 = vor.u32 %v8695_v52, %v6517_v53 }
  0x58   :  { %684 = vmatpush.bf16.msra.mxu0 %v6332_v8  ;;  %v6548_v8 = vor.u32 %v8704_v3, %v6547_v2  ;;  %v6627_v2 = vld [vmem:[%s12466_s1 + $0x70] sm:$0xf]  ;;  %v8724_v3 = vld [vmem:[%s12466_s1 + $0x74] sm:$0xf0] }
  0x59   :  { %697 = vmatpush.bf16.msra.mxu1 %v6336_v9  ;;  %817 = vmatpush.bf16.msra.mxu2 %v6396_v10  ;;  %v6475_v9 = vld [vmem:[%s12466_s1 + $0x40] sm:$0xf]  ;;  %v8686_v10 = vld [vmem:[%s12466_s1 + $0x44] sm:$0xf0] }
  0x5a   :  { %830 = vmatpush.bf16.msra.mxu3 %v6400_v14  ;;  %v6539_v14 = vld [vmem:[%s12466_s1 + $0x40] sm:$0xf]  ;;  %v6476_v18 = vor.u32 %v8686_v10, %v6475_v9  ;;  %v6508_v10 = vor.u32 %v8694_v63, %v6507_v61  ;;  %v8732_v61 = vld [vmem:[%s12466_s1 + $0x34] sm:$0xf0]  ;;  %v6661_v63 = vld [vmem:[%s12466_s1 + $0x38] sm:$0xf0] }
  0x5c   :  { %685 = vmatpush.bf16.msra.mxu0 %v6324_v20  ;;  %v6540_v20 = vor.u32 %v8702_v15, %v6539_v14  ;;  %v6628_v14 = vor.u32 %v8724_v3, %v6627_v2  ;;  %v6587_v3 = vld [vmem:[%s12466_s1 + $0x20] sm:$0xf] }
  0x5d   :  { %698 = vmatpush.bf16.msra.mxu1 %v6328_v23  ;;  %818 = vmatpush.bf16.msra.mxu2 %v6388_v24  ;;  %v8683_v23 = vld [vmem:[%s12466_s1 + $0x34] sm:$0xf]  ;;  %v6544_v24 = vor.u32 %v8701_v16, %v6541_v17  ;;  %v6619_v17 = vld [vmem:[%s12466_s1 + $0x60] sm:$0xf] }
  0x5e   :  { %831 = vmatpush.bf16.msra.mxu3 %v6392_v28  ;;  %v8699_v28 = vld [vmem:[%s12466_s1 + $0x34] sm:$0xf]  ;;  %v6472_v31 = vor.u32 %v8683_v23, %v6469_v25  ;;  %v8738_v23 = vld [vmem:[%s12466_s1 + $0x64] sm:$0xf0]  ;;  %v6685_v25 = vld [vmem:[%s12466_s1 + $0x68] sm:$0xf0] }
  0x5f   :  { %v6536_v36 = vor.u32 %v8699_v28, %v6533_v29  ;;  %v842_v28 = vld [vmem:[%s12467_s0 + $0x18] sm:$0xf] }
  0x60   :  { %686 = vmatpush.bf16.msra.mxu0 %v6316_v35  ;;  %v8681_v35 = vld [vmem:[%s12466_s1 + $0x24] sm:$0xf] }
  0x61   :  { %699 = vmatpush.bf16.msra.mxu1 %v6320_v39  ;;  %819 = vmatpush.bf16.msra.mxu2 %v6380_v40  ;;  %v8698_v39 = vld [vmem:[%s12466_s1 + $0x24] sm:$0xf0]  ;;  %v8697_v40 = vld [vmem:[%s12466_s1 + $0x24] sm:$0xf] }
  0x62   :  { %832 = vmatpush.bf16.msra.mxu3 %v6384_v43  ;;  %v6464_v43 = vor.u32 %v8681_v35, %v6461_v37  ;;  %v6528_v48 = vor.u32 %v8697_v40, %v6525_v41  ;;  %v6613_v35 = vld [vmem:[%s12466_s1 + $0x58] sm:$0xf0]  ;;  %v8736_v37 = vld [vmem:[%s12466_s1 + $0x54] sm:$0xf0] }
  0x63   :  { %687 = vmatmul.bf16.vlgmr.msra.gmra.mxu0 %v576_v58  ;;  %v6616_v41 = vor.u32 %v8719_v33, %v6613_v35  ;;  %v8726_v33 = vld [vmem:[%s12466_s1 + $0x4] sm:$0xf0]  ;;  %v6637_v35 = vld [vmem:[%s12466_s1 + $0x8] sm:$0xf0] }
  0x64   :  { %945 = vmatpush.bf16.msrb.mxu0 %v6500_v44  ;;  %820 = vmatmul.bf16.vlgmr.msra.gmra.mxu2 %v709_v56  ;;  %v6524_v44 = vor.u32 %v8698_v39, %v6523_v38  ;;  %v8735_v38 = vld [vmem:[%s12466_s1 + $0x54] sm:$0xf]  ;;  %v6677_v39 = vld [vmem:[%s12466_s1 + $0x58] sm:$0xf0] }
  0x65   :  { %958 = vmatpush.bf16.msrb.mxu1 %v6504_v45  ;;  %1078 = vmatpush.bf16.msrb.mxu2 %v6564_v46  ;;  %v6451_v45 = vld [vmem:[%s12466_s1 + $0x10] sm:$0xf]  ;;  %v8680_v46 = vld [vmem:[%s12466_s1 + $0x14] sm:$0xf0] }
  0x66   :  { %1091 = vmatpush.bf16.msrb.mxu3 %v6568_v50  ;;  %700 = vmatmul.bf16.vlgmr.msra.gmra.mxu1 %v576_v58  ;;  %v6515_v50 = vld [vmem:[%s12466_s1 + $0x10] sm:$0xf]  ;;  %v6452_v54 = vor.u32 %v8680_v46, %v6451_v45  ;;  %v8717_v45 = vld [vmem:[%s12466_s1 + $0x44] sm:$0xf]  ;;  %v6680_v46 = vor.u32 %v8735_v38, %v6677_v39  ;;  %v8755_v38 = vld [vmem:[%s12466_s1 + $0x74] sm:$0xf] }
  0x67   :  { %833 = vmatmul.bf16.vlgmr.msra.gmra.mxu3 %v709_v56  ;;  %v8678_v56 = vld [vmem:[%s12466_s1 + $0x4] sm:$0xf0]  ;;  %v6516_v58 = vor.u32 %v8696_v51, %v6515_v50  ;;  %v8733_v50 = vld [vmem:[%s12466_s1 + $0x44] sm:$0xf]  ;;  %v6669_v51 = vld [vmem:[%s12466_s1 + $0x48] sm:$0xf0] }
  0x68   :  { %946 = vmatpush.bf16.msrb.mxu0 %v6492_v57  ;;  %v6456_v57 = vor.u32 %v8679_v47, %v6453_v49  ;;  %v6444_v5 = vor.u32 %v8678_v56, %v6443_v55  ;;  %v6605_v47 = vld [vmem:[%s12466_s1 + $0x48] sm:$0xf0]  ;;  %v8734_v49 = vld [vmem:[%s12466_s1 + $0x44] sm:$0xf0]  ;;  %v6595_v55 = vld [vmem:[%s12466_s1 + $0x30] sm:$0xf] }
  0x69   :  { %959 = vmatpush.bf16.msrb.mxu1 %v6496_v59  ;;  %1079 = vmatpush.bf16.msrb.mxu2 %v6556_v60  ;;  %v8677_v59 = vld [vmem:[%s12466_s1 + $0x4] sm:$0xf]  ;;  %v6445_v60 = vld [vmem:[%s12466_s1 + $0x8] sm:$0xf0]  ;;  %v6608_v53 = vor.u32 %v8717_v45, %v6605_v47  ;;  %v8716_v56 = vld [vmem:[%s12466_s1 + $0x34] sm:$0xf0] }
  0x6a   :  { %1092 = vmatpush.bf16.msrb.mxu3 %v6560_v0  ;;  %v8693_v0 = vld [vmem:[%s12466_s1 + $0x4] sm:$0xf]  ;;  %v6448_v9 = vor.u32 %v8677_v59, %v6445_v60  ;;  %v6597_v59 = vld [vmem:[%s12466_s1 + $0x38] sm:$0xf0]  ;;  %v6659_v60 = vld [vmem:[%s12466_s1 + $0x30] sm:$0xf] }
  0x6b   :  { %v6512_v13 = vor.u32 %v8693_v0, %v6509_v1  ;;  %v6596_v0 = vor.u32 %v8716_v56, %v6595_v55  ;;  %v6660_v2 = vor.u32 %v8732_v61, %v6659_v60  ;;  %v8771_v45 = vld [vmem:[%s12466_s1 + $0x74] sm:$0xf]  ;;  %v6749_v55 = vld [vmem:[%s12466_s1 + $0x68] sm:$0xf0]  ;;  %v6811_v56 = vld [vmem:[%s12466_s1 + $0x60] sm:$0xf] }
  0x6c   :  { %947 = vmatpush.bf16.msrb.mxu0 %v6484_v6  ;;  %v6629_v6 = vld [vmem:[%s12466_s1 + $0x78] sm:$0xf0]  ;;  %v1241_v60 = vld [vmem:[%s12467_s0 + $0x24] sm:$0xf] }
  0x6d   :  { %960 = vmatpush.bf16.msrb.mxu1 %v6488_v7  ;;  %1080 = vmatpush.bf16.msrb.mxu2 %v6548_v8  ;;  %v6691_v7 = vld [vmem:[%s12466_s1 + $0x70] sm:$0xf]  ;;  %v8740_v8 = vld [vmem:[%s12466_s1 + $0x74] sm:$0xf0]  ;;  %v6632_v15 = vor.u32 %v8723_v4, %v6629_v6  ;;  %v8714_v4 = vld [vmem:[%s12466_s1 + $0x24] sm:$0xf0] }
  0x6e   :  { %1093 = vmatpush.bf16.msrb.mxu3 %v6552_v12  ;;  %v6693_v12 = vld [vmem:[%s12466_s1 + $0x78] sm:$0xf0]  ;;  %v6692_v16 = vor.u32 %v8740_v8, %v6691_v7  ;;  %v6589_v7 = vld [vmem:[%s12466_s1 + $0x28] sm:$0xf0]  ;;  %v6651_v8 = vld [vmem:[%s12466_s1 + $0x20] sm:$0xf] }
  0x70   :  { %948 = vmatpush.bf16.msrb.mxu0 %v6476_v18  ;;  %v8722_v18 = vld [vmem:[%s12466_s1 + $0x64] sm:$0xf0] }
  0x71   :  { %961 = vmatpush.bf16.msrb.mxu1 %v6480_v19  ;;  %1081 = vmatpush.bf16.msrb.mxu2 %v6540_v20  ;;  %v8721_v19 = vld [vmem:[%s12466_s1 + $0x64] sm:$0xf]  ;;  %v6696_v20 = vor.u32 %v8739_v11, %v6693_v12  ;;  %v6620_v27 = vor.u32 %v8722_v18, %v6619_v17  ;;  %v6653_v11 = vld [vmem:[%s12466_s1 + $0x28] sm:$0xf0]  ;;  %v6588_v12 = vor.u32 %v8714_v4, %v6587_v3  ;;  %v8711_v17 = vld [vmem:[%s12466_s1 + $0x14] sm:$0xf] }
  0x72   :  { %1094 = vmatpush.bf16.msrb.mxu3 %v6544_v24  ;;  %v8737_v24 = vld [vmem:[%s12466_s1 + $0x64] sm:$0xf]  ;;  %v6624_v29 = vor.u32 %v8721_v19, %v6621_v21  ;;  %v6581_v19 = vld [vmem:[%s12466_s1 + $0x18] sm:$0xf0]  ;;  %v8728_v21 = vld [vmem:[%s12466_s1 + $0x14] sm:$0xf0] }
  0x73   :  { %v6688_v34 = vor.u32 %v8737_v24, %v6685_v25  ;;  %v6571_v25 = vld [vmem:[%s12466_s1] sm:$0xf]  ;;  %v8751_v3 = vld [vmem:[%s12466_s1 + $0x54] sm:$0xf] }
  0x74   :  { %949 = vmatpush.bf16.msrb.mxu0 %v6468_v30  ;;  %v6684_v30 = vor.u32 %v8738_v23, %v6683_v22  ;;  %v8727_v22 = vld [vmem:[%s12466_s1 + $0x14] sm:$0xf]  ;;  %v6645_v23 = vld [vmem:[%s12466_s1 + $0x18] sm:$0xf0] }
  0x75   :  { %962 = vmatpush.bf16.msrb.mxu1 %v6472_v31  ;;  %1082 = vmatpush.bf16.msrb.mxu2 %v6532_v32  ;;  %v6611_v31 = vld [vmem:[%s12466_s1 + $0x50] sm:$0xf]  ;;  %v8720_v32 = vld [vmem:[%s12466_s1 + $0x54] sm:$0xf0] }
  0x76   :  { %1095 = vmatpush.bf16.msrb.mxu3 %v6536_v36  ;;  %v6675_v36 = vld [vmem:[%s12466_s1 + $0x50] sm:$0xf]  ;;  %v6612_v40 = vor.u32 %v8720_v32, %v6611_v31  ;;  %v6635_v31 = vld [vmem:[%s12466_s1] sm:$0xf]  ;;  %v6648_v32 = vor.u32 %v8727_v22, %v6645_v23  ;;  %v6797_v22 = vld [vmem:[%s12466_s1 + $0x48] sm:$0xf0] }
  0x78   :  { %950 = vmatpush.bf16.msrb.mxu0 %v6460_v42  ;;  %v6676_v42 = vor.u32 %v8736_v37, %v6675_v36  ;;  %v6755_v36 = vld [vmem:[%s12466_s1 + $0x70] sm:$0xf]  ;;  %v8756_v37 = vld [vmem:[%s12466_s1 + $0x74] sm:$0xf0] }
  0x79   :  { %963 = vmatpush.bf16.msrb.mxu1 %v6464_v43  ;;  %1083 = vmatpush.bf16.msrb.mxu2 %v6524_v44  ;;  %v6603_v43 = vld [vmem:[%s12466_s1 + $0x40] sm:$0xf]  ;;  %v8718_v44 = vld [vmem:[%s12466_s1 + $0x44] sm:$0xf0] }
  0x7a   :  { %1096 = vmatpush.bf16.msrb.mxu3 %v6528_v48  ;;  %v6667_v48 = vld [vmem:[%s12466_s1 + $0x40] sm:$0xf]  ;;  %v6604_v52 = vor.u32 %v8718_v44, %v6603_v43  ;;  %v6636_v44 = vor.u32 %v8726_v33, %v6635_v31  ;;  %v8764_v33 = vld [vmem:[%s12466_s1 + $0x34] sm:$0xf0] }
  0x7c   :  { %951 = vmatpush.bf16.msrb.mxu0 %v6452_v54  ;;  %v6668_v54 = vor.u32 %v8734_v49, %v6667_v48  ;;  %v6756_v48 = vor.u32 %v8756_v37, %v6755_v36  ;;  %v6789_v36 = vld [vmem:[%s12466_s1 + $0x38] sm:$0xf0]  ;;  %v194_v37 = vld [vmem:[%s12468_s2] sm:$0x3] }
  0x7d   :  { %964 = vmatpush.bf16.msrb.mxu1 %v6456_v57  ;;  %1084 = vmatpush.bf16.msrb.mxu2 %v6516_v58  ;;  %v8715_v57 = vld [vmem:[%s12466_s1 + $0x34] sm:$0xf]  ;;  %v6672_v58 = vor.u32 %v8733_v50, %v6669_v51  ;;  %v6747_v51 = vld [vmem:[%s12466_s1 + $0x60] sm:$0xf] }
  0x7e   :  { %1097 = vmatpush.bf16.msrb.mxu3 %v6520_v62  ;;  %v8731_v62 = vld [vmem:[%s12466_s1 + $0x34] sm:$0xf]  ;;  %v6600_v1 = vor.u32 %v8715_v57, %v6597_v59  ;;  %v8770_v57 = vld [vmem:[%s12466_s1 + $0x64] sm:$0xf0]  ;;  %v6813_v59 = vld [vmem:[%s12466_s1 + $0x68] sm:$0xf0] }
  0x7f   :  { %v6664_v6 = vor.u32 %v8731_v62, %v6661_v63  ;;  %v1108_v62 = vld [vmem:[%s12467_s0 + $0x20] sm:$0xf] }
  0x80   :  { %952 = vmatpush.bf16.msrb.mxu0 %v6444_v5  ;;  %v8713_v5 = vld [vmem:[%s12466_s1 + $0x24] sm:$0xf] }
  0x81   :  { %965 = vmatpush.bf16.msrb.mxu1 %v6448_v9  ;;  %1085 = vmatpush.bf16.msrb.mxu2 %v6508_v10  ;;  %v8730_v9 = vld [vmem:[%s12466_s1 + $0x24] sm:$0xf0]  ;;  %v8729_v10 = vld [vmem:[%s12466_s1 + $0x24] sm:$0xf] }
  0x82   :  { %1098 = vmatpush.bf16.msrb.mxu3 %v6512_v13  ;;  %v6592_v13 = vor.u32 %v8713_v5, %v6589_v7  ;;  %v6656_v18 = vor.u32 %v8729_v10, %v6653_v11  ;;  %v6741_v5 = vld [vmem:[%s12466_s1 + $0x58] sm:$0xf0]  ;;  %v8768_v7 = vld [vmem:[%s12466_s1 + $0x54] sm:$0xf0]  ;;  %v6731_v11 = vld [vmem:[%s12466_s1 + $0x40] sm:$0xf] }
  0x83   :  { %953 = vmatmul.bf16.vlgmr.msrb.gmra.mxu0 %v842_v28 }
  0x84   :  { %1211 = vmatpush.bf16.msra.mxu0 %v6628_v14  ;;  %1086 = vmatmul.bf16.vlgmr.msrb.gmra.mxu2 %v975_v26  ;;  %v6652_v14 = vor.u32 %v8730_v9, %v6651_v8  ;;  %v8767_v8 = vld [vmem:[%s12466_s1 + $0x54] sm:$0xf]  ;;  %v6805_v9 = vld [vmem:[%s12466_s1 + $0x58] sm:$0xf0] }
  0x85   :  { %1224 = vmatpush.bf16.msra.mxu1 %v6632_v15  ;;  %1344 = vmatpush.bf16.msra.mxu2 %v6692_v16  ;;  %v6579_v15 = vld [vmem:[%s12466_s1 + $0x10] sm:$0xf]  ;;  %v8712_v16 = vld [vmem:[%s12466_s1 + $0x14] sm:$0xf0] }
  0x86   :  { %1357 = vmatpush.bf16.msra.mxu3 %v6696_v20  ;;  %966 = vmatmul.bf16.vlgmr.msrb.gmra.mxu1 %v842_v28  ;;  %v6643_v20 = vld [vmem:[%s12466_s1 + $0x10] sm:$0xf]  ;;  %v6580_v24 = vor.u32 %v8712_v16, %v6579_v15  ;;  %v8749_v15 = vld [vmem:[%s12466_s1 + $0x44] sm:$0xf]  ;;  %v6733_v16 = vld [vmem:[%s12466_s1 + $0x48] sm:$0xf0] }
  0x87   :  { %1099 = vmatmul.bf16.vlgmr.msrb.gmra.mxu3 %v975_v26  ;;  %v8710_v26 = vld [vmem:[%s12466_s1 + $0x4] sm:$0xf0]  ;;  %v6644_v28 = vor.u32 %v8728_v21, %v6643_v20  ;;  %v61_v20 = vld [vmem:[%s12468_s2] sm:$0x3]  ;;  %v8765_v21 = vld [vmem:[%s12466_s1 + $0x44] sm:$0xf] }
  0x88   :  { %1212 = vmatpush.bf16.msra.mxu0 %v6620_v27  ;;  %v6584_v27 = vor.u32 %v8711_v17, %v6581_v19  ;;  %v6572_v39 = vor.u32 %v8710_v26, %v6571_v25  ;;  %v6808_v17 = vor.u32 %v8767_v8, %v6805_v9  ;;  %v8766_v19 = vld [vmem:[%s12466_s1 + $0x44] sm:$0xf0]  ;;  %v8748_v25 = vld [vmem:[%s12466_s1 + $0x34] sm:$0xf0]  ;;  %v6736_v26 = vor.u32 %v8749_v15, %v6733_v16  ;;  %v8759_v8 = vld [vmem:[%s12466_s1 + $0x14] sm:$0xf] }
  0x89   :  { %1225 = vmatpush.bf16.msra.mxu1 %v6624_v29  ;;  %1345 = vmatpush.bf16.msra.mxu2 %v6684_v30  ;;  %v8709_v29 = vld [vmem:[%s12466_s1 + $0x4] sm:$0xf]  ;;  %v6573_v30 = vld [vmem:[%s12466_s1 + $0x8] sm:$0xf0]  ;;  %v6800_v31 = vor.u32 %v8765_v21, %v6797_v22  ;;  %v6773_v9 = vld [vmem:[%s12466_s1 + $0x18] sm:$0xf0] }
  0x8a   :  { %1358 = vmatpush.bf16.msra.mxu3 %v6688_v34  ;;  %v8725_v34 = vld [vmem:[%s12466_s1 + $0x4] sm:$0xf]  ;;  %v6576_v43 = vor.u32 %v8709_v29, %v6573_v30  ;;  %v6725_v29 = vld [vmem:[%s12466_s1 + $0x38] sm:$0xf0]  ;;  %v63_v30 = vperm.slane %v61_v20, 0 }
  0x8b   :  { %v6640_v47 = vor.u32 %v8725_v34, %v6637_v35  ;;  %v64_v34 = vperm.slane %v61_v20, 1  ;;  %v8763_v35 = vld [vmem:[%s12466_s1 + $0x34] sm:$0xf]  ;;  %v6763_v20 = vld [vmem:[%s12466_s1] sm:$0xf] }
  0x8c   :  { %1213 = vmatpush.bf16.msra.mxu0 %v6612_v40  ;;  %v6757_v40 = vld [vmem:[%s12466_s1 + $0x78] sm:$0xf0] }
  0x8d   :  { %1226 = vmatpush.bf16.msra.mxu1 %v6616_v41  ;;  %1346 = vmatpush.bf16.msra.mxu2 %v6676_v42  ;;  %v6819_v41 = vld [vmem:[%s12466_s1 + $0x70] sm:$0xf]  ;;  %v8772_v42 = vld [vmem:[%s12466_s1 + $0x74] sm:$0xf0]  ;;  %v6760_v49 = vor.u32 %v8755_v38, %v6757_v40 }
  0x8e   :  { %1359 = vmatpush.bf16.msra.mxu3 %v6680_v46  ;;  %v6821_v46 = vld [vmem:[%s12466_s1 + $0x78] sm:$0xf0]  ;;  %v6820_v50 = vor.u32 %v8772_v42, %v6819_v41 }
  0x90   :  { %1214 = vmatpush.bf16.msra.mxu0 %v6604_v52  ;;  %v8754_v52 = vld [vmem:[%s12466_s1 + $0x64] sm:$0xf0] }
  0x91   :  { %1227 = vmatpush.bf16.msra.mxu1 %v6608_v53  ;;  %1347 = vmatpush.bf16.msra.mxu2 %v6668_v54  ;;  %v8753_v53 = vld [vmem:[%s12466_s1 + $0x64] sm:$0xf]  ;;  %v6824_v54 = vor.u32 %v8771_v45, %v6821_v46  ;;  %v6748_v61 = vor.u32 %v8754_v52, %v6747_v51  ;;  %v6717_v45 = vld [vmem:[%s12466_s1 + $0x28] sm:$0xf0]  ;;  %v196_v52 = vperm.slane %v194_v37, 0 }
  0x92   :  { %1360 = vmatpush.bf16.msra.mxu3 %v6672_v58  ;;  %v8769_v58 = vld [vmem:[%s12466_s1 + $0x64] sm:$0xf]  ;;  %v6752_v63 = vor.u32 %v8753_v53, %v6749_v55 }
  0x93   :  { %v6816_v4 = vor.u32 %v8769_v58, %v6813_v59  ;;  %v8761_v53 = vld [vmem:[%s12466_s1 + $0x24] sm:$0xf] }
  0x94   :  { %1215 = vmatpush.bf16.msra.mxu0 %v6596_v0  ;;  %v6812_v0 = vor.u32 %v8770_v57, %v6811_v56  ;;  %v197_v56 = vperm.slane %v194_v37, 1  ;;  %v8803_v37 = vld [vmem:[%s12466_s1 + $0x74] sm:$0xf] }
  0x95   :  { %1228 = vmatpush.bf16.msra.mxu1 %v6600_v1  ;;  %1348 = vmatpush.bf16.msra.mxu2 %v6660_v2  ;;  %v6739_v1 = vld [vmem:[%s12466_s1 + $0x50] sm:$0xf]  ;;  %v8752_v2 = vld [vmem:[%s12466_s1 + $0x54] sm:$0xf0] }
  0x96   :  { %1361 = vmatpush.bf16.msra.mxu3 %v6664_v6  ;;  %v6803_v6 = vld [vmem:[%s12466_s1 + $0x50] sm:$0xf]  ;;  %v6740_v10 = vor.u32 %v8752_v2, %v6739_v1  ;;  %v6709_v2 = vld [vmem:[%s12466_s1 + $0x18] sm:$0xf0] }
  0x98   :  { %1216 = vmatpush.bf16.msra.mxu0 %v6588_v12  ;;  %v6744_v12 = vor.u32 %v8751_v3, %v6741_v5  ;;  %v6771_v3 = vld [vmem:[%s12466_s1 + $0x10] sm:$0xf] }
  0x99   :  { %1229 = vmatpush.bf16.msra.mxu1 %v6592_v13  ;;  %1349 = vmatpush.bf16.msra.mxu2 %v6652_v14  ;;  %v6804_v13 = vor.u32 %v8768_v7, %v6803_v6  ;;  %v8750_v14 = vld [vmem:[%s12466_s1 + $0x44] sm:$0xf0] }
  0x9a   :  { %1362 = vmatpush.bf16.msra.mxu3 %v6656_v18  ;;  %v6795_v18 = vld [vmem:[%s12466_s1 + $0x40] sm:$0xf]  ;;  %v6732_v23 = vor.u32 %v8750_v14, %v6731_v11  ;;  %v8741_v14 = vld [vmem:[%s12466_s1 + $0x4] sm:$0xf] }
  0x9c   :  { %1217 = vmatpush.bf16.msra.mxu0 %v6580_v24  ;;  %v6723_v24 = vld [vmem:[%s12466_s1 + $0x30] sm:$0xf] }
  0x9d   :  { %1230 = vmatpush.bf16.msra.mxu1 %v6584_v27  ;;  %1350 = vmatpush.bf16.msra.mxu2 %v6644_v28  ;;  %v6796_v27 = vor.u32 %v8766_v19, %v6795_v18  ;;  %v8747_v28 = vld [vmem:[%s12466_s1 + $0x34] sm:$0xf]  ;;  %v6724_v38 = vor.u32 %v8748_v25, %v6723_v24  ;;  %v6701_v19 = vld [vmem:[%s12466_s1 + $0x8] sm:$0xf0]  ;;  %v8758_v24 = vld [vmem:[%s12466_s1 + $0x4] sm:$0xf0] }
  0x9e   :  { %1363 = vmatpush.bf16.msra.mxu3 %v6648_v32  ;;  %v6787_v32 = vld [vmem:[%s12466_s1 + $0x30] sm:$0xf]  ;;  %v6728_v41 = vor.u32 %v8747_v28, %v6725_v29  ;;  %v8757_v25 = vld [vmem:[%s12466_s1 + $0x4] sm:$0xf]  ;;  %v8788_v28 = vld [vmem:[%s12466_s1 + $0x74] sm:$0xf0] }
  0x9f   :  { %v6788_v42 = vor.u32 %v8764_v33, %v6787_v32  ;;  %v8787_v29 = vld [vmem:[%s12466_s1 + $0x74] sm:$0xf]  ;;  %v6885_v32 = vld [vmem:[%s12466_s1 + $0x78] sm:$0xf0]  ;;  %v6947_v33 = vld [vmem:[%s12466_s1 + $0x70] sm:$0xf] }
  0xa0   :  { %1218 = vmatpush.bf16.msra.mxu0 %v6572_v39  ;;  %v6715_v39 = vld [vmem:[%s12466_s1 + $0x20] sm:$0xf]  ;;  %v156_v40 = vpop.f32.mrf.mxu0 }
  0xa1   :  { %1231 = vmatpush.bf16.msra.mxu1 %v6576_v43  ;;  %1351 = vmatpush.bf16.msra.mxu2 %v6636_v44  ;;  %v8746_v43 = vld [vmem:[%s12466_s1 + $0x24] sm:$0xf0]  ;;  %v8745_v44 = vld [vmem:[%s12466_s1 + $0x24] sm:$0xf]  ;;  %v157_v46 = vadd.f32 %v156_v40, %v63_v30 }
  0xa2   :  { %1364 = vmatpush.bf16.msra.mxu3 %v6640_v47  ;;  %v6716_v57 = vor.u32 %v8746_v43, %v6715_v39  ;;  %v6720_v59 = vor.u32 %v8745_v44, %v6717_v45  ;;  %v6888_v43 = vor.u32 %v8787_v29, %v6885_v32  ;;  %v6875_v45 = vld [vmem:[%s12466_s1 + $0x60] sm:$0xf] }
  0xa3   :  { %1219 = vmatmul.bf16.vlgmr.msra.gmra.mxu0 %v1108_v62  ;;  %v169_v47 = vpop.f32.mrf.mxu1  ;;  %v173_v55 = vmax.f32 %v157_v46, 0.0  ;;  %v8786_v46 = vld [vmem:[%s12466_s1 + $0x64] sm:$0xf0] }
  0xa4   :  { %1477 = vmatpush.bf16.msrb.mxu0 %v6756_v48  ;;  %1352 = vmatmul.bf16.vlgmr.msra.gmra.mxu2 %v1241_v60  ;;  %v6792_v48 = vor.u32 %v8763_v35, %v6789_v36  ;;  %v170_v51 = vadd.f32 %v169_v47, %v64_v34  ;;  %v8804_v34 = vld [vmem:[%s12466_s1 + $0x74] sm:$0xf0]  ;;  %v6704_v35 = vor.u32 %v8741_v14, %v6701_v19  ;;  %v8785_v47 = vld [vmem:[%s12466_s1 + $0x64] sm:$0xf]  ;;  %v6925_v19 = vld [vmem:[%s12466_s1 + $0x48] sm:$0xf0] }
  0xa5   :  { %1490 = vmatpush.bf16.msrb.mxu1 %v6760_v49  ;;  %1610 = vmatpush.bf16.msrb.mxu2 %v6820_v50  ;;  %v6779_v49 = vld [vmem:[%s12466_s1 + $0x20] sm:$0xf]  ;;  %v8762_v50 = vld [vmem:[%s12466_s1 + $0x24] sm:$0xf0]  ;;  %v6764_v36 = vor.u32 %v8758_v24, %v6763_v20  ;;  %v6948_v44 = vor.u32 %v8804_v34, %v6947_v33  ;;  %v6915_v33 = vld [vmem:[%s12466_s1 + $0x30] sm:$0xf] }
  0xa6   :  { %1623 = vmatpush.bf16.msrb.mxu3 %v6824_v54  ;;  %1232 = vmatmul.bf16.vlgmr.msra.gmra.mxu1 %v1108_v62  ;;  %v6781_v54 = vld [vmem:[%s12466_s1 + $0x28] sm:$0xf0]  ;;  %v174_v58 = vmax.f32 %v170_v51, 0.0  ;;  %v8744_v62 = vld [vmem:[%s12466_s1 + $0x14] sm:$0xf0] }
  0xa7   :  { %1365 = vmatmul.bf16.vlgmr.msra.gmra.mxu3 %v1241_v60  ;;  %v6780_v60 = vor.u32 %v8762_v50, %v6779_v49  ;;  %v6784_v1 = vor.u32 %v8761_v53, %v6781_v54  ;;  %v6877_v49 = vld [vmem:[%s12466_s1 + $0x68] sm:$0xf0]  ;;  %v6939_v50 = vld [vmem:[%s12466_s1 + $0x60] sm:$0xf]  ;;  %v8802_v51 = vld [vmem:[%s12466_s1 + $0x64] sm:$0xf0] }
  0xa8   :  { %1478 = vmatpush.bf16.msrb.mxu0 %v6748_v61  ;;  %v6707_v61 = vld [vmem:[%s12466_s1 + $0x10] sm:$0xf]  ;;  %v10468_v5 = vpack.c.bf16 %v174_v58, %v173_v55  ;;  %v158_v16 = vpop.f32.mrf.mxu0  ;;  %v6941_v53 = vld [vmem:[%s12466_s1 + $0x68] sm:$0xf0]  ;;  %v6876_v55 = vor.u32 %v8786_v46, %v6875_v45  ;;  %v6880_v58 = vor.u32 %v8785_v47, %v6877_v49  ;;  %v460_v20 = vld [vmem:[%s12468_s2] sm:$0x3] }
  0xa9   :  { %1491 = vmatpush.bf16.msrb.mxu1 %v6752_v63  ;;  %1611 = vmatpush.bf16.msrb.mxu2 %v6812_v0  ;;  %v8743_v63 = vld [vmem:[%s12466_s1 + $0x14] sm:$0xf]  ;;  %v289_v0 = vpop.f32.mrf.mxu2  ;;  %v1507_v54 = vld [vmem:[%s12467_s0 + $0x2c] sm:$0xf]  ;;  %v8798_v16 = vld [vmem:[%s12466_s1 + $0x44] sm:$0xf0] }
  0xaa   :  { %1624 = vmatpush.bf16.msrb.mxu3 %v6816_v4  ;;  %v8760_v4 = vld [vmem:[%s12466_s1 + $0x14] sm:$0xf0]  ;;  %v290_v6 = vadd.f32 %v289_v0, %v196_v52  ;;  %v302_v7 = vpop.f32.mrf.mxu3  ;;  %v8801_v52 = vld [vmem:[%s12466_s1 + $0x64] sm:$0xf]  ;;  %v6931_v0 = vld [vmem:[%s12466_s1 + $0x50] sm:$0xf] }
  0xab   :  { %v303_v11 = vadd.f32 %v302_v7, %v197_v56  ;;  %v6772_v18 = vor.u32 %v8760_v4, %v6771_v3  ;;  %v171_v22 = vpop.f32.mrf.mxu1  ;;  %v6867_v56 = vld [vmem:[%s12466_s1 + $0x50] sm:$0xf]  ;;  %v8799_v3 = vld [vmem:[%s12466_s1 + $0x54] sm:$0xf]  ;;  %v6933_v4 = vld [vmem:[%s12466_s1 + $0x58] sm:$0xf0] }
  0xac   :  { %1479 = vmatpush.bf16.msrb.mxu0 %v6740_v10  ;;  %v6699_v10 = vld [vmem:[%s12466_s1] sm:$0xf]  ;;  %v306_v15 = vmax.f32 %v290_v6, 0.0  ;;  %v6936_v14 = vor.u32 %v8799_v3, %v6933_v4  ;;  %v6851_v22 = vld [vmem:[%s12466_s1 + $0x30] sm:$0xf] }
  0xad   :  { %1492 = vmatpush.bf16.msrb.mxu1 %v6744_v12  ;;  %1612 = vmatpush.bf16.msrb.mxu2 %v6804_v13  ;;  %v6708_v12 = vor.u32 %v8744_v62, %v6707_v61  ;;  %v8742_v13 = vld [vmem:[%s12466_s1 + $0x4] sm:$0xf0]  ;;  %v307_v21 = vmax.f32 %v303_v11, 0.0  ;;  %v8783_v61 = vld [vmem:[%s12466_s1 + $0x54] sm:$0xf] }
  0xae   :  { %1625 = vmatpush.bf16.msrb.mxu3 %v6808_v17  ;;  %v6712_v17 = vor.u32 %v8743_v63, %v6709_v2  ;;  %v6869_v62 = vld [vmem:[%s12466_s1 + $0x58] sm:$0xf0]  ;;  %v6944_v63 = vor.u32 %v8801_v52, %v6941_v53  ;;  %v327_v2 = vld [vmem:[%s12468_s2] sm:$0x3]  ;;  %v8781_v11 = vld [vmem:[%s12466_s1 + $0x44] sm:$0xf] }
  0xaf   :  { %v10509_v30 = vpack.c.bf16 %v307_v21, %v306_v15  ;;  %v6859_v7 = vld [vmem:[%s12466_s1 + $0x40] sm:$0xf]  ;;  %v8796_v34 = vld [vmem:[%s12466_s1 + $0x34] sm:$0xf0]  ;;  %v8778_v46 = vld [vmem:[%s12466_s1 + $0x24] sm:$0xf0] }
  0xb0   :  { %1480 = vmatpush.bf16.msrb.mxu0 %v6732_v23  ;;  %v6776_v23 = vor.u32 %v8759_v8, %v6773_v9  ;;  %v8782_v8 = vld [vmem:[%s12466_s1 + $0x44] sm:$0xf0]  ;;  %v6872_v9 = vor.u32 %v8783_v61, %v6869_v62  ;;  %v6923_v15 = vld [vmem:[%s12466_s1 + $0x40] sm:$0xf]  ;;  %v8777_v47 = vld [vmem:[%s12466_s1 + $0x24] sm:$0xf] }
  0xb1   :  { %1493 = vmatpush.bf16.msrb.mxu1 %v6736_v26  ;;  %1613 = vmatpush.bf16.msrb.mxu2 %v6796_v27  ;;  %v6765_v26 = vld [vmem:[%s12466_s1 + $0x8] sm:$0xf0]  ;;  %v6883_v27 = vld [vmem:[%s12466_s1 + $0x70] sm:$0xf]  ;;  %v291_v39 = vpop.f32.mrf.mxu2  ;;  %v6860_v21 = vor.u32 %v8782_v8, %v6859_v7  ;;  %v6843_v45 = vld [vmem:[%s12466_s1 + $0x20] sm:$0xf] }
  0xb2   :  { %1626 = vmatpush.bf16.msrb.mxu3 %v6800_v31  ;;  %v6700_v31 = vor.u32 %v8742_v13, %v6699_v10  ;;  %v6768_v40 = vor.u32 %v8757_v25, %v6765_v26  ;;  %v329_v13 = vperm.slane %v327_v2, 0  ;;  %v6924_v25 = vor.u32 %v8798_v16, %v6923_v15  ;;  %v8780_v26 = vld [vmem:[%s12466_s1 + $0x34] sm:$0xf0]  ;;  %v8794_v52 = vld [vmem:[%s12466_s1 + $0x24] sm:$0xf0] }
  0xb3   :  { %v6837_v7 = vld [vmem:[%s12466_s1 + $0x18] sm:$0xf0]  ;;  %v6899_v8 = vld [vmem:[%s12466_s1 + $0x10] sm:$0xf]  ;;  %v8774_v15 = vld [vmem:[%s12466_s1 + $0x4] sm:$0xf0] }
  0xb4   :  { %1481 = vmatpush.bf16.msrb.mxu0 %v6724_v38  ;;  %v6949_v38 = vld [vmem:[%s12466_s1 + $0x78] sm:$0xf0] }
  0xb5   :  { %1494 = vmatpush.bf16.msrb.mxu1 %v6728_v41  ;;  %1614 = vmatpush.bf16.msrb.mxu2 %v6788_v42  ;;  %v6884_v41 = vor.u32 %v8788_v28, %v6883_v27  ;;  %v304_v42 = vpop.f32.mrf.mxu3  ;;  %v8779_v27 = vld [vmem:[%s12466_s1 + $0x34] sm:$0xf]  ;;  %v6853_v28 = vld [vmem:[%s12466_s1 + $0x38] sm:$0xf0] }
  0xb6   :  { %1627 = vmatpush.bf16.msrb.mxu3 %v6792_v48  ;;  %v6952_v48 = vor.u32 %v8803_v37, %v6949_v38  ;;  %v8795_v37 = vld [vmem:[%s12466_s1 + $0x34] sm:$0xf]  ;;  %v6917_v38 = vld [vmem:[%s12466_s1 + $0x38] sm:$0xf0] }
  0xb7   :  { %v6920_v49 = vor.u32 %v8795_v37, %v6917_v38  ;;  %v8835_v37 = vld [vmem:[%s12466_s1 + $0x74] sm:$0xf]  ;;  %v7077_v38 = vld [vmem:[%s12466_s1 + $0x78] sm:$0xf0] }
  0xb8   :  { %1482 = vmatpush.bf16.msrb.mxu0 %v6716_v57  ;;  %v1374_v57 = vld [vmem:[%s12467_s0 + $0x28] sm:$0xf] }
  0xb9   :  { %1495 = vmatpush.bf16.msrb.mxu1 %v6720_v59  ;;  %1615 = vmatpush.bf16.msrb.mxu2 %v6780_v60  ;;  %v6940_v59 = vor.u32 %v8802_v51, %v6939_v50  ;;  %v8784_v60 = vld [vmem:[%s12466_s1 + $0x54] sm:$0xf0]  ;;  %v6845_v50 = vld [vmem:[%s12466_s1 + $0x28] sm:$0xf0]  ;;  %v6907_v51 = vld [vmem:[%s12466_s1 + $0x20] sm:$0xf] }
  0xba   :  { %1628 = vmatpush.bf16.msrb.mxu3 %v6784_v1  ;;  %v8800_v1 = vld [vmem:[%s12466_s1 + $0x54] sm:$0xf0]  ;;  %v6868_v6 = vor.u32 %v8784_v60, %v6867_v56  ;;  %v8793_v56 = vld [vmem:[%s12466_s1 + $0x24] sm:$0xf]  ;;  %v6835_v60 = vld [vmem:[%s12466_s1 + $0x10] sm:$0xf] }
  0xbb   :  { %v6932_v10 = vor.u32 %v8800_v1, %v6931_v0  ;;  %v6908_v0 = vor.u32 %v8794_v52, %v6907_v51  ;;  %v8776_v1 = vld [vmem:[%s12466_s1 + $0x14] sm:$0xf0]  ;;  %v7069_v51 = vld [vmem:[%s12466_s1 + $0x68] sm:$0xf0]  ;;  %v1773_v52 = vld [vmem:[%s12467_s0 + $0x34] sm:$0xf] }
  0xbc   :  { %1483 = vmatpush.bf16.msrb.mxu0 %v6708_v12  ;;  %v6861_v12 = vld [vmem:[%s12466_s1 + $0x48] sm:$0xf0] }
  0xbd   :  { %1496 = vmatpush.bf16.msrb.mxu1 %v6712_v17  ;;  %1616 = vmatpush.bf16.msrb.mxu2 %v6772_v18  ;;  %v330_v17 = vperm.slane %v327_v2, 1  ;;  %v8797_v18 = vld [vmem:[%s12466_s1 + $0x44] sm:$0xf]  ;;  %v6864_v24 = vor.u32 %v8781_v11, %v6861_v12  ;;  %v8775_v2 = vld [vmem:[%s12466_s1 + $0x14] sm:$0xf] }
  0xbe   :  { %1629 = vmatpush.bf16.msrb.mxu3 %v6776_v23  ;;  %v6928_v32 = vor.u32 %v8797_v18, %v6925_v19  ;;  %v6901_v11 = vld [vmem:[%s12466_s1 + $0x18] sm:$0xf0]  ;;  %v6840_v16 = vor.u32 %v8775_v2, %v6837_v7  ;;  %v8773_v18 = vld [vmem:[%s12466_s1 + $0x4] sm:$0xf]  ;;  %v6829_v19 = vld [vmem:[%s12466_s1 + $0x8] sm:$0xf0] }
  0xbf   :  { %v8831_v2 = vld [vmem:[%s12466_s1 + $0x54] sm:$0xf]  ;;  %v8814_v7 = vld [vmem:[%s12466_s1 + $0x44] sm:$0xf0] }
  0xc0   :  { %1484 = vmatpush.bf16.msrb.mxu0 %v6700_v31  ;;  %v422_v23 = vpop.f32.mrf.mxu0 }
  0xc1   :  { %1497 = vmatpush.bf16.msrb.mxu1 %v6704_v35  ;;  %1617 = vmatpush.bf16.msrb.mxu2 %v6764_v36  ;;  %v423_v29 = vadd.f32 %v422_v23, %v329_v13  ;;  %v462_v36 = vperm.slane %v460_v20, 0  ;;  %v6836_v13 = vor.u32 %v8776_v1, %v6835_v60  ;;  %v8790_v23 = vld [vmem:[%s12466_s1 + $0x4] sm:$0xf0]  ;;  %v8815_v60 = vld [vmem:[%s12466_s1 + $0x54] sm:$0xf] }
  0xc2   :  { %1630 = vmatpush.bf16.msrb.mxu3 %v6768_v40  ;;  %v463_v40 = vperm.slane %v460_v20, 1  ;;  %v6891_v20 = vld [vmem:[%s12466_s1] sm:$0xf] }
  0xc3   :  { %1485 = vmatmul.bf16.vlgmr.msrb.gmra.mxu0 %v1374_v57  ;;  %v435_v31 = vpop.f32.mrf.mxu1  ;;  %v439_v39 = vmax.f32 %v423_v29, 0.0  ;;  %v8819_v29 = vld [vmem:[%s12466_s1 + $0x74] sm:$0xf]  ;;  %v593_v1 = vld [vmem:[%s12468_s2] sm:$0x3] }
  0xc4   :  { %1743 = vmatpush.bf16.msra.mxu0 %v6884_v41  ;;  %1618 = vmatmul.bf16.vlgmr.msrb.gmra.mxu2 %v1507_v54  ;;  %v436_v35 = vadd.f32 %v435_v31, %v330_v17  ;;  %v6852_v41 = vor.u32 %v8780_v26, %v6851_v22 }
  0xc5   :  { %1756 = vmatpush.bf16.msra.mxu1 %v6888_v43  ;;  %1876 = vmatpush.bf16.msra.mxu2 %v6948_v44  ;;  %v6856_v43 = vor.u32 %v8779_v27, %v6853_v28  ;;  %v6916_v44 = vor.u32 %v8796_v34, %v6915_v33  ;;  %v7011_v27 = vld [vmem:[%s12466_s1 + $0x70] sm:$0xf]  ;;  %v8820_v28 = vld [vmem:[%s12466_s1 + $0x74] sm:$0xf0] }
  0xc6   :  { %1889 = vmatpush.bf16.msra.mxu3 %v6952_v48  ;;  %1498 = vmatmul.bf16.vlgmr.msrb.gmra.mxu1 %v1374_v57  ;;  %v440_v42 = vmax.f32 %v436_v35, 0.0  ;;  %v6909_v57 = vld [vmem:[%s12466_s1 + $0x28] sm:$0xf0]  ;;  %v7075_v33 = vld [vmem:[%s12466_s1 + $0x70] sm:$0xf]  ;;  %v6832_v35 = vor.u32 %v8773_v18, %v6829_v19 }
  0xc7   :  { %1631 = vmatmul.bf16.vlgmr.msrb.gmra.mxu3 %v1507_v54  ;;  %v555_v48 = vpop.f32.mrf.mxu2  ;;  %v8836_v34 = vld [vmem:[%s12466_s1 + $0x74] sm:$0xf0]  ;;  %v8829_v18 = vld [vmem:[%s12466_s1 + $0x44] sm:$0xf]  ;;  %v7053_v19 = vld [vmem:[%s12466_s1 + $0x48] sm:$0xf0] }
  0xc8   :  { %1744 = vmatpush.bf16.msra.mxu0 %v6876_v55  ;;  %v10652_v53 = vpack.c.bf16 %v440_v42, %v439_v39  ;;  %v556_v54 = vadd.f32 %v555_v48, %v462_v36  ;;  %v424_v62 = vpop.f32.mrf.mxu0  ;;  %v6892_v36 = vor.u32 %v8790_v23, %v6891_v20  ;;  %v7076_v42 = vor.u32 %v8836_v34, %v7075_v33  ;;  %v7067_v48 = vld [vmem:[%s12466_s1 + $0x60] sm:$0xf]  ;;  %v7043_v33 = vld [vmem:[%s12466_s1 + $0x30] sm:$0xf]  ;;  %v8828_v34 = vld [vmem:[%s12466_s1 + $0x34] sm:$0xf0] }
  0xc9   :  { %1757 = vmatpush.bf16.msra.mxu1 %v6880_v58  ;;  %1877 = vmatpush.bf16.msra.mxu2 %v6940_v59  ;;  %v6844_v59 = vor.u32 %v8778_v46, %v6843_v45  ;;  %v8817_v45 = vld [vmem:[%s12466_s1 + $0x64] sm:$0xf]  ;;  %v7080_v46 = vor.u32 %v8835_v37, %v7077_v38  ;;  %v726_v20 = vld [vmem:[%s12468_s2] sm:$0x3]  ;;  %v8827_v37 = vld [vmem:[%s12466_s1 + $0x34] sm:$0xf] }
  0xca   :  { %1890 = vmatpush.bf16.msra.mxu3 %v6944_v63  ;;  %v568_v55 = vpop.f32.mrf.mxu3  ;;  %v572_v61 = vmax.f32 %v556_v54, 0.0  ;;  %v6848_v63 = vor.u32 %v8777_v47, %v6845_v50  ;;  %v7005_v47 = vld [vmem:[%s12466_s1 + $0x68] sm:$0xf0]  ;;  %v8833_v50 = vld [vmem:[%s12466_s1 + $0x64] sm:$0xf] }
  0xcb   :  { %v569_v58 = vadd.f32 %v568_v55, %v463_v40  ;;  %v437_v4 = vpop.f32.mrf.mxu1  ;;  %v7012_v40 = vor.u32 %v8820_v28, %v7011_v27  ;;  %v6995_v55 = vld [vmem:[%s12466_s1 + $0x50] sm:$0xf]  ;;  %v7072_v62 = vor.u32 %v8833_v50, %v7069_v51  ;;  %v8811_v27 = vld [vmem:[%s12466_s1 + $0x34] sm:$0xf]  ;;  %v6981_v28 = vld [vmem:[%s12466_s1 + $0x38] sm:$0xf0] }
  0xcc   :  { %1745 = vmatpush.bf16.msra.mxu0 %v6868_v6  ;;  %v6912_v6 = vor.u32 %v8793_v56, %v6909_v57  ;;  %v1640_v56 = vld [vmem:[%s12467_s0 + $0x30] sm:$0xf]  ;;  %v7008_v57 = vor.u32 %v8817_v45, %v7005_v47  ;;  %v7045_v38 = vld [vmem:[%s12466_s1 + $0x38] sm:$0xf0]  ;;  %v6971_v45 = vld [vmem:[%s12466_s1 + $0x20] sm:$0xf] }
  0xcd   :  { %1758 = vmatpush.bf16.msra.mxu1 %v6872_v9  ;;  %1878 = vmatpush.bf16.msra.mxu2 %v6932_v10  ;;  %v573_v3 = vmax.f32 %v569_v58, 0.0  ;;  %v8792_v9 = vld [vmem:[%s12466_s1 + $0x14] sm:$0xf0]  ;;  %v8791_v10 = vld [vmem:[%s12466_s1 + $0x14] sm:$0xf] }
  0xce   :  { %1891 = vmatpush.bf16.msra.mxu3 %v6936_v14  ;;  %v6827_v14 = vld [vmem:[%s12466_s1] sm:$0xf]  ;;  %v6900_v17 = vor.u32 %v8792_v9, %v6899_v8  ;;  %v6904_v22 = vor.u32 %v8791_v10, %v6901_v11  ;;  %v8813_v10 = vld [vmem:[%s12466_s1 + $0x44] sm:$0xf]  ;;  %v6989_v11 = vld [vmem:[%s12466_s1 + $0x48] sm:$0xf0] }
  0xcf   :  { %v10684_v12 = vpack.c.bf16 %v573_v3, %v572_v61  ;;  %v6828_v31 = vor.u32 %v8774_v15, %v6827_v14  ;;  %v6997_v61 = vld [vmem:[%s12466_s1 + $0x58] sm:$0xf0]  ;;  %v7051_v15 = vld [vmem:[%s12466_s1 + $0x40] sm:$0xf]  ;;  %v8809_v47 = vld [vmem:[%s12466_s1 + $0x24] sm:$0xf] }
  0xd0   :  { %1746 = vmatpush.bf16.msra.mxu0 %v6860_v21  ;;  %v557_v21 = vpop.f32.mrf.mxu2  ;;  %v7061_v3 = vld [vmem:[%s12466_s1 + $0x58] sm:$0xf0]  ;;  %v7000_v8 = vor.u32 %v8815_v60, %v6997_v61  ;;  %v6973_v50 = vld [vmem:[%s12466_s1 + $0x28] sm:$0xf0]  ;;  %v7035_v51 = vld [vmem:[%s12466_s1 + $0x20] sm:$0xf] }
  0xd1   :  { %1759 = vmatpush.bf16.msra.mxu1 %v6864_v24  ;;  %1879 = vmatpush.bf16.msra.mxu2 %v6924_v25  ;;  %v8789_v24 = vld [vmem:[%s12466_s1 + $0x4] sm:$0xf]  ;;  %v6893_v25 = vld [vmem:[%s12466_s1 + $0x8] sm:$0xf0]  ;;  %v7064_v14 = vor.u32 %v8831_v2, %v7061_v3  ;;  %v6963_v61 = vld [vmem:[%s12466_s1 + $0x10] sm:$0xf] }
  0xd2   :  { %1892 = vmatpush.bf16.msra.mxu3 %v6928_v32  ;;  %v570_v26 = vpop.f32.mrf.mxu3  ;;  %v7013_v32 = vld [vmem:[%s12466_s1 + $0x78] sm:$0xf0]  ;;  %v6896_v39 = vor.u32 %v8789_v24, %v6893_v25  ;;  %v6992_v24 = vor.u32 %v8813_v10, %v6989_v11  ;;  %v8808_v2 = vld [vmem:[%s12466_s1 + $0x14] sm:$0xf0]  ;;  %v8807_v3 = vld [vmem:[%s12466_s1 + $0x14] sm:$0xf] }
  0xd3   :  { %v8812_v26 = vld [vmem:[%s12466_s1 + $0x34] sm:$0xf0]  ;;  %v8823_v11 = vld [vmem:[%s12466_s1 + $0x14] sm:$0xf] }
  0xd4   :  { %1747 = vmatpush.bf16.msra.mxu0 %v6852_v41  ;;  %v7016_v41 = vor.u32 %v8819_v29, %v7013_v32  ;;  %v7056_v32 = vor.u32 %v8829_v18, %v7053_v19  ;;  %v8824_v10 = vld [vmem:[%s12466_s1 + $0x14] sm:$0xf0] }
  0xd5   :  { %1760 = vmatpush.bf16.msra.mxu1 %v6856_v43  ;;  %1880 = vmatpush.bf16.msra.mxu2 %v6916_v44  ;;  %v7003_v43 = vld [vmem:[%s12466_s1 + $0x60] sm:$0xf]  ;;  %v8818_v44 = vld [vmem:[%s12466_s1 + $0x64] sm:$0xf0] }
  0xd6   :  { %1893 = vmatpush.bf16.msra.mxu3 %v6920_v49  ;;  %v8834_v49 = vld [vmem:[%s12466_s1 + $0x64] sm:$0xf0]  ;;  %v7004_v54 = vor.u32 %v8818_v44, %v7003_v43  ;;  %v6984_v43 = vor.u32 %v8811_v27, %v6981_v28  ;;  %v7044_v44 = vor.u32 %v8828_v34, %v7043_v33  ;;  %v7021_v27 = vld [vmem:[%s12466_s1 + $0x8] sm:$0xf0]  ;;  %v7141_v34 = vld [vmem:[%s12466_s1 + $0x78] sm:$0xf0] }
  0xd7   :  { %v7068_v58 = vor.u32 %v8834_v49, %v7067_v48  ;;  %v7048_v49 = vor.u32 %v8827_v37, %v7045_v38 }
  0xd8   :  { %1748 = vmatpush.bf16.msra.mxu0 %v6844_v59  ;;  %v8816_v59 = vld [vmem:[%s12466_s1 + $0x54] sm:$0xf0] }
  0xd9   :  { %1761 = vmatpush.bf16.msra.mxu1 %v6848_v63  ;;  %1881 = vmatpush.bf16.msra.mxu2 %v6908_v0  ;;  %v7059_v63 = vld [vmem:[%s12466_s1 + $0x50] sm:$0xf]  ;;  %v8832_v0 = vld [vmem:[%s12466_s1 + $0x54] sm:$0xf0]  ;;  %v6996_v4 = vor.u32 %v8816_v59, %v6995_v55 }
  0xda   :  { %1894 = vmatpush.bf16.msra.mxu3 %v6912_v6  ;;  %v6987_v6 = vld [vmem:[%s12466_s1 + $0x40] sm:$0xf]  ;;  %v7060_v9 = vor.u32 %v8832_v0, %v7059_v63  ;;  %v6976_v0 = vor.u32 %v8809_v47, %v6973_v50  ;;  %v8849_v47 = vld [vmem:[%s12466_s1 + $0x64] sm:$0xf] }
  0xdb   :  { %v6988_v21 = vor.u32 %v8814_v7, %v6987_v6  ;;  %v7195_v50 = vld [vmem:[%s12466_s1 + $0x60] sm:$0xf] }
  0xdc   :  { %1749 = vmatpush.bf16.msra.mxu0 %v6836_v13  ;;  %v595_v13 = vperm.slane %v593_v1, 0 }
  0xdd   :  { %1762 = vmatpush.bf16.msra.mxu1 %v6840_v16  ;;  %1882 = vmatpush.bf16.msra.mxu2 %v6900_v17  ;;  %v8830_v16 = vld [vmem:[%s12466_s1 + $0x44] sm:$0xf0]  ;;  %v596_v17 = vperm.slane %v593_v1, 1 }
  0xde   :  { %1895 = vmatpush.bf16.msra.mxu3 %v6904_v22  ;;  %v6979_v22 = vld [vmem:[%s12466_s1 + $0x30] sm:$0xf]  ;;  %v7052_v25 = vor.u32 %v8830_v16, %v7051_v15  ;;  %v6964_v15 = vor.u32 %v8808_v2, %v6963_v61  ;;  %v6955_v16 = vld [vmem:[%s12466_s1] sm:$0xf] }
  0xdf   :  { %v7187_v2 = vld [vmem:[%s12466_s1 + $0x50] sm:$0xf] }
  0xe0   :  { %1750 = vmatpush.bf16.msra.mxu0 %v6828_v31  ;;  %v688_v23 = vpop.f32.mrf.mxu0 }
  0xe1   :  { %1763 = vmatpush.bf16.msra.mxu1 %v6832_v35  ;;  %1883 = vmatpush.bf16.msra.mxu2 %v6892_v36  ;;  %v689_v29 = vadd.f32 %v688_v23, %v595_v13  ;;  %v728_v36 = vperm.slane %v726_v20, 0  ;;  %v7029_v13 = vld [vmem:[%s12466_s1 + $0x18] sm:$0xf0] }
  0xe2   :  { %1896 = vmatpush.bf16.msra.mxu3 %v6896_v39 }
  0xe3   :  { %1751 = vmatmul.bf16.vlgmr.msra.gmra.mxu0 %v1640_v56  ;;  %v701_v31 = vpop.f32.mrf.mxu1  ;;  %v705_v39 = vmax.f32 %v689_v29, 0.0  ;;  %v7139_v29 = vld [vmem:[%s12466_s1 + $0x70] sm:$0xf] }
  0xe4   :  { %2009 = vmatpush.bf16.msrb.mxu0 %v7012_v40  ;;  %1884 = vmatmul.bf16.vlgmr.msra.gmra.mxu2 %v1773_v52  ;;  %v702_v35 = vadd.f32 %v701_v31, %v596_v17  ;;  %v729_v40 = vperm.slane %v726_v20, 1  ;;  %v8806_v17 = vld [vmem:[%s12466_s1 + $0x4] sm:$0xf0]  ;;  %v8805_v20 = vld [vmem:[%s12466_s1 + $0x4] sm:$0xf] }
  0xe5   :  { %2022 = vmatpush.bf16.msrb.mxu1 %v7016_v41  ;;  %2142 = vmatpush.bf16.msrb.mxu2 %v7076_v42  ;;  %v6980_v41 = vor.u32 %v8812_v26, %v6979_v22  ;;  %v7019_v22 = vld [vmem:[%s12466_s1] sm:$0xf]  ;;  %v8821_v26 = vld [vmem:[%s12466_s1 + $0x4] sm:$0xf]  ;;  %v8852_v31 = vld [vmem:[%s12466_s1 + $0x74] sm:$0xf0]  ;;  %v6956_v33 = vor.u32 %v8806_v17, %v6955_v16 }
  0xe6   :  { %2155 = vmatpush.bf16.msrb.mxu3 %v7080_v46  ;;  %1764 = vmatmul.bf16.vlgmr.msra.gmra.mxu1 %v1640_v56  ;;  %v706_v42 = vmax.f32 %v702_v35, 0.0  ;;  %v8810_v46 = vld [vmem:[%s12466_s1 + $0x24] sm:$0xf0]  ;;  %v7203_v35 = vld [vmem:[%s12466_s1 + $0x70] sm:$0xf] }
  0xe7   :  { %1897 = vmatmul.bf16.vlgmr.msra.gmra.mxu3 %v1773_v52  ;;  %v821_v48 = vpop.f32.mrf.mxu2  ;;  %v8826_v52 = vld [vmem:[%s12466_s1 + $0x24] sm:$0xf0]  ;;  %v6972_v60 = vor.u32 %v8810_v46, %v6971_v45  ;;  %v7131_v45 = vld [vmem:[%s12466_s1 + $0x60] sm:$0xf]  ;;  %v7117_v16 = vld [vmem:[%s12466_s1 + $0x48] sm:$0xf0] }
  0xe8   :  { %2010 = vmatpush.bf16.msrb.mxu0 %v7004_v54  ;;  %v10860_v54 = vpack.c.bf16 %v706_v42, %v705_v39  ;;  %v822_v55 = vadd.f32 %v821_v48, %v728_v36  ;;  %v690_v63 = vpop.f32.mrf.mxu0  ;;  %v7036_v1 = vor.u32 %v8826_v52, %v7035_v51  ;;  %v8868_v36 = vld [vmem:[%s12466_s1 + $0x74] sm:$0xf0]  ;;  %v8867_v39 = vld [vmem:[%s12466_s1 + $0x74] sm:$0xf]  ;;  %v7140_v42 = vor.u32 %v8852_v31, %v7139_v29  ;;  %v8850_v46 = vld [vmem:[%s12466_s1 + $0x64] sm:$0xf0] }
  0xe9   :  { %2023 = vmatpush.bf16.msrb.mxu1 %v7008_v57  ;;  %2143 = vmatpush.bf16.msrb.mxu2 %v7068_v58  ;;  %v8825_v57 = vld [vmem:[%s12466_s1 + $0x24] sm:$0xf]  ;;  %v7037_v58 = vld [vmem:[%s12466_s1 + $0x28] sm:$0xf0]  ;;  %v8866_v51 = vld [vmem:[%s12466_s1 + $0x64] sm:$0xf0] }
  0xea   :  { %2156 = vmatpush.bf16.msrb.mxu3 %v7072_v62  ;;  %v834_v56 = vpop.f32.mrf.mxu3  ;;  %v838_v62 = vmax.f32 %v822_v55, 0.0  ;;  %v7040_v7 = vor.u32 %v8825_v57, %v7037_v58  ;;  %v8865_v52 = vld [vmem:[%s12466_s1 + $0x64] sm:$0xf]  ;;  %v7197_v55 = vld [vmem:[%s12466_s1 + $0x68] sm:$0xf0]  ;;  %v7132_v57 = vor.u32 %v8850_v46, %v7131_v45  ;;  %v7196_v61 = vor.u32 %v8866_v51, %v7195_v50 }
  0xeb   :  { %v835_v59 = vadd.f32 %v834_v56, %v729_v40  ;;  %v703_v6 = vpop.f32.mrf.mxu1  ;;  %v7205_v40 = vld [vmem:[%s12466_s1 + $0x78] sm:$0xf0]  ;;  %v7123_v58 = vld [vmem:[%s12466_s1 + $0x50] sm:$0xf]  ;;  %v8847_v63 = vld [vmem:[%s12466_s1 + $0x54] sm:$0xf] }
  0xec   :  { %2011 = vmatpush.bf16.msrb.mxu0 %v6996_v4  ;;  %v7208_v48 = vor.u32 %v8867_v39, %v7205_v40  ;;  %v2039_v56 = vld [vmem:[%s12467_s0 + $0x3c] sm:$0xf]  ;;  %v8863_v6 = vld [vmem:[%s12466_s1 + $0x54] sm:$0xf]  ;;  %v8844_v31 = vld [vmem:[%s12466_s1 + $0x34] sm:$0xf0] }
  0xed   :  { %2024 = vmatpush.bf16.msrb.mxu1 %v7000_v8  ;;  %2144 = vmatpush.bf16.msrb.mxu2 %v7060_v9  ;;  %v839_v4 = vmax.f32 %v835_v59, 0.0  ;;  %v6965_v8 = vld [vmem:[%s12466_s1 + $0x18] sm:$0xf0]  ;;  %v7027_v9 = vld [vmem:[%s12466_s1 + $0x10] sm:$0xf] }
  0xee   :  { %2157 = vmatpush.bf16.msrb.mxu3 %v7064_v14  ;;  %v6968_v18 = vor.u32 %v8807_v3, %v6965_v8  ;;  %v7028_v19 = vor.u32 %v8824_v10, %v7027_v9  ;;  %v1906_v59 = vld [vmem:[%s12467_s0 + $0x38] sm:$0xf]  ;;  %v7115_v9 = vld [vmem:[%s12466_s1 + $0x40] sm:$0xf]  ;;  %v8846_v10 = vld [vmem:[%s12466_s1 + $0x44] sm:$0xf0] }
  0xef   :  { %v10892_v14 = vpack.c.bf16 %v839_v4, %v838_v62  ;;  %v823_v23 = vpop.f32.mrf.mxu2  ;;  %v8848_v62 = vld [vmem:[%s12466_s1 + $0x54] sm:$0xf0]  ;;  %v859_v4 = vld [vmem:[%s12468_s2] sm:$0x3]  ;;  %v8842_v50 = vld [vmem:[%s12466_s1 + $0x24] sm:$0xf0] }
  0xf0   :  { %2012 = vmatpush.bf16.msrb.mxu0 %v6988_v21  ;;  %v6957_v21 = vld [vmem:[%s12466_s1 + $0x8] sm:$0xf0]  ;;  %v8864_v3 = vld [vmem:[%s12466_s1 + $0x54] sm:$0xf0]  ;;  %v7124_v8 = vor.u32 %v8848_v62, %v7123_v58  ;;  %v861_v17 = vperm.slane %v859_v4, 0 }
  0xf1   :  { %2025 = vmatpush.bf16.msrb.mxu1 %v6992_v24  ;;  %2145 = vmatpush.bf16.msrb.mxu2 %v7052_v25  ;;  %v7032_v24 = vor.u32 %v8823_v11, %v7029_v13  ;;  %v8822_v25 = vld [vmem:[%s12466_s1 + $0x4] sm:$0xf0]  ;;  %v6960_v37 = vor.u32 %v8805_v20, %v6957_v21  ;;  %v7188_v13 = vor.u32 %v8864_v3, %v7187_v2  ;;  %v862_v21 = vperm.slane %v859_v4, 1  ;;  %v7181_v23 = vld [vmem:[%s12466_s1 + $0x48] sm:$0xf0] }
  0xf2   :  { %2158 = vmatpush.bf16.msrb.mxu3 %v7056_v32  ;;  %v836_v28 = vpop.f32.mrf.mxu3  ;;  %v8851_v32 = vld [vmem:[%s12466_s1 + $0x74] sm:$0xf]  ;;  %v7020_v38 = vor.u32 %v8822_v25, %v7019_v22  ;;  %v8862_v20 = vld [vmem:[%s12466_s1 + $0x44] sm:$0xf0]  ;;  %v8861_v22 = vld [vmem:[%s12466_s1 + $0x44] sm:$0xf]  ;;  %v7116_v25 = vor.u32 %v8846_v10, %v7115_v9 }
  0xf3   :  { %v8841_v51 = vld [vmem:[%s12466_s1 + $0x24] sm:$0xf]  ;;  %v8858_v58 = vld [vmem:[%s12466_s1 + $0x24] sm:$0xf0]  ;;  %v7091_v2 = vld [vmem:[%s12466_s1 + $0x10] sm:$0xf] }
  0xf4   :  { %2013 = vmatpush.bf16.msrb.mxu0 %v6980_v41  ;;  %v7024_v41 = vor.u32 %v8821_v26, %v7021_v27  ;;  %v7107_v26 = vld [vmem:[%s12466_s1 + $0x30] sm:$0xf]  ;;  %v8857_v62 = vld [vmem:[%s12466_s1 + $0x24] sm:$0xf]  ;;  %v8839_v9 = vld [vmem:[%s12466_s1 + $0x14] sm:$0xf] }
  0xf5   :  { %2026 = vmatpush.bf16.msrb.mxu1 %v6984_v43  ;;  %2146 = vmatpush.bf16.msrb.mxu2 %v7044_v44  ;;  %v7144_v43 = vor.u32 %v8851_v32, %v7141_v34  ;;  %v7204_v44 = vor.u32 %v8868_v36, %v7203_v35  ;;  %v8843_v32 = vld [vmem:[%s12466_s1 + $0x34] sm:$0xf]  ;;  %v7184_v36 = vor.u32 %v8861_v22, %v7181_v23  ;;  %v7083_v22 = vld [vmem:[%s12466_s1] sm:$0xf] }
  0xf6   :  { %2159 = vmatpush.bf16.msrb.mxu3 %v7048_v49  ;;  %v7133_v49 = vld [vmem:[%s12466_s1 + $0x68] sm:$0xf0]  ;;  %v7108_v45 = vor.u32 %v8844_v31, %v7107_v26  ;;  %v8837_v26 = vld [vmem:[%s12466_s1 + $0x4] sm:$0xf]  ;;  %v7147_v31 = vld [vmem:[%s12466_s1] sm:$0xf] }
  0xf8   :  { %2014 = vmatpush.bf16.msrb.mxu0 %v6972_v60  ;;  %v7136_v60 = vor.u32 %v8849_v47, %v7133_v49  ;;  %v7099_v49 = vld [vmem:[%s12466_s1 + $0x20] sm:$0xf] }
  0xf9   :  { %2027 = vmatpush.bf16.msrb.mxu1 %v6976_v0  ;;  %2147 = vmatpush.bf16.msrb.mxu2 %v7036_v1  ;;  %v7125_v0 = vld [vmem:[%s12466_s1 + $0x58] sm:$0xf0]  ;;  %v7200_v1 = vor.u32 %v8865_v52, %v7197_v55 }
  0xfa   :  { %2160 = vmatpush.bf16.msrb.mxu3 %v7040_v7  ;;  %v7189_v7 = vld [vmem:[%s12466_s1 + $0x58] sm:$0xf0]  ;;  %v7128_v11 = vor.u32 %v8847_v63, %v7125_v0  ;;  %v7165_v63 = vld [vmem:[%s12466_s1 + $0x28] sm:$0xf0] }
  0xfc   :  { %2015 = vmatpush.bf16.msrb.mxu0 %v6964_v15  ;;  %v8845_v15 = vld [vmem:[%s12466_s1 + $0x44] sm:$0xf] }
  0xfd   :  { %2028 = vmatpush.bf16.msrb.mxu1 %v6968_v18  ;;  %2148 = vmatpush.bf16.msrb.mxu2 %v7028_v19  ;;  %v7192_v18 = vor.u32 %v8863_v6, %v7189_v7  ;;  %v7179_v19 = vld [vmem:[%s12466_s1 + $0x40] sm:$0xf]  ;;  %v7120_v28 = vor.u32 %v8845_v15, %v7117_v16  ;;  %v7093_v15 = vld [vmem:[%s12466_s1 + $0x18] sm:$0xf0]  ;;  %v7155_v16 = vld [vmem:[%s12466_s1 + $0x10] sm:$0xf] }
  0xfe   :  { %2161 = vmatpush.bf16.msrb.mxu3 %v7032_v24  ;;  %v992_v24 = vld [vmem:[%s12468_s2] sm:$0x3]  ;;  %v7180_v29 = vor.u32 %v8862_v20, %v7179_v19  ;;  %v7157_v19 = vld [vmem:[%s12466_s1 + $0x18] sm:$0xf0]  ;;  %v7096_v23 = vor.u32 %v8839_v9, %v7093_v15  ;;  %v8898_v9 = vld [vmem:[%s12469_s3 + $0x68] sm:$0xff] }
  0xff   :  { %v994_v40 = vperm.slane %v992_v24, 0  ;;  %v1258_v15 = vld [vmem:[%s12468_s2] sm:$0x3] }
 0x100   :  { %2016 = vmatpush.bf16.msrb.mxu0 %v6956_v33  ;;  %v954_v27 = vpop.f32.mrf.mxu0  ;;  %v7109_v33 = vld [vmem:[%s12466_s1 + $0x38] sm:$0xf0] }
 0x101   :  { %2029 = vmatpush.bf16.msrb.mxu1 %v6960_v37  ;;  %2149 = vmatpush.bf16.msrb.mxu2 %v7020_v38  ;;  %v955_v34 = vadd.f32 %v954_v27, %v861_v17  ;;  %v7171_v37 = vld [vmem:[%s12466_s1 + $0x30] sm:$0xf]  ;;  %v8860_v38 = vld [vmem:[%s12466_s1 + $0x34] sm:$0xf0]  ;;  %v7112_v47 = vor.u32 %v8843_v32, %v7109_v33  ;;  %v7085_v27 = vld [vmem:[%s12466_s1 + $0x8] sm:$0xf0] }
 0x102   :  { %2162 = vmatpush.bf16.msrb.mxu3 %v7024_v41  ;;  %v8859_v41 = vld [vmem:[%s12466_s1 + $0x34] sm:$0xf]  ;;  %v8856_v17 = vld [vmem:[%s12466_s1 + $0x14] sm:$0xf0]  ;;  %v8854_v32 = vld [vmem:[%s12466_s1 + $0x4] sm:$0xf0] }
 0x103   :  { %2017 = vmatmul.bf16.vlgmr.msrb.gmra.mxu0 %v1906_v59  ;;  %v967_v35 = vpop.f32.mrf.mxu1  ;;  %v8853_v33 = vld [vmem:[%s12466_s1 + $0x4] sm:$0xf] }
 0x104   :  { %2275 = vmatpush.bf16.msra.mxu0 %v7140_v42  ;;  %2150 = vmatmul.bf16.vlgmr.msrb.gmra.mxu2 %v2039_v56  ;;  %v968_v39 = vadd.f32 %v967_v35, %v862_v21  ;;  %v7173_v42 = vld [vmem:[%s12466_s1 + $0x38] sm:$0xf0]  ;;  %v7149_v35 = vld [vmem:[%s12466_s1 + $0x8] sm:$0xf0] }
 0x105   :  { %2288 = vmatpush.bf16.msra.mxu1 %v7144_v43  ;;  %2408 = vmatpush.bf16.msra.mxu2 %v7204_v44  ;;  %v971_v43 = vmax.f32 %v955_v34, 0.0  ;;  %v995_v44 = vperm.slane %v992_v24, 1  ;;  %v7176_v55 = vor.u32 %v8859_v41, %v7173_v42  ;;  %v7156_v24 = vor.u32 %v8856_v17, %v7155_v16 }
 0x106   :  { %2421 = vmatpush.bf16.msra.mxu3 %v7208_v48  ;;  %2030 = vmatmul.bf16.vlgmr.msrb.gmra.mxu1 %v1906_v59  ;;  %v972_v46 = vmax.f32 %v968_v39, 0.0  ;;  %v7172_v48 = vor.u32 %v8860_v38, %v7171_v37  ;;  %v8884_v37 = vld [vmem:[%s12466_s1 + $0x74] sm:$0xf0]  ;;  %v8883_v39 = vld [vmem:[%s12466_s1 + $0x74] sm:$0xf]  ;;  %v7088_v41 = vor.u32 %v8837_v26, %v7085_v27  ;;  %v7148_v42 = vor.u32 %v8854_v32, %v7147_v31 }
 0x107   :  { %2163 = vmatmul.bf16.vlgmr.msrb.gmra.mxu3 %v2039_v56  ;;  %v1087_v52 = vpop.f32.mrf.mxu2  ;;  %v7101_v56 = vld [vmem:[%s12466_s1 + $0x28] sm:$0xf0]  ;;  %v8875_v26 = vld [vmem:[%s12466_s1 + $0x34] sm:$0xf]  ;;  %v7237_v27 = vld [vmem:[%s12466_s1 + $0x38] sm:$0xf0] }
 0x108   :  { %2276 = vmatpush.bf16.msra.mxu0 %v7132_v57  ;;  %v7163_v57 = vld [vmem:[%s12466_s1 + $0x20] sm:$0xf]  ;;  %v11068_v59 = vpack.c.bf16 %v972_v46, %v971_v43  ;;  %v956_v4 = vpop.f32.mrf.mxu0  ;;  %v7104_v6 = vor.u32 %v8841_v51, %v7101_v56  ;;  %v7152_v43 = vor.u32 %v8853_v33, %v7149_v35  ;;  %v8892_v46 = vld [vmem:[%s12469_s3 + $0x38] sm:$0xff]  ;;  %v7261_v51 = vld [vmem:[%s12466_s1 + $0x68] sm:$0xf0]  ;;  %v1261_v32 = vperm.slane %v1258_v15, 1 }
 0x109   :  { %2289 = vmatpush.bf16.msra.mxu1 %v7136_v60  ;;  %2409 = vmatpush.bf16.msra.mxu2 %v7196_v61  ;;  %v1088_v60 = vadd.f32 %v1087_v52, %v994_v40  ;;  %v7164_v7 = vor.u32 %v8858_v58, %v7163_v57  ;;  %v7269_v40 = vld [vmem:[%s12466_s1 + $0x78] sm:$0xf0]  ;;  %v2305_v52 = vld [vmem:[%s12467_s0 + $0x44] sm:$0xf]  ;;  %v8891_v56 = vld [vmem:[%s12469_s3 + $0x30] sm:$0xff]  ;;  %v7240_v35 = vor.u32 %v8875_v26, %v7237_v27 }
 0x10a   :  { %2422 = vmatpush.bf16.msra.mxu3 %v7200_v1  ;;  %v1100_v61 = vpop.f32.mrf.mxu3  ;;  %v7100_v1 = vor.u32 %v8842_v50, %v7099_v49  ;;  %v8900_v49 = vld [vmem:[%s12469_s3 + $0x78] sm:$0xff]  ;;  %v8881_v50 = vld [vmem:[%s12466_s1 + $0x64] sm:$0xf]  ;;  %v2172_v57 = vld [vmem:[%s12467_s0 + $0x40] sm:$0xf] }
 0x10b   :  { %v1101_v0 = vadd.f32 %v1100_v61, %v995_v44  ;;  %v1104_v3 = vmax.f32 %v1088_v60, 0.0  ;;  %v7264_v58 = vor.u32 %v8881_v50, %v7261_v51  ;;  %v8899_v60 = vld [vmem:[%s12469_s3 + $0x70] sm:$0xff]  ;;  %v8890_v4 = vld [vmem:[%s12469_s3 + $0x28] sm:$0xff] }
 0x10c   :  { %2277 = vmatpush.bf16.msra.mxu0 %v7124_v8  ;;  %v8840_v8 = vld [vmem:[%s12466_s1 + $0x14] sm:$0xf0]  ;;  %v7251_v61 = vld [vmem:[%s12466_s1 + $0x50] sm:$0xf] }
 0x10d   :  { %2290 = vmatpush.bf16.msra.mxu1 %v7128_v11  ;;  %2410 = vmatpush.bf16.msra.mxu2 %v7188_v13  ;;  %v1105_v10 = vmax.f32 %v1101_v0, 0.0  ;;  %v969_v11 = vpop.f32.mrf.mxu1  ;;  %v7168_v13 = vor.u32 %v8857_v62, %v7165_v63  ;;  %v7092_v21 = vor.u32 %v8840_v8, %v7091_v2  ;;  %v8880_v62 = vld [vmem:[%s12466_s1 + $0x54] sm:$0xf0]  ;;  %v8879_v63 = vld [vmem:[%s12466_s1 + $0x54] sm:$0xf] }
 0x10e   :  { %2423 = vmatpush.bf16.msra.mxu3 %v7192_v18  ;;  %v8855_v18 = vld [vmem:[%s12466_s1 + $0x14] sm:$0xf]  ;;  %v7253_v0 = vld [vmem:[%s12466_s1 + $0x58] sm:$0xf0]  ;;  %v7252_v2 = vor.u32 %v8880_v62, %v7251_v61  ;;  %v7245_v11 = vld [vmem:[%s12466_s1 + $0x48] sm:$0xf0] }
 0x10f   :  { %v11100_v20 = vpack.c.bf16 %v1105_v10, %v1104_v3  ;;  %v7256_v3 = vor.u32 %v8879_v63, %v7253_v0  ;;  %v8877_v10 = vld [vmem:[%s12466_s1 + $0x44] sm:$0xf]  ;;  %v8887_v51 = vld [vmem:[%s12469_s3 + $0x10] sm:$0xff]  ;;  %v7221_v61 = vld [vmem:[%s12466_s1 + $0x18] sm:$0xf0] }
 0x110   :  { %2278 = vmatpush.bf16.msra.mxu0 %v7116_v25  ;;  %v8838_v25 = vld [vmem:[%s12466_s1 + $0x4] sm:$0xf0]  ;;  %v8915_v26 = vld [vmem:[%s12469_s3 + $0xf0] sm:$0xff] }
 0x111   :  { %2291 = vmatpush.bf16.msra.mxu1 %v7120_v28  ;;  %2411 = vmatpush.bf16.msra.mxu2 %v7180_v29  ;;  %v1089_v28 = vpop.f32.mrf.mxu2  ;;  %v7160_v29 = vor.u32 %v8855_v18, %v7157_v19  ;;  %v7084_v38 = vor.u32 %v8838_v25, %v7083_v22  ;;  %v7248_v18 = vor.u32 %v8877_v10, %v7245_v11  ;;  %v8889_v19 = vld [vmem:[%s12469_s3 + $0x20] sm:$0xff]  ;;  %v8876_v22 = vld [vmem:[%s12466_s1 + $0x34] sm:$0xf0]  ;;  %v8923_v27 = vld [vmem:[%s12469_s3 + $0x130] sm:$0xff] }
 0x112   :  { %2424 = vmatpush.bf16.msra.mxu3 %v7184_v36  ;;  %v1102_v34 = vpop.f32.mrf.mxu3  ;;  %v7267_v36 = vld [vmem:[%s12466_s1 + $0x70] sm:$0xf]  ;;  %v8897_v25 = vld [vmem:[%s12469_s3 + $0x60] sm:$0xff] }
 0x113   :  { %v7268_v44 = vor.u32 %v8884_v37, %v7267_v36  ;;  %v8888_v36 = vld [vmem:[%s12469_s3 + $0x18] sm:$0xff]  ;;  %v7227_v37 = vld [vmem:[%s12466_s1 + $0x20] sm:$0xf] }
 0x114   :  { %2279 = vmatpush.bf16.msra.mxu0 %v7108_v45  ;;  %v7272_v45 = vor.u32 %v8883_v39, %v7269_v40  ;;  %v8896_v40 = vld [vmem:[%s12469_s3 + $0x58] sm:$0xff] }
 0x115   :  { %2292 = vmatpush.bf16.msra.mxu1 %v7112_v47  ;;  %2412 = vmatpush.bf16.msra.mxu2 %v7172_v48  ;;  %v7259_v47 = vld [vmem:[%s12466_s1 + $0x60] sm:$0xf]  ;;  %v8882_v48 = vld [vmem:[%s12466_s1 + $0x64] sm:$0xf0] }
 0x116   :  { %2425 = vmatpush.bf16.msra.mxu3 %v7176_v55  ;;  %v7260_v55 = vor.u32 %v8882_v48, %v7259_v47 }
 0x118   :  { %2280 = vmatpush.bf16.msra.mxu0 %v7100_v1  ;;  %v1125_v1 = vld [vmem:[%s12468_s2] sm:$0x3] }
 0x119   :  { %2293 = vmatpush.bf16.msra.mxu1 %v7104_v6  ;;  %2413 = vmatpush.bf16.msra.mxu2 %v7164_v7  ;;  %v7243_v6 = vld [vmem:[%s12466_s1 + $0x40] sm:$0xf]  ;;  %v8878_v7 = vld [vmem:[%s12466_s1 + $0x44] sm:$0xf0]  ;;  %v1127_v8 = vperm.slane %v1125_v1, 0 }
 0x11a   :  { %2426 = vmatpush.bf16.msra.mxu3 %v7168_v13  ;;  %v1128_v13 = vperm.slane %v1125_v1, 1  ;;  %v7244_v16 = vor.u32 %v8878_v7, %v7243_v6  ;;  %v8886_v1 = vld [vmem:[%s12469_s3 + $0x8] sm:$0xff]  ;;  %v8869_v7 = vld [vmem:[%s12466_s1 + $0x4] sm:$0xf] }
 0x11b   :  { %v8894_v6 = vld [vmem:[%s12469_s3 + $0x48] sm:$0xff] }
 0x11c   :  { %2281 = vmatpush.bf16.msra.mxu0 %v7092_v21  ;;  %v7235_v21 = vld [vmem:[%s12466_s1 + $0x30] sm:$0xf] }
 0x11d   :  { %2294 = vmatpush.bf16.msra.mxu1 %v7096_v23  ;;  %2414 = vmatpush.bf16.msra.mxu2 %v7156_v24  ;;  %v7236_v33 = vor.u32 %v8876_v22, %v7235_v21  ;;  %v8924_v21 = vld [vmem:[%s12469_s3 + $0x138] sm:$0xff] }
 0x11e   :  { %2427 = vmatpush.bf16.msra.mxu3 %v7160_v29  ;;  %v1260_v29 = vperm.slane %v1258_v15, 0  ;;  %v3221_v15 = vunpack.c.l.b16 %v10468_v5  ;;  %v8932_v22 = vld [vmem:[%s12469_s3 + $0x178] sm:$0xff] }
 0x120   :  { %2282 = vmatpush.bf16.msra.mxu0 %v7084_v38  ;;  %v1220_v17 = vpop.f32.mrf.mxu0  ;;  %v8874_v38 = vld [vmem:[%s12466_s1 + $0x24] sm:$0xf0] }
 0x121   :  { %2295 = vmatpush.bf16.msra.mxu1 %v7088_v41  ;;  %2415 = vmatpush.bf16.msra.mxu2 %v7148_v42  ;;  %v1221_v23 = vadd.f32 %v1220_v17, %v1127_v8  ;;  %v8873_v41 = vld [vmem:[%s12466_s1 + $0x24] sm:$0xf]  ;;  %v7229_v42 = vld [vmem:[%s12466_s1 + $0x28] sm:$0xf0]  ;;  %v7228_v47 = vor.u32 %v8874_v38, %v7227_v37  ;;  %v8908_v17 = vld [vmem:[%s12469_s3 + $0xb8] sm:$0xff] }
 0x122   :  { %2428 = vmatpush.bf16.msra.mxu3 %v7152_v43  ;;  %v7232_v50 = vor.u32 %v8873_v41, %v7229_v42  ;;  %v7213_v8 = vld [vmem:[%s12466_s1 + $0x8] sm:$0xf0]  ;;  %v1524_v37 = vld [vmem:[%s12468_s2] sm:$0x3] }
 0x123   :  { %2283 = vmatmul.bf16.vlgmr.msra.gmra.mxu0 %v2172_v57  ;;  %v1233_v24 = vpop.f32.mrf.mxu1  ;;  %v1237_v31 = vmax.f32 %v1221_v23, 0.0  ;;  %v7216_v11 = vor.u32 %v8869_v7, %v7213_v8  ;;  %v3259_v23 = vpack.c.b16 %v3221_v15, %v3221_v15  ;;  %v8905_v38 = vld [vmem:[%s12469_s3 + $0xa0] sm:$0xff]  ;;  %v8927_v8 = vld [vmem:[%s12469_s3 + $0x150] sm:$0xff] }
 0x124   :  { %2541 = vmatpush.bf16.msrb.mxu0 %v7268_v44  ;;  %2416 = vmatmul.bf16.vlgmr.msra.gmra.mxu2 %v2305_v52  ;;  %v1234_v28 = vadd.f32 %v1233_v24, %v1128_v13  ;;  %v8885_v13 = vld [vmem:[%s12469_s3] sm:$0xff]  ;;  %v2438_v24 = vld [vmem:[%s12467_s0 + $0x48] sm:$0xf] }
 0x125   :  { %2554 = vmatpush.bf16.msrb.mxu1 %v7272_v45  ;;  %5159 = vmatpush.bf16.msrb.mxu2 %v8892_v46  ;;  %v8921_v41 = vld [vmem:[%s12469_s3 + $0x120] sm:$0xff] }
 0x126   :  { %5172 = vmatpush.bf16.msrb.mxu3 %v8900_v49  ;;  %2296 = vmatmul.bf16.vlgmr.msra.gmra.mxu1 %v2172_v57  ;;  %v1238_v34 = vmax.f32 %v1234_v28, 0.0  ;;  %v8931_v28 = vld [vmem:[%s12469_s3 + $0x170] sm:$0xff] }
 0x127   :  { %2429 = vmatmul.bf16.vlgmr.msra.gmra.mxu3 %v2305_v52  ;;  %v1353_v39 = vpop.f32.mrf.mxu2  ;;  %v7219_v52 = vld [vmem:[%s12466_s1 + $0x10] sm:$0xf] }
 0x128   :  { %2542 = vmatpush.bf16.msrb.mxu0 %v7260_v55  ;;  %v11240_v43 = vpack.c.bf16 %v1238_v34, %v1237_v31  ;;  %v1354_v44 = vadd.f32 %v1353_v39, %v1260_v29  ;;  %v1222_v49 = vpop.f32.mrf.mxu0  ;;  %v8872_v55 = vld [vmem:[%s12466_s1 + $0x14] sm:$0xf0]  ;;  %v1391_v29 = vld [vmem:[%s12468_s2] sm:$0x3]  ;;  %v8906_v31 = vld [vmem:[%s12469_s3 + $0xa8] sm:$0xff] }
 0x129   :  { %2555 = vmatpush.bf16.msrb.mxu1 %v7264_v58  ;;  %5160 = vmatpush.bf16.msrb.mxu2 %v8891_v56  ;;  %v8895_v58 = vld [vmem:[%s12469_s3 + $0x50] sm:$0xff]  ;;  %v7220_v63 = vor.u32 %v8872_v55, %v7219_v52  ;;  %v1393_v34 = vperm.slane %v1391_v29, 0  ;;  %v1527_v49 = vperm.slane %v1524_v37, 1  ;;  %v8912_v52 = vld [vmem:[%s12469_s3 + $0xd8] sm:$0xff] }
 0x12a   :  { %5173 = vmatpush.bf16.msrb.mxu3 %v8899_v60  ;;  %v1366_v45 = vpop.f32.mrf.mxu3  ;;  %v1370_v48 = vmax.f32 %v1354_v44, 0.0  ;;  %v8871_v60 = vld [vmem:[%s12466_s1 + $0x14] sm:$0xf]  ;;  %v8920_v55 = vld [vmem:[%s12469_s3 + $0x118] sm:$0xff] }
 0x12b   :  { %v1367_v46 = vadd.f32 %v1366_v45, %v1261_v32  ;;  %v1235_v57 = vpop.f32.mrf.mxu1  ;;  %v7224_v0 = vor.u32 %v8871_v60, %v7221_v61  ;;  %v8914_v32 = vld [vmem:[%s12469_s3 + $0xe8] sm:$0xff]  ;;  %v8929_v45 = vld [vmem:[%s12469_s3 + $0x160] sm:$0xff] }
 0x12c   :  { %2543 = vmatpush.bf16.msrb.mxu0 %v7252_v2  ;;  %v7211_v2 = vld [vmem:[%s12466_s1] sm:$0xf]  ;;  %v8928_v57 = vld [vmem:[%s12469_s3 + $0x158] sm:$0xff] }
 0x12d   :  { %2556 = vmatpush.bf16.msrb.mxu1 %v7256_v3  ;;  %5161 = vmatpush.bf16.msrb.mxu2 %v8890_v4  ;;  %v1371_v56 = vmax.f32 %v1367_v46, 0.0  ;;  %v8870_v3 = vld [vmem:[%s12466_s1 + $0x4] sm:$0xf0] }
 0x12e   :  { %5174 = vmatpush.bf16.msrb.mxu3 %v8898_v9  ;;  %v7212_v10 = vor.u32 %v8870_v3, %v7211_v2  ;;  %v8911_v3 = vld [vmem:[%s12469_s3 + $0xd0] sm:$0xff] }
 0x12f   :  { %v11260_v62 = vpack.c.bf16 %v1371_v56, %v1370_v48  ;;  %v1355_v4 = vpop.f32.mrf.mxu2 }
 0x130   :  { %2544 = vmatpush.bf16.msrb.mxu0 %v7244_v16  ;;  %v8893_v16 = vld [vmem:[%s12469_s3 + $0x40] sm:$0xff]  ;;  %v8919_v4 = vld [vmem:[%s12469_s3 + $0x110] sm:$0xff] }
 0x131   :  { %2557 = vmatpush.bf16.msrb.mxu1 %v7248_v18  ;;  %5162 = vmatpush.bf16.msrb.mxu2 %v8889_v19  ;;  %v3222_v18 = vunpack.c.h.b16 %v10468_v5  ;;  %v8916_v19 = vld [vmem:[%s12469_s3 + $0xf8] sm:$0xff]  ;;  %v8907_v5 = vld [vmem:[%s12469_s3 + $0xb0] sm:$0xff] }
 0x132   :  { %5175 = vmatpush.bf16.msrb.mxu3 %v8897_v25  ;;  %v1368_v9 = vpop.f32.mrf.mxu3 }
 0x133   :  { %v3260_v25 = vpack.c.b16 %v3222_v18, %v3222_v18  ;;  %v8901_v18 = vld [vmem:[%s12469_s3 + $0x80] sm:$0xff] }
 0x134   :  { %2545 = vmatpush.bf16.msrb.mxu0 %v7236_v33  ;;  %v8922_v33 = vld [vmem:[%s12469_s3 + $0x128] sm:$0xff] }
 0x135   :  { %2558 = vmatpush.bf16.msrb.mxu1 %v7240_v35  ;;  %5163 = vmatpush.bf16.msrb.mxu2 %v8888_v36  ;;  %v8930_v35 = vld [vmem:[%s12469_s3 + $0x168] sm:$0xff]  ;;  %v1394_v36 = vperm.slane %v1391_v29, 1  ;;  %v8964_v29 = vld [vmem:[%s12469_s3 + $0x278] sm:$0xff] }
 0x136   :  { %5176 = vmatpush.bf16.msrb.mxu3 %v8896_v40  ;;  %v8913_v40 = vld [vmem:[%s12469_s3 + $0xe0] sm:$0xff] }
 0x138   :  { %2546 = vmatpush.bf16.msrb.mxu0 %v7228_v47  ;;  %v1526_v47 = vperm.slane %v1524_v37, 0  ;;  %v1657_v37 = vld [vmem:[%s12468_s2] sm:$0x3] }
 0x139   :  { %2559 = vmatpush.bf16.msrb.mxu1 %v7232_v50  ;;  %5164 = vmatpush.bf16.msrb.mxu2 %v8887_v51  ;;  %v8904_v50 = vld [vmem:[%s12469_s3 + $0x98] sm:$0xff] }
 0x13a   :  { %5177 = vmatpush.bf16.msrb.mxu3 %v8895_v58 }
 0x13c   :  { %2547 = vmatpush.bf16.msrb.mxu0 %v7220_v63 }
 0x13d   :  { %2560 = vmatpush.bf16.msrb.mxu1 %v7224_v0  ;;  %5165 = vmatpush.bf16.msrb.mxu2 %v8886_v1  ;;  %v8903_v0 = vld [vmem:[%s12469_s3 + $0x90] sm:$0xff] }
 0x13e   :  { %5178 = vmatpush.bf16.msrb.mxu3 %v8894_v6 }
 0x140   :  { %2548 = vmatpush.bf16.msrb.mxu0 %v7212_v10  ;;  %v1486_v39 = vpop.f32.mrf.mxu0  ;;  %v8902_v10 = vld [vmem:[%s12469_s3 + $0x88] sm:$0xff] }
 0x141   :  { %2561 = vmatpush.bf16.msrb.mxu1 %v7216_v11  ;;  %5166 = vmatpush.bf16.msrb.mxu2 %v8885_v13  ;;  %v1487_v42 = vadd.f32 %v1486_v39, %v1393_v34  ;;  %v8910_v11 = vld [vmem:[%s12469_s3 + $0xc8] sm:$0xff]  ;;  %v8955_v34 = vld [vmem:[%s12469_s3 + $0x230] sm:$0xff] }
 0x142   :  { %5179 = vmatpush.bf16.msrb.mxu3 %v8893_v16  ;;  %v8918_v13 = vld [vmem:[%s12469_s3 + $0x108] sm:$0xff] }
 0x143   :  { %2549 = vmatmul.bf16.vlgmr.msrb.gmra.mxu0 %v2438_v24  ;;  %v1499_v44 = vpop.f32.mrf.mxu1  ;;  %v1503_v48 = vmax.f32 %v1487_v42, 0.0  ;;  %v8926_v16 = vld [vmem:[%s12469_s3 + $0x148] sm:$0xff] }
 0x144   :  { %5185 = vmatpush.bf16.msra.mxu0 %v8908_v17  ;;  %5167 = vmatmul.bf16.vlgmr.msrb.gmra.mxu2 %v3259_v23  ;;  %v1500_v46 = vadd.f32 %v1499_v44, %v1394_v36  ;;  %v8925_v23 = vld [vmem:[%s12469_s3 + $0x140] sm:$0xff]  ;;  %v8963_v36 = vld [vmem:[%s12469_s3 + $0x270] sm:$0xff]  ;;  %v8946_v39 = vld [vmem:[%s12469_s3 + $0x1e8] sm:$0xff]  ;;  %v1660_v44 = vperm.slane %v1657_v37, 1 }
 0x145   :  { %5198 = vmatpush.bf16.msra.mxu1 %v8916_v19  ;;  %5211 = vmatpush.bf16.msra.mxu2 %v8924_v21  ;;  %v8909_v19 = vld [vmem:[%s12469_s3 + $0xc0] sm:$0xff]  ;;  %v8962_v42 = vld [vmem:[%s12469_s3 + $0x268] sm:$0xff] }
 0x146   :  { %5224 = vmatpush.bf16.msra.mxu3 %v8932_v22  ;;  %2562 = vmatmul.bf16.vlgmr.msrb.gmra.mxu1 %v2438_v24  ;;  %v1504_v51 = vmax.f32 %v1500_v46, 0.0  ;;  %v8917_v21 = vld [vmem:[%s12469_s3 + $0x100] sm:$0xff]  ;;  %v3223_v22 = vunpack.c.l.b16 %v10509_v30  ;;  %v3224_v24 = vunpack.c.h.b16 %v10509_v30 }
 0x147   :  { %5180 = vmatmul.bf16.vlgmr.msrb.gmra.mxu3 %v3260_v25  ;;  %v1619_v56 = vpop.f32.mrf.mxu2  ;;  %v3225_v25 = vunpack.c.l.b16 %v10652_v53  ;;  %v8937_v46 = vld [vmem:[%s12469_s3 + $0x1a0] sm:$0xff] }
 0x148   :  { %5186 = vmatpush.bf16.msra.mxu0 %v8907_v5  ;;  %v11357_v58 = vpack.c.bf16 %v1504_v51, %v1503_v48  ;;  %v1620_v60 = vadd.f32 %v1619_v56, %v1526_v47  ;;  %v1488_v2 = vpop.f32.mrf.mxu0  ;;  %v8940_v5 = vld [vmem:[%s12469_s3 + $0x1b8] sm:$0xff]  ;;  %v3261_v30 = vpack.c.b16 %v3223_v22, %v3223_v22  ;;  %v8945_v48 = vld [vmem:[%s12469_s3 + $0x1e0] sm:$0xff]  ;;  %v8934_v22 = vld [vmem:[%s12469_s3 + $0x188] sm:$0xff] }
 0x149   :  { %5199 = vmatpush.bf16.msra.mxu1 %v8915_v26  ;;  %5212 = vmatpush.bf16.msra.mxu2 %v8923_v27  ;;  %v8948_v26 = vld [vmem:[%s12469_s3 + $0x1f8] sm:$0xff] }
 0x14a   :  { %5225 = vmatpush.bf16.msra.mxu3 %v8931_v28  ;;  %v1632_v61 = vpop.f32.mrf.mxu3  ;;  %v1636_v1 = vmax.f32 %v1620_v60, 0.0  ;;  %v8956_v27 = vld [vmem:[%s12469_s3 + $0x238] sm:$0xff]  ;;  %v3226_v28 = vunpack.c.h.b16 %v10652_v53  ;;  %v8947_v53 = vld [vmem:[%s12469_s3 + $0x1f0] sm:$0xff] }
 0x14b   :  { %v1633_v63 = vadd.f32 %v1632_v61, %v1527_v49  ;;  %v1501_v7 = vpop.f32.mrf.mxu1  ;;  %v8953_v49 = vld [vmem:[%s12469_s3 + $0x220] sm:$0xff]  ;;  %v8936_v61 = vld [vmem:[%s12469_s3 + $0x198] sm:$0xff] }
 0x14c   :  { %5187 = vmatpush.bf16.msra.mxu0 %v8906_v31  ;;  %v8939_v31 = vld [vmem:[%s12469_s3 + $0x1b0] sm:$0xff] }
 0x14d   :  { %5200 = vmatpush.bf16.msra.mxu1 %v8914_v32  ;;  %5213 = vmatpush.bf16.msra.mxu2 %v8922_v33  ;;  %v1637_v6 = vmax.f32 %v1633_v63, 0.0  ;;  %v3262_v32 = vpack.c.b16 %v3224_v24, %v3224_v24  ;;  %v3263_v33 = vpack.c.b16 %v3225_v25, %v3225_v25  ;;  %v8958_v25 = vld [vmem:[%s12469_s3 + $0x248] sm:$0xff] }
 0x14e   :  { %5226 = vmatpush.bf16.msra.mxu3 %v8930_v35  ;;  %v3264_v35 = vpack.c.b16 %v3226_v28, %v3226_v28  ;;  %v8941_v28 = vld [vmem:[%s12469_s3 + $0x1c0] sm:$0xff] }
 0x14f   :  { %v11371_v9 = vpack.c.bf16 %v1637_v6, %v1636_v1  ;;  %v1621_v15 = vpop.f32.mrf.mxu2  ;;  %v8952_v1 = vld [vmem:[%s12469_s3 + $0x218] sm:$0xff] }
 0x150   :  { %5188 = vmatpush.bf16.msra.mxu0 %v8905_v38  ;;  %v8938_v38 = vld [vmem:[%s12469_s3 + $0x1a8] sm:$0xff]  ;;  %v8943_v15 = vld [vmem:[%s12469_s3 + $0x1d0] sm:$0xff] }
 0x151   :  { %5201 = vmatpush.bf16.msra.mxu1 %v8913_v40  ;;  %5214 = vmatpush.bf16.msra.mxu2 %v8921_v41  ;;  %v8954_v40 = vld [vmem:[%s12469_s3 + $0x228] sm:$0xff]  ;;  %v1659_v41 = vperm.slane %v1657_v37, 0  ;;  %v8996_v37 = vld [vmem:[%s12469_s3 + $0x378] sm:$0xff] }
 0x152   :  { %5227 = vmatpush.bf16.msra.mxu3 %v8929_v45  ;;  %v1634_v17 = vpop.f32.mrf.mxu3  ;;  %v1790_v45 = vld [vmem:[%s12468_s2] sm:$0x3] }
 0x153   :  { %v1792_v56 = vperm.slane %v1790_v45, 0  ;;  %v1793_v60 = vperm.slane %v1790_v45, 1  ;;  %v8970_v45 = vld [vmem:[%s12469_s3 + $0x2a8] sm:$0xff] }
 0x154   :  { %5189 = vmatpush.bf16.msra.mxu0 %v8904_v50 }
 0x155   :  { %5202 = vmatpush.bf16.msra.mxu1 %v8912_v52  ;;  %5215 = vmatpush.bf16.msra.mxu2 %v8920_v55  ;;  %v8961_v52 = vld [vmem:[%s12469_s3 + $0x260] sm:$0xff] }
 0x156   :  { %5228 = vmatpush.bf16.msra.mxu3 %v8928_v57 }
 0x158   :  { %5190 = vmatpush.bf16.msra.mxu0 %v8903_v0  ;;  %v8944_v0 = vld [vmem:[%s12469_s3 + $0x1d8] sm:$0xff] }
 0x159   :  { %5203 = vmatpush.bf16.msra.mxu1 %v8911_v3  ;;  %5216 = vmatpush.bf16.msra.mxu2 %v8919_v4  ;;  %v8960_v3 = vld [vmem:[%s12469_s3 + $0x258] sm:$0xff] }
 0x15a   :  { %5229 = vmatpush.bf16.msra.mxu3 %v8927_v8 }
 0x15c   :  { %5191 = vmatpush.bf16.msra.mxu0 %v8902_v10  ;;  %v8935_v10 = vld [vmem:[%s12469_s3 + $0x190] sm:$0xff] }
 0x15d   :  { %5204 = vmatpush.bf16.msra.mxu1 %v8910_v11  ;;  %5217 = vmatpush.bf16.msra.mxu2 %v8918_v13 }
 0x15e   :  { %5230 = vmatpush.bf16.msra.mxu3 %v8926_v16  ;;  %v8951_v16 = vld [vmem:[%s12469_s3 + $0x210] sm:$0xff] }
 0x160   :  { %5192 = vmatpush.bf16.msra.mxu0 %v8901_v18  ;;  %v1752_v47 = vpop.f32.mrf.mxu0 }
 0x161   :  { %5205 = vmatpush.bf16.msra.mxu1 %v8909_v19  ;;  %5218 = vmatpush.bf16.msra.mxu2 %v8917_v21  ;;  %v1753_v50 = vadd.f32 %v1752_v47, %v1659_v41  ;;  %v8959_v19 = vld [vmem:[%s12469_s3 + $0x250] sm:$0xff]  ;;  %v8986_v47 = vld [vmem:[%s12469_s3 + $0x328] sm:$0xff] }
 0x162   :  { %5231 = vmatpush.bf16.msra.mxu3 %v8925_v23  ;;  %v8942_v23 = vld [vmem:[%s12469_s3 + $0x1c8] sm:$0xff]  ;;  %v8987_v41 = vld [vmem:[%s12469_s3 + $0x330] sm:$0xff] }
 0x163   :  { %5193 = vmatmul.bf16.vlgmr.msra.gmra.mxu0 %v3261_v30  ;;  %v1765_v51 = vpop.f32.mrf.mxu1  ;;  %v1769_v57 = vmax.f32 %v1753_v50, 0.0  ;;  %v3227_v30 = vunpack.c.l.b16 %v10684_v12  ;;  %v8969_v50 = vld [vmem:[%s12469_s3 + $0x2a0] sm:$0xff] }
 0x164   :  { %5237 = vmatpush.bf16.msrb.mxu0 %v8940_v5  ;;  %5206 = vmatmul.bf16.vlgmr.msra.gmra.mxu1 %v3262_v32  ;;  %v1766_v55 = vadd.f32 %v1765_v51, %v1660_v44  ;;  %v8950_v5 = vld [vmem:[%s12469_s3 + $0x208] sm:$0xff]  ;;  %v8972_v32 = vld [vmem:[%s12469_s3 + $0x2b8] sm:$0xff]  ;;  %v8995_v44 = vld [vmem:[%s12469_s3 + $0x370] sm:$0xff] }
 0x165   :  { %5250 = vmatpush.bf16.msrb.mxu1 %v8948_v26  ;;  %5263 = vmatpush.bf16.msrb.mxu2 %v8956_v27  ;;  %v8933_v27 = vld [vmem:[%s12469_s3 + $0x180] sm:$0xff] }
 0x166   :  { %5276 = vmatpush.bf16.msrb.mxu3 %v8964_v29  ;;  %5219 = vmatmul.bf16.vlgmr.msra.gmra.mxu2 %v3263_v33  ;;  %v1770_v63 = vmax.f32 %v1766_v55, 0.0  ;;  %v8949_v29 = vld [vmem:[%s12469_s3 + $0x200] sm:$0xff]  ;;  %v3228_v33 = vunpack.c.h.b16 %v10684_v12  ;;  %v3265_v12 = vpack.c.b16 %v3227_v30, %v3227_v30 }
 0x167   :  { %5232 = vmatmul.bf16.vlgmr.msra.gmra.mxu3 %v3264_v35  ;;  %v1885_v2 = vpop.f32.mrf.mxu2  ;;  %v8988_v35 = vld [vmem:[%s12469_s3 + $0x338] sm:$0xff]  ;;  %v8985_v55 = vld [vmem:[%s12469_s3 + $0x320] sm:$0xff] }
 0x168   :  { %5238 = vmatpush.bf16.msrb.mxu0 %v8939_v31  ;;  %v11467_v4 = vpack.c.bf16 %v1770_v63, %v1769_v57  ;;  %v1886_v6 = vadd.f32 %v1885_v2, %v1792_v56  ;;  %v1754_v13 = vpop.f32.mrf.mxu0  ;;  %v8957_v31 = vld [vmem:[%s12469_s3 + $0x240] sm:$0xff]  ;;  %v8968_v63 = vld [vmem:[%s12469_s3 + $0x298] sm:$0xff] }
 0x169   :  { %5251 = vmatpush.bf16.msrb.mxu1 %v8947_v53  ;;  %5264 = vmatpush.bf16.msrb.mxu2 %v8955_v34  ;;  %v3229_v53 = vunpack.c.l.b16 %v10860_v54  ;;  %v8980_v34 = vld [vmem:[%s12469_s3 + $0x2f8] sm:$0xff]  ;;  %v8993_v57 = vld [vmem:[%s12469_s3 + $0x360] sm:$0xff] }
 0x16a   :  { %5277 = vmatpush.bf16.msrb.mxu3 %v8963_v36  ;;  %v1898_v7 = vpop.f32.mrf.mxu3  ;;  %v1902_v11 = vmax.f32 %v1886_v6, 0.0  ;;  %v3230_v36 = vunpack.c.h.b16 %v10860_v54  ;;  %v8979_v54 = vld [vmem:[%s12469_s3 + $0x2f0] sm:$0xff]  ;;  %v8981_v30 = vld [vmem:[%s12469_s3 + $0x300] sm:$0xff] }
 0x16b   :  { %v1899_v8 = vadd.f32 %v1898_v7, %v1793_v60  ;;  %v1767_v18 = vpop.f32.mrf.mxu1 }
 0x16c   :  { %5239 = vmatpush.bf16.msrb.mxu0 %v8938_v38  ;;  %v8971_v38 = vld [vmem:[%s12469_s3 + $0x2b0] sm:$0xff] }
 0x16d   :  { %5252 = vmatpush.bf16.msrb.mxu1 %v8946_v39  ;;  %5265 = vmatpush.bf16.msrb.mxu2 %v8954_v40  ;;  %v1903_v17 = vmax.f32 %v1899_v8, 0.0  ;;  %v3266_v39 = vpack.c.b16 %v3228_v33, %v3228_v33  ;;  %v3267_v40 = vpack.c.b16 %v3229_v53, %v3229_v53  ;;  %v9004_v33 = vld [vmem:[%s12469_s3 + $0x3b8] sm:$0xff]  ;;  %v3232_v53 = vunpack.c.h.b16 %v10892_v14 }
 0x16e   :  { %5278 = vmatpush.bf16.msrb.mxu3 %v8962_v42  ;;  %v3268_v42 = vpack.c.b16 %v3230_v36, %v3230_v36  ;;  %v9020_v36 = vld [vmem:[%s12469_s3 + $0x438] sm:$0xff] }
 0x16f   :  { %v11481_v21 = vpack.c.bf16 %v1903_v17, %v1902_v11  ;;  %v1887_v24 = vpop.f32.mrf.mxu2 }
 0x170   :  { %5240 = vmatpush.bf16.msrb.mxu0 %v8937_v46  ;;  %v8978_v46 = vld [vmem:[%s12469_s3 + $0x2e8] sm:$0xff] }
 0x171   :  { %5253 = vmatpush.bf16.msrb.mxu1 %v8945_v48  ;;  %5266 = vmatpush.bf16.msrb.mxu2 %v8953_v49  ;;  %v8994_v48 = vld [vmem:[%s12469_s3 + $0x368] sm:$0xff]  ;;  %v2056_v49 = vld [vmem:[%s12468_s2] sm:$0x3] }
 0x172   :  { %5279 = vmatpush.bf16.msrb.mxu3 %v8961_v52  ;;  %v1900_v26 = vpop.f32.mrf.mxu3  ;;  %v8977_v52 = vld [vmem:[%s12469_s3 + $0x2e0] sm:$0xff]  ;;  %v2058_v60 = vperm.slane %v2056_v49, 0  ;;  %v8982_v24 = vld [vmem:[%s12469_s3 + $0x308] sm:$0xff] }
 0x173   :  { %v8990_v26 = vld [vmem:[%s12469_s3 + $0x348] sm:$0xff] }
 0x174   :  { %5241 = vmatpush.bf16.msrb.mxu0 %v8936_v61  ;;  %v2059_v61 = vperm.slane %v2056_v49, 1  ;;  %v9001_v49 = vld [vmem:[%s12469_s3 + $0x3a0] sm:$0xff] }
 0x175   :  { %5254 = vmatpush.bf16.msrb.mxu1 %v8944_v0  ;;  %5267 = vmatpush.bf16.msrb.mxu2 %v8952_v1  ;;  %v8976_v0 = vld [vmem:[%s12469_s3 + $0x2d8] sm:$0xff] }
 0x176   :  { %5280 = vmatpush.bf16.msrb.mxu3 %v8960_v3  ;;  %v8984_v1 = vld [vmem:[%s12469_s3 + $0x318] sm:$0xff] }
 0x177   :  { %v8992_v3 = vld [vmem:[%s12469_s3 + $0x358] sm:$0xff] }
 0x178   :  { %5242 = vmatpush.bf16.msrb.mxu0 %v8935_v10  ;;  %v8967_v10 = vld [vmem:[%s12469_s3 + $0x290] sm:$0xff] }
 0x179   :  { %5255 = vmatpush.bf16.msrb.mxu1 %v8943_v15  ;;  %5268 = vmatpush.bf16.msrb.mxu2 %v8951_v16  ;;  %v8975_v15 = vld [vmem:[%s12469_s3 + $0x2d0] sm:$0xff] }
 0x17a   :  { %5281 = vmatpush.bf16.msrb.mxu3 %v8959_v19  ;;  %v8983_v16 = vld [vmem:[%s12469_s3 + $0x310] sm:$0xff] }
 0x17b   :  { %v8991_v19 = vld [vmem:[%s12469_s3 + $0x350] sm:$0xff] }
 0x17c   :  { %5243 = vmatpush.bf16.msrb.mxu0 %v8934_v22 }
 0x17d   :  { %5256 = vmatpush.bf16.msrb.mxu1 %v8942_v23  ;;  %5269 = vmatpush.bf16.msrb.mxu2 %v8950_v5  ;;  %v8966_v23 = vld [vmem:[%s12469_s3 + $0x288] sm:$0xff] }
 0x17e   :  { %5282 = vmatpush.bf16.msrb.mxu3 %v8958_v25  ;;  %v8974_v5 = vld [vmem:[%s12469_s3 + $0x2c8] sm:$0xff] }
 0x180   :  { %5244 = vmatpush.bf16.msrb.mxu0 %v8933_v27  ;;  %v11553_v51 = vpop.f32.mrf.mxu0 }
 0x181   :  { %5257 = vmatpush.bf16.msrb.mxu1 %v8941_v28  ;;  %5270 = vmatpush.bf16.msrb.mxu2 %v8949_v29  ;;  %v8965_v28 = vld [vmem:[%s12469_s3 + $0x280] sm:$0xff] }
 0x182   :  { %5283 = vmatpush.bf16.msrb.mxu3 %v8957_v31  ;;  %v8973_v29 = vld [vmem:[%s12469_s3 + $0x2c0] sm:$0xff]  ;;  %v3231_v31 = vunpack.c.l.b16 %v10892_v14 }
 0x183   :  { %5245 = vmatmul.bf16.vlgmr.msrb.gmra.mxu0 %v3265_v12  ;;  %v11561_v56 = vpop.f32.mrf.mxu1  ;;  %v9028_v12 = vld [vmem:[%s12469_s3 + $0x478] sm:$0xff] }
 0x184   :  { %5289 = vmatpush.bf16.msra.mxu0 %v8972_v32  ;;  %5258 = vmatmul.bf16.vlgmr.msrb.gmra.mxu1 %v3266_v39  ;;  %v8989_v32 = vld [vmem:[%s12469_s3 + $0x340] sm:$0xff]  ;;  %v3269_v14 = vpack.c.b16 %v3231_v31, %v3231_v31  ;;  %v3270_v39 = vpack.c.b16 %v3232_v53, %v3232_v53 }
 0x185   :  { %5302 = vmatpush.bf16.msra.mxu1 %v8980_v34  ;;  %5315 = vmatpush.bf16.msra.mxu2 %v8988_v35  ;;  %v3233_v34 = vunpack.c.l.b16 %v11068_v59  ;;  %v9012_v35 = vld [vmem:[%s12469_s3 + $0x3f8] sm:$0xff]  ;;  %v9005_v31 = vld [vmem:[%s12469_s3 + $0x3c0] sm:$0xff] }
 0x186   :  { %5328 = vmatpush.bf16.msra.mxu3 %v8996_v37  ;;  %5271 = vmatmul.bf16.vlgmr.msrb.gmra.mxu2 %v3267_v40  ;;  %v3234_v37 = vunpack.c.h.b16 %v11068_v59  ;;  %v9011_v59 = vld [vmem:[%s12469_s3 + $0x3f0] sm:$0xff]  ;;  %v9021_v53 = vld [vmem:[%s12469_s3 + $0x440] sm:$0xff] }
 0x187   :  { %5284 = vmatmul.bf16.vlgmr.msrb.gmra.mxu3 %v3268_v42  ;;  %v2151_v2 = vpop.f32.mrf.mxu2  ;;  %v3271_v40 = vpack.c.b16 %v3233_v34, %v3233_v34  ;;  %v9027_v42 = vld [vmem:[%s12469_s3 + $0x470] sm:$0xff]  ;;  %v9036_v34 = vld [vmem:[%s12469_s3 + $0x4b8] sm:$0xff] }
 0x188   :  { %5290 = vmatpush.bf16.msra.mxu0 %v8971_v38  ;;  %v2152_v6 = vadd.f32 %v2151_v2, %v2058_v60  ;;  %v2020_v13 = vpop.f32.mrf.mxu0  ;;  %v9003_v38 = vld [vmem:[%s12469_s3 + $0x3b0] sm:$0xff]  ;;  %v9025_v60 = vld [vmem:[%s12469_s3 + $0x460] sm:$0xff]  ;;  %v9016_v2 = vld [vmem:[%s12469_s3 + $0x418] sm:$0xff] }
 0x189   :  { %5303 = vmatpush.bf16.msra.mxu1 %v8979_v54  ;;  %5316 = vmatpush.bf16.msra.mxu2 %v8987_v41  ;;  %v9019_v54 = vld [vmem:[%s12469_s3 + $0x430] sm:$0xff]  ;;  %v3272_v41 = vpack.c.b16 %v3234_v37, %v3234_v37  ;;  %v9044_v37 = vld [vmem:[%s12469_s3 + $0x4f8] sm:$0xff] }
 0x18a   :  { %5329 = vmatpush.bf16.msra.mxu3 %v8995_v44  ;;  %v2164_v7 = vpop.f32.mrf.mxu3  ;;  %v2168_v11 = vmax.f32 %v2152_v6, 0.0  ;;  %v9002_v44 = vld [vmem:[%s12469_s3 + $0x3a8] sm:$0xff]  ;;  %v9024_v6 = vld [vmem:[%s12469_s3 + $0x458] sm:$0xff] }
 0x18b   :  { %v2165_v8 = vadd.f32 %v2164_v7, %v2059_v61  ;;  %v2033_v18 = vpop.f32.mrf.mxu1 }
 0x18c   :  { %5291 = vmatpush.bf16.msra.mxu0 %v8970_v45  ;;  %v9010_v45 = vld [vmem:[%s12469_s3 + $0x3e8] sm:$0xff] }
 0x18d   :  { %5304 = vmatpush.bf16.msra.mxu1 %v8978_v46  ;;  %5317 = vmatpush.bf16.msra.mxu2 %v8986_v47  ;;  %v2169_v17 = vmax.f32 %v2165_v8, 0.0  ;;  %v9018_v46 = vld [vmem:[%s12469_s3 + $0x428] sm:$0xff] }
 0x18e   :  { %5330 = vmatpush.bf16.msra.mxu3 %v8994_v48  ;;  %v9026_v47 = vld [vmem:[%s12469_s3 + $0x468] sm:$0xff]  ;;  %v2322_v48 = vld [vmem:[%s12468_s2] sm:$0x3] }
 0x18f   :  { %v11590_v22 = vpack.c.bf16 %v2169_v17, %v2168_v11  ;;  %v2153_v25 = vpop.f32.mrf.mxu2  ;;  %v2324_v61 = vperm.slane %v2322_v48, 0  ;;  %v8999_v11 = vld [vmem:[%s12469_s3 + $0x390] sm:$0xff] }
 0x190   :  { %5292 = vmatpush.bf16.msra.mxu0 %v8969_v50  ;;  %v9015_v17 = vld [vmem:[%s12469_s3 + $0x410] sm:$0xff]  ;;  %v9006_v25 = vld [vmem:[%s12469_s3 + $0x3c8] sm:$0xff] }
 0x191   :  { %5305 = vmatpush.bf16.msra.mxu1 %v8977_v52  ;;  %5318 = vmatpush.bf16.msra.mxu2 %v8985_v55  ;;  %v9009_v52 = vld [vmem:[%s12469_s3 + $0x3e0] sm:$0xff] }
 0x192   :  { %5331 = vmatpush.bf16.msra.mxu3 %v8993_v57  ;;  %v2166_v27 = vpop.f32.mrf.mxu3  ;;  %v9017_v55 = vld [vmem:[%s12469_s3 + $0x420] sm:$0xff] }
 0x194   :  { %5293 = vmatpush.bf16.msra.mxu0 %v8968_v63  ;;  %v2325_v63 = vperm.slane %v2322_v48, 1 }
 0x195   :  { %5306 = vmatpush.bf16.msra.mxu1 %v8976_v0  ;;  %5319 = vmatpush.bf16.msra.mxu2 %v8984_v1  ;;  %v9000_v0 = vld [vmem:[%s12469_s3 + $0x398] sm:$0xff] }
 0x196   :  { %5332 = vmatpush.bf16.msra.mxu3 %v8992_v3  ;;  %v9008_v1 = vld [vmem:[%s12469_s3 + $0x3d8] sm:$0xff] }
 0x198   :  { %5294 = vmatpush.bf16.msra.mxu0 %v8967_v10 }
 0x199   :  { %5307 = vmatpush.bf16.msra.mxu1 %v8975_v15  ;;  %5320 = vmatpush.bf16.msra.mxu2 %v8983_v16  ;;  %v9007_v16 = vld [vmem:[%s12469_s3 + $0x3d0] sm:$0xff] }
 0x19a   :  { %5333 = vmatpush.bf16.msra.mxu3 %v8991_v19 }
 0x19c   :  { %5295 = vmatpush.bf16.msra.mxu0 %v8966_v23  ;;  %v9023_v23 = vld [vmem:[%s12469_s3 + $0x450] sm:$0xff] }
 0x19d   :  { %5308 = vmatpush.bf16.msra.mxu1 %v8974_v5  ;;  %5321 = vmatpush.bf16.msra.mxu2 %v8982_v24  ;;  %v8998_v24 = vld [vmem:[%s12469_s3 + $0x388] sm:$0xff] }
 0x19e   :  { %5334 = vmatpush.bf16.msra.mxu3 %v8990_v26  ;;  %v9014_v26 = vld [vmem:[%s12469_s3 + $0x408] sm:$0xff] }
 0x1a0   :  { %5296 = vmatpush.bf16.msra.mxu0 %v8965_v28  ;;  %v11662_v50 = vpop.f32.mrf.mxu0  ;;  %v9022_v28 = vld [vmem:[%s12469_s3 + $0x448] sm:$0xff] }
 0x1a1   :  { %5309 = vmatpush.bf16.msra.mxu1 %v8973_v29  ;;  %5322 = vmatpush.bf16.msra.mxu2 %v8981_v30  ;;  %v8997_v30 = vld [vmem:[%s12469_s3 + $0x380] sm:$0xff] }
 0x1a2   :  { %5335 = vmatpush.bf16.msra.mxu3 %v8989_v32  ;;  %v9013_v32 = vld [vmem:[%s12469_s3 + $0x400] sm:$0xff] }
 0x1a3   :  { %5297 = vmatmul.bf16.vlgmr.msra.gmra.mxu0 %v3269_v14  ;;  %v11670_v57 = vpop.f32.mrf.mxu1  ;;  %v3238_v14 = vunpack.c.h.b16 %v11240_v43 }
 0x1a4   :  { %5341 = vmatpush.bf16.msrb.mxu0 %v9004_v33  ;;  %5310 = vmatmul.bf16.vlgmr.msra.gmra.mxu1 %v3270_v39  ;;  %v3235_v33 = vunpack.c.l.b16 %v11100_v20  ;;  %v9035_v39 = vld [vmem:[%s12469_s3 + $0x4b0] sm:$0xff] }
 0x1a5   :  { %5354 = vmatpush.bf16.msrb.mxu1 %v9012_v35  ;;  %5367 = vmatpush.bf16.msrb.mxu2 %v9020_v36  ;;  %v3236_v35 = vunpack.c.h.b16 %v11100_v20  ;;  %v3237_v36 = vunpack.c.l.b16 %v11240_v43  ;;  %v9043_v43 = vld [vmem:[%s12469_s3 + $0x4f0] sm:$0xff] }
 0x1a6   :  { %5380 = vmatpush.bf16.msrb.mxu3 %v9028_v12  ;;  %5323 = vmatmul.bf16.vlgmr.msra.gmra.mxu2 %v3271_v40  ;;  %v9052_v12 = vld [vmem:[%s12469_s3 + $0x538] sm:$0xff]  ;;  %v3273_v20 = vpack.c.b16 %v3235_v33, %v3235_v33 }
 0x1a7   :  { %5336 = vmatmul.bf16.vlgmr.msra.gmra.mxu3 %v3272_v41  ;;  %v2417_v3 = vpop.f32.mrf.mxu2  ;;  %v3274_v40 = vpack.c.b16 %v3236_v35, %v3236_v35  ;;  %v3276_v41 = vpack.c.b16 %v3238_v14, %v3238_v14  ;;  %v9029_v35 = vld [vmem:[%s12469_s3 + $0x480] sm:$0xff] }
 0x1a8   :  { %5342 = vmatpush.bf16.msrb.mxu0 %v9003_v38  ;;  %v2418_v7 = vadd.f32 %v2417_v3, %v2324_v61  ;;  %v2286_v15 = vpop.f32.mrf.mxu0  ;;  %v9060_v38 = vld [vmem:[%s12469_s3 + $0x578] sm:$0xff]  ;;  %v9041_v61 = vld [vmem:[%s12469_s3 + $0x4e0] sm:$0xff] }
 0x1a9   :  { %5355 = vmatpush.bf16.msrb.mxu1 %v9011_v59  ;;  %5368 = vmatpush.bf16.msrb.mxu2 %v9019_v54  ;;  %v3275_v59 = vpack.c.b16 %v3237_v36, %v3237_v36  ;;  %v9051_v54 = vld [vmem:[%s12469_s3 + $0x530] sm:$0xff]  ;;  %v9212_v3 = vld [vmem:[%s12470_s4] ss:$0 sm:$0xff]  ;;  %s9238_s4 = smov 120  }
 0x1aa   :  { %5381 = vmatpush.bf16.msrb.mxu3 %v9027_v42  ;;  %v2430_v8 = vpop.f32.mrf.mxu3  ;;  %v2434_v13 = vmax.f32 %v2418_v7, 0.0  ;;  %v9059_v42 = vld [vmem:[%s12469_s3 + $0x570] sm:$0xff]  ;;  %v9037_v36 = vld [vmem:[%s12469_s3 + $0x4c0] sm:$0xff] }
 0x1ab   :  { %v2431_v10 = vadd.f32 %v2430_v8, %v2325_v63  ;;  %v2299_v19 = vpop.f32.mrf.mxu1  ;;  %v9049_v63 = vld [vmem:[%s12469_s3 + $0x520] sm:$0xff]  ;;  %v9032_v8 = vld [vmem:[%s12469_s3 + $0x498] sm:$0xff] }
 0x1ac   :  { %5343 = vmatpush.bf16.msrb.mxu0 %v9002_v44  ;;  %v2455_v44 = vld [vmem:[%s12468_s2] sm:$0x3] }
 0x1ad   :  { %5356 = vmatpush.bf16.msrb.mxu1 %v9010_v45  ;;  %5369 = vmatpush.bf16.msrb.mxu2 %v9018_v46  ;;  %v2435_v18 = vmax.f32 %v2431_v10, 0.0  ;;  %v9034_v45 = vld [vmem:[%s12469_s3 + $0x4a8] sm:$0xff]  ;;  %v2457_v48 = vperm.slane %v2455_v44, 0  ;;  %v9053_v14 = vld [vmem:[%s12469_s3 + $0x540] sm:$0xff] }
 0x1ae   :  { %5382 = vmatpush.bf16.msrb.mxu3 %v9026_v47  ;;  %v9042_v46 = vld [vmem:[%s12469_s3 + $0x4e8] sm:$0xff] }
 0x1af   :  { %v11699_v5 = vpack.c.bf16 %v2435_v18, %v2434_v13  ;;  %v2419_v27 = vpop.f32.mrf.mxu2  ;;  %v9050_v47 = vld [vmem:[%s12469_s3 + $0x528] sm:$0xff]  ;;  %v9048_v13 = vld [vmem:[%s12469_s3 + $0x518] sm:$0xff] }
 0x1b0   :  { %5344 = vmatpush.bf16.msrb.mxu0 %v9001_v49  ;;  %v9058_v49 = vld [vmem:[%s12469_s3 + $0x568] sm:$0xff]  ;;  %v9047_v27 = vld [vmem:[%s12469_s3 + $0x510] sm:$0xff] }
 0x1b1   :  { %5357 = vmatpush.bf16.msrb.mxu1 %v9009_v52  ;;  %5370 = vmatpush.bf16.msrb.mxu2 %v9017_v55  ;;  %v2458_v52 = vperm.slane %v2455_v44, 1  ;;  %v9033_v55 = vld [vmem:[%s12469_s3 + $0x4a0] sm:$0xff] }
 0x1b2   :  { %5383 = vmatpush.bf16.msrb.mxu3 %v9025_v60  ;;  %v2432_v29 = vpop.f32.mrf.mxu3 }
 0x1b3   :  { %v9055_v29 = vld [vmem:[%s12469_s3 + $0x550] sm:$0xff] }
 0x1b4   :  { %5345 = vmatpush.bf16.msrb.mxu0 %v9000_v0 }
 0x1b5   :  { %5358 = vmatpush.bf16.msrb.mxu1 %v9008_v1  ;;  %5371 = vmatpush.bf16.msrb.mxu2 %v9016_v2  ;;  %v9057_v2 = vld [vmem:[%s12469_s3 + $0x560] sm:$0xff] }
 0x1b6   :  { %5384 = vmatpush.bf16.msrb.mxu3 %v9024_v6 }
 0x1b8   :  { %5346 = vmatpush.bf16.msrb.mxu0 %v8999_v11  ;;  %v9040_v11 = vld [vmem:[%s12469_s3 + $0x4d8] sm:$0xff] }
 0x1b9   :  { %5359 = vmatpush.bf16.msrb.mxu1 %v9007_v16  ;;  %5372 = vmatpush.bf16.msrb.mxu2 %v9015_v17  ;;  %v9056_v16 = vld [vmem:[%s12469_s3 + $0x558] sm:$0xff] }
 0x1ba   :  { %5385 = vmatpush.bf16.msrb.mxu3 %v9023_v23 }
 0x1bc   :  { %5347 = vmatpush.bf16.msrb.mxu0 %v8998_v24  ;;  %v9031_v24 = vld [vmem:[%s12469_s3 + $0x490] sm:$0xff] }
 0x1bd   :  { %5360 = vmatpush.bf16.msrb.mxu1 %v9006_v25  ;;  %5373 = vmatpush.bf16.msrb.mxu2 %v9014_v26  ;;  %v9039_v26 = vld [vmem:[%s12469_s3 + $0x4d0] sm:$0xff] }
 0x1be   :  { %5386 = vmatpush.bf16.msrb.mxu3 %v9022_v28 }
 0x1c0   :  { %5348 = vmatpush.bf16.msrb.mxu0 %v8997_v30  ;;  %v2550_v60 = vpop.f32.mrf.mxu0  ;;  %v9030_v30 = vld [vmem:[%s12469_s3 + $0x488] sm:$0xff] }
 0x1c1   :  { %5361 = vmatpush.bf16.msrb.mxu1 %v9005_v31  ;;  %5374 = vmatpush.bf16.msrb.mxu2 %v9013_v32  ;;  %v2551_v0 = vadd.f32 %v2550_v60, %v2457_v48  ;;  %v9038_v31 = vld [vmem:[%s12469_s3 + $0x4c8] sm:$0xff] }
 0x1c2   :  { %5387 = vmatpush.bf16.msrb.mxu3 %v9021_v53  ;;  %v9046_v32 = vld [vmem:[%s12469_s3 + $0x508] sm:$0xff] }
 0x1c3   :  { %5349 = vmatmul.bf16.vlgmr.msrb.gmra.mxu0 %v3273_v20  ;;  %v2563_v1 = vpop.f32.mrf.mxu1  ;;  %v2567_v7 = vmax.f32 %v2551_v0, 0.0  ;;  %v9054_v53 = vld [vmem:[%s12469_s3 + $0x548] sm:$0xff]  ;;  %v3240_v20 = vunpack.c.h.b16 %v11260_v62  ;;  %v9065_v0 = vld [vmem:[%s12469_s3 + $0x5a0] sm:$0xff] }
 0x1c4   :  { %5393 = vmatpush.bf16.msra.mxu0 %v9036_v34  ;;  %5362 = vmatmul.bf16.vlgmr.msrb.gmra.mxu1 %v3274_v40  ;;  %v2564_v6 = vadd.f32 %v2563_v1, %v2458_v52  ;;  %v9076_v40 = vld [vmem:[%s12469_s3 + $0x5f8] sm:$0xff]  ;;  %v9066_v48 = vld [vmem:[%s12469_s3 + $0x5a8] sm:$0xff]  ;;  %v9073_v1 = vld [vmem:[%s12469_s3 + $0x5e0] sm:$0xff] }
 0x1c5   :  { %5406 = vmatpush.bf16.msra.mxu1 %v9044_v37  ;;  %5419 = vmatpush.bf16.msra.mxu2 %v9052_v12  ;;  %v9045_v37 = vld [vmem:[%s12469_s3 + $0x500] sm:$0xff]  ;;  %v3239_v12 = vunpack.c.l.b16 %v11260_v62  ;;  %v9082_v52 = vld [vmem:[%s12469_s3 + $0x628] sm:$0xff] }
 0x1c6   :  { %5432 = vmatpush.bf16.msra.mxu3 %v9060_v38  ;;  %5375 = vmatmul.bf16.vlgmr.msrb.gmra.mxu2 %v3275_v59  ;;  %v2568_v10 = vmax.f32 %v2564_v6, 0.0  ;;  %v9068_v38 = vld [vmem:[%s12469_s3 + $0x5b8] sm:$0xff]  ;;  %v9089_v6 = vld [vmem:[%s12469_s3 + $0x660] sm:$0xff] }
 0x1c7   :  { %5388 = vmatmul.bf16.vlgmr.msrb.gmra.mxu3 %v3276_v41  ;;  %v5168_v15 = vpop.f32.mrf.mxu2  ;;  %v9084_v59 = vld [vmem:[%s12469_s3 + $0x638] sm:$0xff]  ;;  %v3277_v62 = vpack.c.b16 %v3239_v12, %v3239_v12  ;;  %v9067_v41 = vld [vmem:[%s12469_s3 + $0x5b0] sm:$0xff] }
 0x1c8   :  { %5394 = vmatpush.bf16.msra.mxu0 %v9035_v39  ;;  %v5169_v17 = vadd.f32 %v9212_v3, %v5168_v15  ;;  %v11795_v19 = vpack.c.bf16 %v2568_v10, %v2567_v7  ;;  %v2552_v25 = vpop.f32.mrf.mxu0  ;;  %v3241_v39 = vunpack.c.l.b16 %v11357_v58  ;;  %v9064_v7 = vld [vmem:[%s12469_s3 + $0x598] sm:$0xff] }
 0x1c9   :  { %5407 = vmatpush.bf16.msra.mxu1 %v9043_v43  ;;  %5420 = vmatpush.bf16.msra.mxu2 %v9051_v54  ;;  %v3242_v43 = vunpack.c.h.b16 %v11357_v58  ;;  %v9092_v54 = vld [vmem:[%s12469_s3 + $0x678] sm:$0xff]  ;;  %v9075_v58 = vld [vmem:[%s12469_s3 + $0x5f0] sm:$0xff] }
 0x1ca   :  { %5433 = vmatpush.bf16.msra.mxu3 %v9059_v42  ;;  %v5181_v18 = vpop.f32.mrf.mxu3  ;;  %v3278_v42 = vpack.c.b16 %v3240_v20, %v3240_v20  ;;  %v3279_v44 = vpack.c.b16 %v3241_v39, %v3241_v39  ;;  %v9080_v10 = vld [vmem:[%s12469_s3 + $0x618] sm:$0xff]  ;;  %v9071_v25 = vld [vmem:[%s12469_s3 + $0x5d0] sm:$0xff] }
 0x1cb   :  { %v11797_v23 = vadd.f32 %v5181_v18, %v5169_v17  ;;  %v2565_v28 = vpop.f32.mrf.mxu1  ;;  %v9100_v12 = vld [vmem:[%s12469_s3 + $0x6b8] sm:$0xff] }
 0x1cc   :  { %5395 = vmatpush.bf16.msra.mxu0 %v9034_v45  ;;  %v9083_v45 = vld [vmem:[%s12469_s3 + $0x630] sm:$0xff]  ;;  %v9062_v28 = vld [vmem:[%s12469_s3 + $0x588] sm:$0xff]  ;;  %v9108_v20 = vld [vmem:[%s12469_s3 + $0x6f8] sm:$0xff] }
 0x1cd   :  { %5408 = vmatpush.bf16.msra.mxu1 %v9042_v46  ;;  %5421 = vmatpush.bf16.msra.mxu2 %v9050_v47  ;;  %v3280_v46 = vpack.c.b16 %v3242_v43, %v3242_v43  ;;  %v9091_v47 = vld [vmem:[%s12469_s3 + $0x670] sm:$0xff]  ;;  %v9116_v39 = vld [vmem:[%s12469_s3 + $0x738] sm:$0xff] }
 0x1ce   :  { %5434 = vmatpush.bf16.msra.mxu3 %v9058_v49  ;;  %v9074_v49 = vld [vmem:[%s12469_s3 + $0x5e8] sm:$0xff]  ;;  %v9099_v43 = vld [vmem:[%s12469_s3 + $0x6b0] sm:$0xff] }
 0x1cf   :  { %v5170_v33 = vpop.f32.mrf.mxu2 }
 0x1d0   :  { %5396 = vmatpush.bf16.msra.mxu0 %v9033_v55  ;;  %v9090_v55 = vld [vmem:[%s12469_s3 + $0x668] sm:$0xff] }
 0x1d1   :  { %5409 = vmatpush.bf16.msra.mxu1 %v9041_v61  ;;  %5422 = vmatpush.bf16.msra.mxu2 %v9049_v63 }
 0x1d2   :  { %5435 = vmatpush.bf16.msra.mxu3 %v9057_v2  ;;  %v5183_v34 = vpop.f32.mrf.mxu3  ;;  %v9081_v2 = vld [vmem:[%s12469_s3 + $0x620] sm:$0xff] }
 0x1d3   :  { %v9069_v34 = vld [vmem:[%s12469_s3 + $0x5c0] sm:$0xff] }
 0x1d4   :  { %5397 = vmatpush.bf16.msra.mxu0 %v9032_v8  ;;  %v9072_v8 = vld [vmem:[%s12469_s3 + $0x5d8] sm:$0xff] }
 0x1d5   :  { %5410 = vmatpush.bf16.msra.mxu1 %v9040_v11  ;;  %5423 = vmatpush.bf16.msra.mxu2 %v9048_v13  ;;  %v9088_v11 = vld [vmem:[%s12469_s3 + $0x658] sm:$0xff] }
 0x1d6   :  { %5436 = vmatpush.bf16.msra.mxu3 %v9056_v16 }
 0x1d8   :  { %5398 = vmatpush.bf16.msra.mxu0 %v9031_v24 }
 0x1d9   :  { %5411 = vmatpush.bf16.msra.mxu1 %v9039_v26  ;;  %5424 = vmatpush.bf16.msra.mxu2 %v9047_v27  ;;  %v9079_v26 = vld [vmem:[%s12469_s3 + $0x610] sm:$0xff] }
 0x1da   :  { %5437 = vmatpush.bf16.msra.mxu3 %v9055_v29  ;;  %v9087_v27 = vld [vmem:[%s12469_s3 + $0x650] sm:$0xff]  ;;  %v9070_v29 = vld [vmem:[%s12469_s3 + $0x5c8] sm:$0xff] }
 0x1dc   :  { %5399 = vmatpush.bf16.msra.mxu0 %v9030_v30  ;;  %v9078_v30 = vld [vmem:[%s12469_s3 + $0x608] sm:$0xff] }
 0x1dd   :  { %5412 = vmatpush.bf16.msra.mxu1 %v9038_v31  ;;  %5425 = vmatpush.bf16.msra.mxu2 %v9046_v32  ;;  %v9086_v31 = vld [vmem:[%s12469_s3 + $0x648] sm:$0xff] }
 0x1de   :  { %5438 = vmatpush.bf16.msra.mxu3 %v9054_v53  ;;  %v9061_v53 = vld [vmem:[%s12469_s3 + $0x580] sm:$0xff] }
 0x1e0   :  { %5400 = vmatpush.bf16.msra.mxu0 %v9029_v35  ;;  %v5194_v60 = vpop.f32.mrf.mxu0  ;;  %v9077_v35 = vld [vmem:[%s12469_s3 + $0x600] sm:$0xff] }
 0x1e1   :  { %5413 = vmatpush.bf16.msra.mxu1 %v9037_v36  ;;  %5426 = vmatpush.bf16.msra.mxu2 %v9045_v37  ;;  %v5195_v61 = vadd.f32 %v5194_v60, %v11797_v23  ;;  %v5207_v63 = vpop.f32.mrf.mxu1  ;;  %v9063_v23 = vld [vmem:[%s12469_s3 + $0x590] sm:$0xff]  ;;  %v3243_v36 = vunpack.c.l.b16 %v11371_v9  ;;  %v9085_v37 = vld [vmem:[%s12469_s3 + $0x640] sm:$0xff] }
 0x1e2   :  { %5439 = vmatpush.bf16.msra.mxu3 %v9053_v14  ;;  %v3244_v14 = vunpack.c.h.b16 %v11371_v9  ;;  %v9097_v60 = vld [vmem:[%s12469_s3 + $0x6a0] sm:$0xff] }
 0x1e3   :  { %5401 = vmatmul.bf16.vlgmr.msra.gmra.mxu0 %v3277_v62  ;;  %v5208_v3 = vadd.f32 %v5207_v63, %v5195_v61  ;;  %v3281_v9 = vpack.c.b16 %v3243_v36, %v3243_v36  ;;  %v9105_v61 = vld [vmem:[%s12469_s3 + $0x6e0] sm:$0xff] }
 0x1e4   :  { %5445 = vmatpush.bf16.msrb.mxu0 %v9068_v38  ;;  %5414 = vmatmul.bf16.vlgmr.msra.gmra.mxu1 %v3278_v42  ;;  %v3245_v38 = vunpack.c.l.b16 %v11467_v4  ;;  %v9113_v63 = vld [vmem:[%s12469_s3 + $0x720] sm:$0xff] }
 0x1e5   :  { %5458 = vmatpush.bf16.msrb.mxu1 %v9076_v40  ;;  %5471 = vmatpush.bf16.msrb.mxu2 %v9084_v59  ;;  %v3246_v40 = vunpack.c.h.b16 %v11467_v4  ;;  %v9124_v59 = vld [vmem:[%s12469_s3 + $0x778] sm:$0xff]  ;;  %v9107_v4 = vld [vmem:[%s12469_s3 + $0x6f0] sm:$0xff]  ;;  %v9101_v36 = vld [vmem:[%s12469_s3 + $0x6c0] sm:$0xff] }
 0x1e6   :  { %5484 = vmatpush.bf16.msrb.mxu3 %v9092_v54  ;;  %5427 = vmatmul.bf16.vlgmr.msra.gmra.mxu2 %v3279_v44  ;;  %v3282_v54 = vpack.c.b16 %v3244_v14, %v3244_v14  ;;  %v3283_v62 = vpack.c.b16 %v3245_v38, %v3245_v38  ;;  %v9123_v44 = vld [vmem:[%s12469_s3 + $0x770] sm:$0xff]  ;;  %v9117_v14 = vld [vmem:[%s12469_s3 + $0x740] sm:$0xff]  ;;  %v9132_v38 = vld [vmem:[%s12469_s3 + $0x7b8] sm:$0xff] }
 0x1e7   :  { %5440 = vmatmul.bf16.vlgmr.msra.gmra.mxu3 %v3280_v46  ;;  %v3284_v42 = vpack.c.b16 %v3246_v40, %v3246_v40  ;;  %v9114_v46 = vld [vmem:[%s12469_s3 + $0x728] sm:$0xff]  ;;  %v9140_v40 = vld [vmem:[%s12469_s3 + $0x7f8] sm:$0xff] }
 0x1e8   :  { %5446 = vmatpush.bf16.msrb.mxu0 %v9067_v41  ;;  %v5196_v17 = vpop.f32.mrf.mxu0  ;;  %v9115_v41 = vld [vmem:[%s12469_s3 + $0x730] sm:$0xff] }
 0x1e9   :  { %5459 = vmatpush.bf16.msrb.mxu1 %v9075_v58  ;;  %5472 = vmatpush.bf16.msrb.mxu2 %v9083_v45  ;;  %v5220_v13 = vpop.f32.mrf.mxu2  ;;  %v5209_v18 = vpop.f32.mrf.mxu1  ;;  %v9098_v58 = vld [vmem:[%s12469_s3 + $0x6a8] sm:$0xff] }
 0x1ea   :  { %5485 = vmatpush.bf16.msrb.mxu3 %v9091_v47  ;;  %v5221_v15 = vadd.f32 %v5220_v13, %v5208_v3  ;;  %v5233_v16 = vpop.f32.mrf.mxu3  ;;  %v9106_v45 = vld [vmem:[%s12469_s3 + $0x6e8] sm:$0xff] }
 0x1eb   :  { %v9122_v47 = vld [vmem:[%s12469_s3 + $0x768] sm:$0xff] }
 0x1ec   :  { %5447 = vmatpush.bf16.msrb.mxu0 %v9066_v48  ;;  %v5234_v24 = vadd.f32 %v5233_v16, %v5221_v15 }
 0x1ed   :  { %5460 = vmatpush.bf16.msrb.mxu1 %v9074_v49  ;;  %5473 = vmatpush.bf16.msrb.mxu2 %v9082_v52  ;;  %v1923_v49 = vld [vmem:[%s12468_s2] sm:$0x3] }
 0x1ee   :  { %5486 = vmatpush.bf16.msrb.mxu3 %v9090_v55  ;;  %v1926_v3 = vperm.slane %v1923_v49, 1 }
 0x1f0   :  { %5448 = vmatpush.bf16.msrb.mxu0 %v9065_v0  ;;  %v2032_v15 = vadd.f32 %v11561_v56, %v1926_v3  ;;  %v9119_v56 = vld [vmem:[%s12469_s3 + $0x750] sm:$0xff] }
 0x1f1   :  { %5461 = vmatpush.bf16.msrb.mxu1 %v9073_v1  ;;  %5474 = vmatpush.bf16.msrb.mxu2 %v9081_v2  ;;  %v5222_v32 = vpop.f32.mrf.mxu2  ;;  %v9121_v1 = vld [vmem:[%s12469_s3 + $0x760] sm:$0xff]  ;;  %v1925_v2 = vperm.slane %v1923_v49, 0 }
 0x1f2   :  { %5487 = vmatpush.bf16.msrb.mxu3 %v9089_v6  ;;  %v5235_v33 = vpop.f32.mrf.mxu3  ;;  %v9096_v6 = vld [vmem:[%s12469_s3 + $0x698] sm:$0xff]  ;;  %v9118_v32 = vld [vmem:[%s12469_s3 + $0x748] sm:$0xff] }
 0x1f3   :  { %v2019_v13 = vadd.f32 %v11553_v51, %v1925_v2  ;;  %v9111_v51 = vld [vmem:[%s12469_s3 + $0x710] sm:$0xff]  ;;  %v9153_v2 = vld [vmem:[%s12469_s3 + $0x860] sm:$0xff] }
 0x1f4   :  { %5449 = vmatpush.bf16.msrb.mxu0 %v9064_v7  ;;  %v9104_v7 = vld [vmem:[%s12469_s3 + $0x6d8] sm:$0xff] }
 0x1f5   :  { %5462 = vmatpush.bf16.msrb.mxu1 %v9072_v8  ;;  %5475 = vmatpush.bf16.msrb.mxu2 %v9080_v10  ;;  %v9112_v8 = vld [vmem:[%s12469_s3 + $0x718] sm:$0xff] }
 0x1f6   :  { %5488 = vmatpush.bf16.msrb.mxu3 %v9088_v11  ;;  %v9120_v10 = vld [vmem:[%s12469_s3 + $0x758] sm:$0xff] }
 0x1f8   :  { %5450 = vmatpush.bf16.msrb.mxu0 %v9063_v23 }
 0x1f9   :  { %5463 = vmatpush.bf16.msrb.mxu1 %v9071_v25  ;;  %5476 = vmatpush.bf16.msrb.mxu2 %v9079_v26  ;;  %v9103_v26 = vld [vmem:[%s12469_s3 + $0x6d0] sm:$0xff] }
 0x1fa   :  { %5489 = vmatpush.bf16.msrb.mxu3 %v9087_v27  ;;  %v2035_v27 = vmax.f32 %v2019_v13, 0.0 }
 0x1fc   :  { %5451 = vmatpush.bf16.msrb.mxu0 %v9062_v28  ;;  %v2036_v28 = vmax.f32 %v2032_v15, 0.0 }
 0x1fd   :  { %5464 = vmatpush.bf16.msrb.mxu1 %v9070_v29  ;;  %5477 = vmatpush.bf16.msrb.mxu2 %v9078_v30  ;;  %v9094_v29 = vld [vmem:[%s12469_s3 + $0x688] sm:$0xff] }
 0x1fe   :  { %5490 = vmatpush.bf16.msrb.mxu3 %v9086_v31  ;;  %v9102_v30 = vld [vmem:[%s12469_s3 + $0x6c8] sm:$0xff] }
 0x1ff   :  { %v9110_v31 = vld [vmem:[%s12469_s3 + $0x708] sm:$0xff] }
 0x200   :  { %5452 = vmatpush.bf16.msrb.mxu0 %v9061_v53  ;;  %v5246_v48 = vpop.f32.mrf.mxu0  ;;  %v2037_v53 = vpack.c.bf16 %v2036_v28, %v2035_v27  ;;  %v9126_v28 = vld [vmem:[%s12469_s3 + $0x788] sm:$0xff] }
 0x201   :  { %5465 = vmatpush.bf16.msrb.mxu1 %v9069_v34  ;;  %5478 = vmatpush.bf16.msrb.mxu2 %v9077_v35  ;;  %v5247_v52 = vadd.f32 %v5246_v48, %v5234_v24  ;;  %v5259_v55 = vpop.f32.mrf.mxu1  ;;  %v9095_v24 = vld [vmem:[%s12469_s3 + $0x690] sm:$0xff]  ;;  %v9093_v35 = vld [vmem:[%s12469_s3 + $0x680] sm:$0xff]  ;;  %v9154_v48 = vld [vmem:[%s12469_s3 + $0x868] sm:$0xff] }
 0x202   :  { %5491 = vmatpush.bf16.msrb.mxu3 %v9085_v37  ;;  %v9109_v37 = vld [vmem:[%s12469_s3 + $0x700] sm:$0xff] }
 0x203   :  { %5453 = vmatmul.bf16.vlgmr.msrb.gmra.mxu0 %v3281_v9  ;;  %v5260_v0 = vadd.f32 %v5259_v55, %v5247_v52  ;;  %v3250_v9 = vunpack.c.h.b16 %v2037_v53  ;;  %v2189_v52 = vld [vmem:[%s12468_s2] sm:$0x3] }
 0x204   :  { %5497 = vmatpush.bf16.msra.mxu0 %v9100_v12  ;;  %5466 = vmatmul.bf16.vlgmr.msrb.gmra.mxu1 %v3282_v54  ;;  %v3247_v12 = vunpack.c.l.b16 %v11481_v21  ;;  %v2191_v3 = vperm.slane %v2189_v52, 0 }
 0x205   :  { %5510 = vmatpush.bf16.msra.mxu1 %v9108_v20  ;;  %5523 = vmatpush.bf16.msra.mxu2 %v9116_v39  ;;  %v3248_v20 = vunpack.c.h.b16 %v11481_v21  ;;  %v3249_v39 = vunpack.c.l.b16 %v2037_v53  ;;  %v9131_v21 = vld [vmem:[%s12469_s3 + $0x7b0] sm:$0xff] }
 0x206   :  { %5536 = vmatpush.bf16.msra.mxu3 %v9124_v59  ;;  %5479 = vmatmul.bf16.vlgmr.msrb.gmra.mxu2 %v3283_v62  ;;  %v9148_v59 = vld [vmem:[%s12469_s3 + $0x838] sm:$0xff]  ;;  %v3285_v54 = vpack.c.b16 %v3247_v12, %v3247_v12  ;;  %v2285_v15 = vadd.f32 %v11662_v50, %v2191_v3  ;;  %v9143_v50 = vld [vmem:[%s12469_s3 + $0x810] sm:$0xff]  ;;  %v9149_v12 = vld [vmem:[%s12469_s3 + $0x840] sm:$0xff] }
 0x207   :  { %5492 = vmatmul.bf16.vlgmr.msrb.gmra.mxu3 %v3284_v42  ;;  %v3286_v62 = vpack.c.b16 %v3248_v20, %v3248_v20  ;;  %v9147_v42 = vld [vmem:[%s12469_s3 + $0x830] sm:$0xff]  ;;  %v9184_v3 = vld [vmem:[%s12469_s3 + $0x958] sm:$0xff] }
 0x208   :  { %5498 = vmatpush.bf16.msra.mxu0 %v9099_v43  ;;  %v5248_v18 = vpop.f32.mrf.mxu0  ;;  %v9156_v43 = vld [vmem:[%s12469_s3 + $0x878] sm:$0xff] }
 0x209   :  { %5511 = vmatpush.bf16.msra.mxu1 %v9107_v4  ;;  %5524 = vmatpush.bf16.msra.mxu2 %v9115_v41  ;;  %v5272_v11 = vpop.f32.mrf.mxu2  ;;  %v5261_v23 = vpop.f32.mrf.mxu1  ;;  %v3287_v4 = vpack.c.b16 %v3249_v39, %v3249_v39  ;;  %v9139_v41 = vld [vmem:[%s12469_s3 + $0x7f0] sm:$0xff]  ;;  %v9172_v39 = vld [vmem:[%s12469_s3 + $0x8f8] sm:$0xff] }
 0x20a   :  { %5537 = vmatpush.bf16.msra.mxu3 %v9123_v44  ;;  %v5273_v16 = vadd.f32 %v5272_v11, %v5260_v0  ;;  %v5285_v17 = vpop.f32.mrf.mxu3  ;;  %v3288_v44 = vpack.c.b16 %v3250_v9, %v3250_v9  ;;  %v9145_v0 = vld [vmem:[%s12469_s3 + $0x820] sm:$0xff]  ;;  %v9152_v11 = vld [vmem:[%s12469_s3 + $0x858] sm:$0xff] }
 0x20b   :  { %v9188_v9 = vld [vmem:[%s12469_s3 + $0x978] sm:$0xff] }
 0x20c   :  { %5499 = vmatpush.bf16.msra.mxu0 %v9098_v58  ;;  %v12008_v25 = vadd.f32 %v5285_v17, %v5273_v16  ;;  %v9155_v58 = vld [vmem:[%s12469_s3 + $0x870] sm:$0xff] }
 0x20d   :  { %5512 = vmatpush.bf16.msra.mxu1 %v9106_v45  ;;  %5525 = vmatpush.bf16.msra.mxu2 %v9114_v46  ;;  %v9130_v45 = vld [vmem:[%s12469_s3 + $0x7a8] sm:$0xff] }
 0x20e   :  { %5538 = vmatpush.bf16.msra.mxu3 %v9122_v47  ;;  %v9138_v46 = vld [vmem:[%s12469_s3 + $0x7e8] sm:$0xff] }
 0x20f   :  { %v9146_v47 = vld [vmem:[%s12469_s3 + $0x828] sm:$0xff] }
 0x210   :  { %5500 = vmatpush.bf16.msra.mxu0 %v9097_v60 }
 0x211   :  { %5513 = vmatpush.bf16.msra.mxu1 %v9105_v61  ;;  %5526 = vmatpush.bf16.msra.mxu2 %v9113_v63  ;;  %v5274_v33 = vpop.f32.mrf.mxu2  ;;  %v9129_v61 = vld [vmem:[%s12469_s3 + $0x7a0] sm:$0xff] }
 0x212   :  { %5539 = vmatpush.bf16.msra.mxu3 %v9121_v1  ;;  %v5287_v34 = vpop.f32.mrf.mxu3  ;;  %v9137_v63 = vld [vmem:[%s12469_s3 + $0x7e0] sm:$0xff] }
 0x213   :  { %v9125_v34 = vld [vmem:[%s12469_s3 + $0x780] sm:$0xff] }
 0x214   :  { %5501 = vmatpush.bf16.msra.mxu0 %v9096_v6  ;;  %v2192_v6 = vperm.slane %v2189_v52, 1  ;;  %v9161_v52 = vld [vmem:[%s12469_s3 + $0x8a0] sm:$0xff] }
 0x215   :  { %5514 = vmatpush.bf16.msra.mxu1 %v9104_v7  ;;  %5527 = vmatpush.bf16.msra.mxu2 %v9112_v8  ;;  %v9128_v7 = vld [vmem:[%s12469_s3 + $0x798] sm:$0xff] }
 0x216   :  { %5540 = vmatpush.bf16.msra.mxu3 %v9120_v10  ;;  %v9136_v8 = vld [vmem:[%s12469_s3 + $0x7d8] sm:$0xff]  ;;  %v2298_v16 = vadd.f32 %v11670_v57, %v2192_v6  ;;  %v9151_v57 = vld [vmem:[%s12469_s3 + $0x850] sm:$0xff] }
 0x217   :  { %v9144_v10 = vld [vmem:[%s12469_s3 + $0x818] sm:$0xff] }
 0x218   :  { %5502 = vmatpush.bf16.msra.mxu0 %v9095_v24  ;;  %v2302_v27 = vmax.f32 %v2298_v16, 0.0  ;;  %v9167_v16 = vld [vmem:[%s12469_s3 + $0x8d0] sm:$0xff] }
 0x219   :  { %5515 = vmatpush.bf16.msra.mxu1 %v9103_v26  ;;  %5528 = vmatpush.bf16.msra.mxu2 %v9111_v51  ;;  %v9135_v51 = vld [vmem:[%s12469_s3 + $0x7d0] sm:$0xff] }
 0x21a   :  { %5541 = vmatpush.bf16.msra.mxu3 %v9119_v56  ;;  %v2301_v56 = vmax.f32 %v2285_v15, 0.0 }
 0x21c   :  { %5503 = vmatpush.bf16.msra.mxu0 %v9094_v29  ;;  %v9134_v29 = vld [vmem:[%s12469_s3 + $0x7c8] sm:$0xff]  ;;  %v2303_v33 = vpack.c.bf16 %v2302_v27, %v2301_v56  ;;  %v3255_v56 = vunpack.c.l.b16 %v11699_v5  ;;  %v9165_v27 = vld [vmem:[%s12469_s3 + $0x8c0] sm:$0xff] }
 0x21d   :  { %5516 = vmatpush.bf16.msra.mxu1 %v9102_v30  ;;  %5529 = vmatpush.bf16.msra.mxu2 %v9110_v31  ;;  %v9142_v30 = vld [vmem:[%s12469_s3 + $0x808] sm:$0xff] }
 0x21e   :  { %5542 = vmatpush.bf16.msra.mxu3 %v9118_v32  ;;  %v9150_v31 = vld [vmem:[%s12469_s3 + $0x848] sm:$0xff]  ;;  %v3253_v20 = vunpack.c.l.b16 %v2303_v33 }
 0x220   :  { %5504 = vmatpush.bf16.msra.mxu0 %v9093_v35  ;;  %v5298_v49 = vpop.f32.mrf.mxu0  ;;  %v9133_v35 = vld [vmem:[%s12469_s3 + $0x7c0] sm:$0xff] }
 0x221   :  { %5517 = vmatpush.bf16.msra.mxu1 %v9101_v36  ;;  %5530 = vmatpush.bf16.msra.mxu2 %v9109_v37  ;;  %v5299_v55 = vadd.f32 %v5298_v49, %v12008_v25  ;;  %v5311_v60 = vpop.f32.mrf.mxu1  ;;  %v9127_v25 = vld [vmem:[%s12469_s3 + $0x790] sm:$0xff]  ;;  %v9141_v36 = vld [vmem:[%s12469_s3 + $0x800] sm:$0xff]  ;;  %v3251_v37 = vunpack.c.l.b16 %v11590_v22 }
 0x222   :  { %5543 = vmatpush.bf16.msra.mxu3 %v9117_v14  ;;  %v9164_v14 = vld [vmem:[%s12469_s3 + $0x8b8] sm:$0xff] }
 0x223   :  { %5505 = vmatmul.bf16.vlgmr.msra.gmra.mxu0 %v3285_v54  ;;  %v5312_v1 = vadd.f32 %v5311_v60, %v5299_v55  ;;  %v9169_v55 = vld [vmem:[%s12469_s3 + $0x8e0] sm:$0xff] }
 0x224   :  { %5549 = vmatpush.bf16.msrb.mxu0 %v9132_v38  ;;  %5518 = vmatmul.bf16.vlgmr.msra.gmra.mxu1 %v3286_v62  ;;  %v3252_v38 = vunpack.c.h.b16 %v11590_v22  ;;  %v9163_v22 = vld [vmem:[%s12469_s3 + $0x8b0] sm:$0xff]  ;;  %v9177_v60 = vld [vmem:[%s12469_s3 + $0x920] sm:$0xff] }
 0x225   :  { %5562 = vmatpush.bf16.msrb.mxu1 %v9140_v40  ;;  %5575 = vmatpush.bf16.msrb.mxu2 %v9148_v59  ;;  %v9180_v40 = vld [vmem:[%s12469_s3 + $0x938] sm:$0xff]  ;;  %v3254_v59 = vunpack.c.h.b16 %v2303_v33  ;;  %v9171_v62 = vld [vmem:[%s12469_s3 + $0x8f0] sm:$0xff]  ;;  %v3293_v33 = vpack.c.b16 %v3255_v56, %v3255_v56 }
 0x226   :  { %5588 = vmatpush.bf16.msrb.mxu3 %v9156_v43  ;;  %5531 = vmatmul.bf16.vlgmr.msra.gmra.mxu2 %v3287_v4  ;;  %v3289_v43 = vpack.c.b16 %v3251_v37, %v3251_v37  ;;  %v3290_v54 = vpack.c.b16 %v3252_v38, %v3252_v38  ;;  %v9179_v4 = vld [vmem:[%s12469_s3 + $0x930] sm:$0xff] }
 0x227   :  { %5544 = vmatmul.bf16.vlgmr.msra.gmra.mxu3 %v3288_v44  ;;  %v9162_v44 = vld [vmem:[%s12469_s3 + $0x8a8] sm:$0xff] }
 0x228   :  { %5550 = vmatpush.bf16.msrb.mxu0 %v9131_v21  ;;  %v5300_v23 = vpop.f32.mrf.mxu0  ;;  %v3291_v21 = vpack.c.b16 %v3253_v20, %v3253_v20 }
 0x229   :  { %5563 = vmatpush.bf16.msrb.mxu1 %v9139_v41  ;;  %5576 = vmatpush.bf16.msrb.mxu2 %v9147_v42  ;;  %v5324_v13 = vpop.f32.mrf.mxu2  ;;  %v5313_v24 = vpop.f32.mrf.mxu1  ;;  %v3292_v41 = vpack.c.b16 %v3254_v59, %v3254_v59  ;;  %v9187_v42 = vld [vmem:[%s12469_s3 + $0x970] sm:$0xff]  ;;  %v9158_v23 = vld [vmem:[%s12469_s3 + $0x888] sm:$0xff] }
 0x22a   :  { %5589 = vmatpush.bf16.msrb.mxu3 %v9155_v58  ;;  %v5325_v17 = vadd.f32 %v5324_v13, %v5312_v1  ;;  %v5337_v18 = vpop.f32.mrf.mxu3  ;;  %v9170_v58 = vld [vmem:[%s12469_s3 + $0x8e8] sm:$0xff]  ;;  %v9168_v1 = vld [vmem:[%s12469_s3 + $0x8d8] sm:$0xff]  ;;  %v9159_v13 = vld [vmem:[%s12469_s3 + $0x890] sm:$0xff] }
 0x22b   :  { %v9166_v24 = vld [vmem:[%s12469_s3 + $0x8c8] sm:$0xff] }
 0x22c   :  { %5551 = vmatpush.bf16.msrb.mxu0 %v9130_v45  ;;  %v12114_v26 = vadd.f32 %v5337_v18, %v5325_v17  ;;  %v9178_v45 = vld [vmem:[%s12469_s3 + $0x928] sm:$0xff]  ;;  %v9175_v17 = vld [vmem:[%s12469_s3 + $0x910] sm:$0xff] }
 0x22d   :  { %5564 = vmatpush.bf16.msrb.mxu1 %v9138_v46  ;;  %5577 = vmatpush.bf16.msrb.mxu2 %v9146_v47  ;;  %v9186_v46 = vld [vmem:[%s12469_s3 + $0x968] sm:$0xff]  ;;  %v9183_v18 = vld [vmem:[%s12469_s3 + $0x950] sm:$0xff] }
 0x22e   :  { %5590 = vmatpush.bf16.msrb.mxu3 %v9154_v48 }
 0x230   :  { %5552 = vmatpush.bf16.msrb.mxu0 %v9129_v61 }
 0x231   :  { %5565 = vmatpush.bf16.msrb.mxu1 %v9137_v63  ;;  %5578 = vmatpush.bf16.msrb.mxu2 %v9145_v0  ;;  %v5326_v32 = vpop.f32.mrf.mxu2  ;;  %v9185_v63 = vld [vmem:[%s12469_s3 + $0x960] sm:$0xff]  ;;  %v9160_v0 = vld [vmem:[%s12469_s3 + $0x898] sm:$0xff] }
 0x232   :  { %5591 = vmatpush.bf16.msrb.mxu3 %v9153_v2  ;;  %v5339_v53 = vpop.f32.mrf.mxu3  ;;  %v9176_v2 = vld [vmem:[%s12469_s3 + $0x918] sm:$0xff]  ;;  %v3258_v32 = vunpack.c.h.b16 %v11795_v19 }
 0x234   :  { %5553 = vmatpush.bf16.msrb.mxu0 %v9128_v7 }
 0x235   :  { %5566 = vmatpush.bf16.msrb.mxu1 %v9136_v8  ;;  %5579 = vmatpush.bf16.msrb.mxu2 %v9144_v10 }
 0x236   :  { %5592 = vmatpush.bf16.msrb.mxu3 %v9152_v11 }
 0x238   :  { %5554 = vmatpush.bf16.msrb.mxu0 %v9127_v25  ;;  %v9174_v25 = vld [vmem:[%s12469_s3 + $0x908] sm:$0xff] }
 0x239   :  { %5567 = vmatpush.bf16.msrb.mxu1 %v9135_v51  ;;  %5580 = vmatpush.bf16.msrb.mxu2 %v9143_v50 }
 0x23a   :  { %5593 = vmatpush.bf16.msrb.mxu3 %v9151_v57  ;;  %v9157_v57 = vld [vmem:[%s12469_s3 + $0x880] sm:$0xff] }
 0x23c   :  { %5555 = vmatpush.bf16.msrb.mxu0 %v9126_v28  ;;  %v9173_v28 = vld [vmem:[%s12469_s3 + $0x900] sm:$0xff] }
 0x23d   :  { %5568 = vmatpush.bf16.msrb.mxu1 %v9134_v29  ;;  %5581 = vmatpush.bf16.msrb.mxu2 %v9142_v30  ;;  %v3256_v29 = vunpack.c.h.b16 %v11699_v5  ;;  %v3257_v30 = vunpack.c.l.b16 %v11795_v19 }
 0x23e   :  { %5594 = vmatpush.bf16.msrb.mxu3 %v9150_v31  ;;  %v9181_v31 = vld [vmem:[%s12469_s3 + $0x940] sm:$0xff] }
 0x23f   :  { %v3294_v53 = vpack.c.b16 %v3256_v29, %v3256_v29 }
 0x240   :  { %5556 = vmatpush.bf16.msrb.mxu0 %v9125_v34  ;;  %v5350_v47 = vpop.f32.mrf.mxu0  ;;  %v3295_v34 = vpack.c.b16 %v3257_v30, %v3257_v30 }
 0x241   :  { %5569 = vmatpush.bf16.msrb.mxu1 %v9133_v35  ;;  %5582 = vmatpush.bf16.msrb.mxu2 %v9141_v36  ;;  %v5351_v48 = vadd.f32 %v5350_v47, %v12114_v26  ;;  %v5363_v49 = vpop.f32.mrf.mxu1  ;;  %v9182_v26 = vld [vmem:[%s12469_s3 + $0x948] sm:$0xff]  ;;  %v3296_v35 = vpack.c.b16 %v3258_v32, %v3258_v32 }
 0x242   :  { %5595 = vmatpush.bf16.msrb.mxu3 %v9149_v12 }
 0x243   :  { %5557 = vmatmul.bf16.vlgmr.msrb.gmra.mxu0 %v3289_v43  ;;  %v5364_v61 = vadd.f32 %v5363_v49, %v5351_v48 }
 0x244   :  { %5601 = vmatpush.bf16.msra.mxu0 %v9164_v14  ;;  %5570 = vmatmul.bf16.vlgmr.msrb.gmra.mxu1 %v3290_v54 }
 0x245   :  { %5614 = vmatpush.bf16.msra.mxu1 %v9172_v39  ;;  %5627 = vmatpush.bf16.msra.mxu2 %v9180_v40 }
 0x246   :  { %5640 = vmatpush.bf16.msra.mxu3 %v9188_v9  ;;  %5583 = vmatmul.bf16.vlgmr.msrb.gmra.mxu2 %v3291_v21 }
 0x247   :  { %5596 = vmatmul.bf16.vlgmr.msrb.gmra.mxu3 %v3292_v41 }
 0x248   :  { %5602 = vmatpush.bf16.msra.mxu0 %v9163_v22  ;;  %v5352_v10 = vpop.f32.mrf.mxu0 }
 0x249   :  { %5615 = vmatpush.bf16.msra.mxu1 %v9171_v62  ;;  %5628 = vmatpush.bf16.msra.mxu2 %v9179_v4  ;;  %v5376_v6 = vpop.f32.mrf.mxu2  ;;  %v5365_v11 = vpop.f32.mrf.mxu1  ;;  %v5656_v10 = vld [vmem:[%s12472_s5 + $0x10] sm:$0xff] }
 0x24a   :  { %5641 = vmatpush.bf16.msra.mxu3 %v9187_v42  ;;  %v5377_v7 = vadd.f32 %v5376_v6, %v5364_v61  ;;  %v5389_v8 = vpop.f32.mrf.mxu3  ;;  %v5661_v61 = vld [vmem:[%s12472_s5 + $0x38] sm:$0xff]  ;;  %v5658_v6 = vld [vmem:[%s12472_s5 + $0x20] sm:$0xff] }
 0x24c   :  { %5603 = vmatpush.bf16.msra.mxu0 %v9162_v44  ;;  %v5390_v15 = vadd.f32 %v5389_v8, %v5377_v7  ;;  %v5657_v8 = vld [vmem:[%s12472_s5 + $0x18] sm:$0xff] }
 0x24d   :  { %5616 = vmatpush.bf16.msra.mxu1 %v9170_v58  ;;  %5629 = vmatpush.bf16.msra.mxu2 %v9178_v45 }
 0x24e   :  { %5642 = vmatpush.bf16.msra.mxu3 %v9186_v46 }
 0x250   :  { %5604 = vmatpush.bf16.msra.mxu0 %v9161_v52 }
 0x251   :  { %5617 = vmatpush.bf16.msra.mxu1 %v9169_v55  ;;  %5630 = vmatpush.bf16.msra.mxu2 %v9177_v60  ;;  %v5378_v51 = vpop.f32.mrf.mxu2 }
 0x252   :  { %5643 = vmatpush.bf16.msra.mxu3 %v9185_v63  ;;  %v5391_v50 = vpop.f32.mrf.mxu3  ;;  %v5660_v63 = vld [vmem:[%s12472_s5 + $0x30] sm:$0xff] }
 0x254   :  { %5605 = vmatpush.bf16.msra.mxu0 %v9160_v0 }
 0x255   :  { %5618 = vmatpush.bf16.msra.mxu1 %v9168_v1  ;;  %5631 = vmatpush.bf16.msra.mxu2 %v9176_v2 }
 0x256   :  { %5644 = vmatpush.bf16.msra.mxu3 %v9184_v3  ;;  %v5659_v3 = vld [vmem:[%s12472_s5 + $0x28] sm:$0xff] }
 0x258   :  { %5606 = vmatpush.bf16.msra.mxu0 %v9159_v13 }
 0x259   :  { %5619 = vmatpush.bf16.msra.mxu1 %v9167_v16  ;;  %5632 = vmatpush.bf16.msra.mxu2 %v9175_v17  ;;  %v5655_v17 = vld [vmem:[%s12472_s5 + $0x8] sm:$0xff] }
 0x25a   :  { %5645 = vmatpush.bf16.msra.mxu3 %v9183_v18 }
 0x25c   :  { %5607 = vmatpush.bf16.msra.mxu0 %v9158_v23  ;;  %v5654_v23 = vld [vmem:[%s12472_s5] sm:$0xff] }
 0x25d   :  { %5620 = vmatpush.bf16.msra.mxu1 %v9166_v24  ;;  %5633 = vmatpush.bf16.msra.mxu2 %v9174_v25 }
 0x25e   :  { %5646 = vmatpush.bf16.msra.mxu3 %v9182_v26 }
 0x260   :  { %5608 = vmatpush.bf16.msra.mxu0 %v9157_v57  ;;  %v5402_v5 = vpop.f32.mrf.mxu0 }
 0x261   :  { %5621 = vmatpush.bf16.msra.mxu1 %v9165_v27  ;;  %5634 = vmatpush.bf16.msra.mxu2 %v9173_v28  ;;  %v5403_v36 = vadd.f32 %v5402_v5, %v5390_v15  ;;  %v5415_v37 = vpop.f32.mrf.mxu1 }
 0x262   :  { %5647 = vmatpush.bf16.msra.mxu3 %v9181_v31 }
 0x263   :  { %5609 = vmatmul.bf16.vlgmr.msra.gmra.mxu0 %v3293_v33  ;;  %v5416_v12 = vadd.f32 %v5415_v37, %v5403_v36 }
 0x264   :  { %5622 = vmatmul.bf16.vlgmr.msra.gmra.mxu1 %v3294_v53  ;;  %5635 = vmatmul.bf16.vlgmr.msra.gmra.mxu2 %v3295_v34 }
 0x265   :  { %5648 = vmatmul.bf16.vlgmr.msra.gmra.mxu3 %v3296_v35  ;;  %5678 = vmatpush.msrb.mxu0 %v5661_v61  ;;  %v8535_v61 = vld [vmem:[%s12477_s10 + $0x64] sm:$0xf0] }
 0x267   :  { %5679 = vmatpush.msrb.mxu0 %v5660_v63  ;;  %v8541_v63 = vld [vmem:[%s12477_s10 + $0x58] sm:$0xf] }
 0x268   :  { %v5404_v19 = vpop.f32.mrf.mxu0 }
 0x269   :  { %v5428_v14 = vpop.f32.mrf.mxu2  ;;  %v5417_v39 = vpop.f32.mrf.mxu1  ;;  %5680 = vmatpush.msrb.mxu0 %v5659_v3  ;;  %v9200_v3 = vld [vmem:[%s12477_s10 + $0x5c] sm:$0xf] }
 0x26a   :  { %v5429_v38 = vadd.f32 %v5428_v14, %v5416_v12  ;;  %v5441_v20 = vpop.f32.mrf.mxu3 }
 0x26b   :  { %5681 = vmatpush.msrb.mxu0 %v5658_v6  ;;  %v8543_v6 = vld [vmem:[%s12477_s10 + $0x6c] sm:$0xf0] }
 0x26c   :  { %v5442_v40 = vadd.f32 %v5441_v20, %v5429_v38  ;;  %v5701_v38 = vld [vmem:[%s12473_s8] sm:$0xff] }
 0x26d   :  { %5682 = vmatpush.msrb.mxu0 %v5657_v8  ;;  %5729 = vmatpush.msrb.mxu1 %v5701_v38  ;;  %v9213_v20 = vld [vmem:[%s12471_s6] ss:$0 sm:$0xff]  ;;  %v9203_v38 = vld [vmem:[%s12477_s10 + $0x70] sm:$0xf0] }
 0x26f   :  { %5683 = vmatpush.msrb.mxu0 %v5656_v10 }
 0x271   :  { %v5430_v59 = vpop.f32.mrf.mxu2  ;;  %5684 = vmatpush.msrb.mxu0 %v5655_v17 }
 0x272   :  { %v5443_v9 = vpop.f32.mrf.mxu3 }
 0x273   :  { %5685 = vmatpush.msrb.mxu0 %v5654_v23  ;;  %v8521_v23 = vld [vmem:[%s12477_s10 + $0x30] sm:$0xf] }
 0x280   :  { %v5454_v43 = vpop.f32.mrf.mxu0 }
 0x281   :  { %v5455_v22 = vadd.f32 %v5454_v43, %v5442_v40  ;;  %v5467_v54 = vpop.f32.mrf.mxu1  ;;  %v5691_v43 = vld [vmem:[%s12476_s7] sm:$0xff] }
 0x283   :  { %v5468_v21 = vadd.f32 %v5467_v54, %v5455_v22  ;;  %v8553_v22 = vld [vmem:[%s12477_s10 + $0x78] sm:$0xf]  ;;  %v9206_v54 = vld [vmem:[%s12477_s10 + $0x88] sm:$0xf0] }
 0x288   :  { %v5456_v42 = vpop.f32.mrf.mxu0 }
 0x289   :  { %v5480_v62 = vpop.f32.mrf.mxu2  ;;  %v5469_v44 = vpop.f32.mrf.mxu1  ;;  %v8561_v42 = vld [vmem:[%s12477_s10 + $0x80] sm:$0xf] }
 0x28a   :  { %v5481_v4 = vadd.f32 %v5480_v62, %v5468_v21  ;;  %v5493_v41 = vpop.f32.mrf.mxu3  ;;  %v9239_v21 = vmov 8   ;;  %v8554_v62 = vor.u32 %v9206_v54, %v8553_v22  ;;  %v9214_v22 = vld [vmem:[%s12473_s8 + $0x8] ss:$0 sm:$0xff] }
 0x28b   :  { %9211 = vset.pattern.permute.xlu0 %v9239_v21 }
 0x28c   :  { %v5494_v58 = vadd.f32 %v5493_v41, %v5481_v4  ;;  %v9204_v4 = vld [vmem:[%s12477_s10 + $0x7c] sm:$0xf]  ;;  %v8555_v41 = vld [vmem:[%s12477_s10 + $0x8c] sm:$0xf0]  ;;  %5888 = vmatpush.bf16.msrb.mxu2 %v8554_v62  ;;  %v9215_v62 = vld [vmem:[%s12475_s9] ss:$0 sm:$0xff] }
 0x28d   :  { %v8558_v44 = vor.u32 %v9204_v4, %v8555_v41 }
 0x28f   :  { %5901 = vmatpush.bf16.msrb.mxu3 %v8558_v44 }
 0x291   :  { %v5482_v45 = vpop.f32.mrf.mxu2 }
 0x292   :  { %v5495_v46 = vpop.f32.mrf.mxu3  ;;  %v9205_v45 = vld [vmem:[%s12477_s10 + $0x84] sm:$0xf] }
 0x293   :  { %v8563_v46 = vld [vmem:[%s12477_s10 + $0x94] sm:$0xf0] }
 0x2a0   :  { %v5506_v47 = vpop.f32.mrf.mxu0 }
 0x2a1   :  { %v5519_v48 = vpop.f32.mrf.mxu1  ;;  %v5507_v11 = vadd.f32 %v5506_v47, %v5494_v58  ;;  %v9207_v58 = vld [vmem:[%s12477_s10 + $0x90] sm:$0xf0] }
 0x2a2   :  { %v8562_v47 = vor.u32 %v9207_v58, %v8561_v42 }
 0x2a3   :  { %v5520_v24 = vadd.f32 %v5519_v48, %v5507_v11  ;;  %v8566_v48 = vor.u32 %v9205_v45, %v8563_v46  ;;  %v5765_v45 = vld [vmem:[%s12478_s11] sm:$0x1f] }
 0x2a4   :  { %5914 = vmatpush.bf16.msra.mxu0 %v8562_v47  ;;  %v5769_v46 = vperm.slane %v5765_v45, 2  ;;  %v5770_v47 = vperm.slane %v5765_v45, 3 }
 0x2a5   :  { %5927 = vmatpush.bf16.msra.mxu1 %v8566_v48 }
 0x2a8   :  { %v5508_v55 = vpop.f32.mrf.mxu0 }
 0x2a9   :  { %v5532_v49 = vpop.f32.mrf.mxu2  ;;  %v5521_v60 = vpop.f32.mrf.mxu1  ;;  %v9199_v55 = vld [vmem:[%s12477_s10 + $0x54] sm:$0xf] }
 0x2aa   :  { %v5545_v52 = vpop.f32.mrf.mxu3  ;;  %v5533_v25 = vadd.f32 %v5532_v49, %v5520_v24  ;;  %v8533_v49 = vld [vmem:[%s12477_s10 + $0x50] sm:$0xf] }
 0x2ac   :  { %v5546_v50 = vadd.f32 %v5545_v52, %v5533_v25  ;;  %v9201_v52 = vld [vmem:[%s12477_s10 + $0x60] sm:$0xf0] }
 0x2ad   :  { %v8534_v60 = vor.u32 %v9201_v52, %v8533_v49  ;;  %v9197_v25 = vld [vmem:[%s12477_s10 + $0x40] sm:$0xf0] }
 0x2af   :  { %5889 = vmatpush.bf16.msrb.mxu2 %v8534_v60  ;;  %v5767_v60 = vperm.slane %v5765_v45, 0 }
 0x2b1   :  { %v5534_v0 = vpop.f32.mrf.mxu2 }
 0x2b2   :  { %v5547_v1 = vpop.f32.mrf.mxu3  ;;  %v9202_v0 = vld [vmem:[%s12477_s10 + $0x68] sm:$0xf0] }
 0x2b3   :  { %v8538_v1 = vor.u32 %v9199_v55, %v8535_v61  ;;  %v5768_v61 = vperm.slane %v5765_v45, 1 }
 0x2b5   :  { %5902 = vmatpush.bf16.msrb.mxu3 %v8538_v1 }
 0x2c0   :  { %v5558_v2 = vpop.f32.mrf.mxu0 }
 0x2c1   :  { %v5571_v7 = vpop.f32.mrf.mxu1  ;;  %v5559_v57 = vadd.f32 %v5558_v2, %v5546_v50  ;;  %v8542_v2 = vor.u32 %v9202_v0, %v8541_v63  ;;  %v8522_v50 = vor.u32 %v9197_v25, %v8521_v23 }
 0x2c3   :  { %v5572_v56 = vadd.f32 %v5571_v7, %v5559_v57  ;;  %v8546_v7 = vor.u32 %v9200_v3, %v8543_v6  ;;  %5915 = vmatpush.bf16.msra.mxu0 %v8542_v2 }
 0x2c5   :  { %5928 = vmatpush.bf16.msra.mxu1 %v8546_v7 }
 0x2c7   :  { %5916 = vmatpush.bf16.msra.mxu0 %v8522_v50  ;;  %v5771_v50 = vperm.slane %v5765_v45, 4 }
 0x2c8   :  { %v5560_v16 = vpop.f32.mrf.mxu0 }
 0x2c9   :  { %v5584_v13 = vpop.f32.mrf.mxu2  ;;  %v5573_v18 = vpop.f32.mrf.mxu1  ;;  %v9194_v16 = vld [vmem:[%s12477_s10 + $0x2c] sm:$0xf] }
 0x2ca   :  { %v5597_v15 = vpop.f32.mrf.mxu3  ;;  %v5585_v27 = vadd.f32 %v5584_v13, %v5572_v56  ;;  %v8513_v13 = vld [vmem:[%s12477_s10 + $0x28] sm:$0xf]  ;;  %v8515_v18 = vld [vmem:[%s12477_s10 + $0x3c] sm:$0xf0] }
 0x2cb   :  { %v8518_v24 = vor.u32 %v9194_v16, %v8515_v18  ;;  %v8493_v56 = vld [vmem:[%s12477_s10] sm:$0xf] }
 0x2cc   :  { %v5598_v28 = vadd.f32 %v5597_v15, %v5585_v27  ;;  %v9196_v15 = vld [vmem:[%s12477_s10 + $0x38] sm:$0xf0]  ;;  %v9191_v27 = vld [vmem:[%s12477_s10 + $0x10] sm:$0xf0] }
 0x2cd   :  { %v8514_v17 = vor.u32 %v9196_v15, %v8513_v13  ;;  %5903 = vmatpush.bf16.msrb.mxu3 %v8518_v24 }
 0x2cf   :  { %5890 = vmatpush.bf16.msrb.mxu2 %v8514_v17 }
 0x2d1   :  { %v5586_v26 = vpop.f32.mrf.mxu2 }
 0x2d2   :  { %v5599_v51 = vpop.f32.mrf.mxu3  ;;  %v9195_v26 = vld [vmem:[%s12477_s10 + $0x34] sm:$0xf] }
 0x2d3   :  { %v8523_v51 = vld [vmem:[%s12477_s10 + $0x44] sm:$0xf0] }
 0x2d4   :  { %v8526_v57 = vor.u32 %v9195_v26, %v8523_v51 }
 0x2d6   :  { %5929 = vmatpush.bf16.msra.mxu1 %v8526_v57 }
 0x2e0   :  { %v5610_v29 = vpop.f32.mrf.mxu0 }
 0x2e1   :  { %v5623_v30 = vpop.f32.mrf.mxu1  ;;  %v5611_v31 = vadd.f32 %v5610_v29, %v5598_v28  ;;  %v9189_v28 = vld [vmem:[%s12477_s10 + $0x4] sm:$0xf]  ;;  %v8494_v29 = vor.u32 %v9191_v27, %v8493_v56 }
 0x2e3   :  { %v5624_v32 = vadd.f32 %v5623_v30, %v5611_v31  ;;  %v8495_v30 = vld [vmem:[%s12477_s10 + $0x14] sm:$0xf0]  ;;  %v8501_v31 = vld [vmem:[%s12477_s10 + $0x8] sm:$0xf]  ;;  %5891 = vmatpush.bf16.msrb.mxu2 %v8494_v29 }
 0x2e7   :  { %v5636_v33 = vpop.f32.mrf.mxu2 }
 0x2e8   :  { %v5637_v53 = vadd.f32 %v5636_v33, %v5624_v32  ;;  %v5649_v34 = vpop.f32.mrf.mxu3  ;;  %v5612_v35 = vpop.f32.mrf.mxu0  ;;  %v9192_v32 = vld [vmem:[%s12477_s10 + $0x18] sm:$0xf0]  ;;  %v8498_v33 = vor.u32 %v9189_v28, %v8495_v30 }
 0x2e9   :  { %v5625_v5 = vpop.f32.mrf.mxu1  ;;  %v8503_v35 = vld [vmem:[%s12477_s10 + $0x1c] sm:$0xf0] }
 0x2ea   :  { %v5650_v36 = vadd.f32 %v5649_v34, %v5637_v53  ;;  %v8502_v53 = vor.u32 %v9192_v32, %v8501_v31  ;;  %v9190_v34 = vld [vmem:[%s12477_s10 + $0xc] sm:$0xf]  ;;  %5904 = vmatpush.bf16.msrb.mxu3 %v8498_v33 }
 0x2eb   :  { %v8506_v5 = vor.u32 %v9190_v34, %v8503_v35 }
 0x2ec   :  { %v5653_v37 = vmax.f32 %v5650_v36, 0.0  ;;  %v8569_v36 = vld [vmem:[%s12477_s10 + $0x88] sm:$0xf]  ;;  %5917 = vmatpush.bf16.msra.mxu0 %v8502_v53 }
 0x2ed   :  { %5930 = vmatpush.bf16.msra.mxu1 %v8506_v5 }
 0x2ee   :  { %8489 = vmatmul.msk.f32.vlgmr.msrb.gmra.mxu0 %vm5666_vm0, %v5653_v37  ;;  %v9208_v37 = vld [vmem:[%s12477_s10 + $0x98] sm:$0xf0] }
 0x2ef   :  { %v5638_v12 = vpop.f32.mrf.mxu2 }
 0x2f0   :  { %v5651_v14 = vpop.f32.mrf.mxu3  ;;  %v8570_v12 = vor.u32 %v9208_v37, %v8569_v36 }
 0x2f1   :  { %v8549_v14 = vld [vmem:[%s12477_s10 + $0x60] sm:$0xf] }
 0x2f2   :  { %5940 = vmatpush.bf16.msra.mxu2 %v8570_v12 }
 0x36b   :  { %v5687_v19 = vpop.f32.mrf.mxu0 }
 0x36c   :  { %v5688_v39 = vadd.f32 %v9213_v20, %v5687_v19  ;;  %v8550_v20 = vor.u32 %v9203_v38, %v8549_v14  ;;  %v8529_v19 = vld [vmem:[%s12477_s10 + $0x38] sm:$0xf] }
 0x36e   :  { %5690 = vst [vmem:[%s12474_s13] sm:$0xff] %v5688_v39  ;;  %v5692_v40 = vmul.f32 0.5, %v5688_v39  ;;  %5941 = vmatpush.bf16.msra.mxu2 %v8550_v20 }
 0x370   :  { %v5693_v59 = vmul.f32 1.442695, %v5692_v40 }
 0x372   :  { %9216 = vpow2.f32 %v5693_v59  ;;  %v8509_v59 = vld [vmem:[%s12477_s10 + $0x10] sm:$0xf] }
 0x378   :  { %v9217_v9 = vpop.eup %9216 }
 0x379   :  { %5696 = vrot.lane.b32.xlu0 %v9217_v9, %s9238_s4  ;;  %v9193_v9 = vld [vmem:[%s12477_s10 + $0x20] sm:$0xf0] }
 0x381   :  { %5705 = vperm.xlu0 %9211, %v5691_v43  }
 0x3eb   :  { %v5697_v8 = vpop.permute.xlu0 %5696 }
 0x3ec   :  { %v5699_v10 = vmul.f32 %v5697_v8, %v5691_v43  ;;  %v8510_v43 = vor.u32 %v9193_v9, %v8509_v59 }
 0x3ee   :  { %v5700_v11 = vadd.f32 %v5699_v10, %v5688_v39  ;;  %v9198_v39 = vld [vmem:[%s12477_s10 + $0x48] sm:$0xf0] }
 0x3ef   :  { %v8530_v40 = vor.u32 %v9198_v39, %v8529_v19 }
 0x3f0   :  { %8490 = vmatmul.msk.f32.vlgmr.msrb.gmra.mxu1 %vm5710_vm1, %v5700_v11 }
 0x3f1   :  { %5942 = vmatpush.bf16.msra.mxu2 %v8530_v40 }
 0x3f3   :  { %v5706_v54 = vpop.permute.xlu0 %5705 }
 0x3f4   :  { %v5709_v21 = vmul.f32 %v9214_v22, %v5706_v54 }
 0x3f5   :  { %5943 = vmatpush.bf16.msra.mxu2 %v8510_v43 }
 0x46d   :  { %v5731_v4 = vpop.f32.mrf.mxu1 }
 0x46e   :  { %v5732_v41 = vadd.f32 %v5731_v4, %v5709_v21 }
 0x470   :  { %v5738_v42 = vadd.f32 %v9215_v62, %v5732_v41 }
 0x472   :  { %v5739_v44 = vmax.f32 %v5738_v42, 0.0 }
 0x474   :  { %v5740_v58 = vpack.c.bf16 %v5739_v44, %v5739_v44 }
 0x476   :  { %8571 = vmatmul.msk.bf16.vlgmr.msrb.gmra.mxu2 %vm5666_vm0, %v5740_v58  ;;  %8572 = vmatmul.msk.bf16.vlgmr.msrb.gmra.mxu3 %vm5666_vm0, %v5740_v58 }
 0x477   :  { %8573 = vmatmul.msk.bf16.vlgmr.msra.gmra.mxu0 %vm5666_vm0, %v5740_v58  ;;  %8574 = vmatmul.msk.bf16.vlgmr.msra.gmra.mxu1 %vm5666_vm0, %v5740_v58 }
 0x486   :  { %8575 = vmatmul.msk.bf16.vlgmr.msra.gmra.mxu2 %vm5666_vm0, %v5740_v58 }
 0x4f4   :  { %v5919_v48 = vpop.f32.mrf.mxu0  ;;  %v5932_v49 = vpop.f32.mrf.mxu1 }
 0x4f5   :  { %v5920_v52 = vadd.f32 %v5919_v48, %v5769_v46  ;;  %v5933_v55 = vadd.f32 %v5932_v49, %v5770_v47 }
 0x4f7   :  { %v8578_v63 = vmul.f32 -1.442695, %v5920_v52  ;;  %v8579_v0 = vmul.f32 -1.442695, %v5933_v55 }
 0x4f9   :  { %9218 = vpow2.f32 %v8578_v63  ;;  %v5893_v1 = vpop.f32.mrf.mxu2  ;;  %v5906_v2 = vpop.f32.mrf.mxu3 }
 0x4fa   :  { %9220 = vpow2.f32 %v8579_v0  ;;  %v5894_v3 = vadd.f32 %v5893_v1, %v5767_v60  ;;  %v5907_v6 = vadd.f32 %v5906_v2, %v5768_v61 }
 0x4fc   :  { %v8576_v7 = vmul.f32 -1.442695, %v5894_v3  ;;  %v8577_v8 = vmul.f32 -1.442695, %v5907_v6  ;;  %v5921_v10 = vpop.f32.mrf.mxu0  ;;  %v5934_v11 = vpop.f32.mrf.mxu1 }
 0x4fe   :  { %9222 = vpow2.f32 %v8576_v7 }
 0x4ff   :  { %v9219_v13 = vpop.eup %9218  ;;  %9224 = vpow2.f32 %v8577_v8 }
 0x500   :  { %v9221_v15 = vpop.eup %9220  ;;  %v5966_v16 = vadd.f32 1.0, %v9219_v13 }
 0x501   :  { %v5967_v17 = vadd.f32 1.0, %v9221_v15  ;;  %v5895_v18 = vpop.f32.mrf.mxu2  ;;  %v5908_v23 = vpop.f32.mrf.mxu3 }
 0x502   :  { %9226 = vrcp.f32 %v5966_v16  ;;  %v6008_v28 = vand.u32 2147483647, %v5966_v16  ;;  %v6010_v30 = vand.u32 2147483648, %v5966_v16  ;;  %vm6004_vm2 = vweird.f32 %v5966_v16 }
 0x503   :  { %9228 = vrcp.f32 %v5967_v17  ;;  %v6023_v33 = vand.u32 2147483647, %v5967_v17  ;;  %vm6019_vm3 = vweird.f32 %v5967_v17  ;;  %v6025_v35 = vand.u32 2147483648, %v5967_v17 }
 0x504   :  { %v9223_v24 = vpop.eup %9222  ;;  %vm12429_vm5 = vcmp.eq.f32.partialorder %v6008_v28, 8.507059e+37  ;;  %v6011_v38 = vor.u32 1.1754944e-38, %v6010_v30 }
 0x505   :  { %v9225_v25 = vpop.eup %9224  ;;  %v12423_v26 = vadd.f32 1.0, %v9223_v24  ;;  %vm12434_vm7 = vcmp.eq.f32.partialorder %v6023_v33, 8.507059e+37  ;;  %v6026_v43 = vor.u32 1.1754944e-38, %v6025_v35 }
 0x506   :  { %v12425_v51 = vadd.f32 1.0, %v9225_v25 }
 0x507   :  { %9230 = vrcp.f32 %v12423_v26  ;;  %v5978_v54 = vand.u32 2147483647, %v12423_v26  ;;  %v5980_v62 = vand.u32 2147483648, %v12423_v26  ;;  %vm5974_vm12 = vweird.f32 %v12423_v26 }
 0x508   :  { %v9227_v57 = vpop.eup %9226  ;;  %9232 = vrcp.f32 %v12425_v51  ;;  %v5995_v41 = vand.u32 2147483648, %v12425_v51  ;;  %v5993_v48 = vand.u32 2147483647, %v12425_v51  ;;  %vm5989_vm14 = vweird.f32 %v12425_v51 }
 0x509   :  { %v9229_v56 = vpop.eup %9228  ;;  %v6000_v27 = vmul.f32 %v9227_v57, %v5966_v16  ;;  %v5945_v29 = vpop.f32.mrf.mxu2  ;;  %vm6005_vm4 = vweird.f32 %v9227_v57  ;;  %v5981_v55 = vor.u32 1.1754944e-38, %v5980_v62  ;;  %vm5979_vm15 = vcmp.eq.f32.partialorder %v5978_v54, 8.507059e+37 }
 0x50a   :  { %v6015_v31 = vmul.f32 %v9229_v56, %v5967_v17  ;;  %v5946_v53 = vadd.f32 %v5945_v29, %v5771_v50  ;;  %vm6020_vm6 = vweird.f32 %v9229_v56  ;;  %vm6006_vm8 = vmor %vm6004_vm2, %vm6005_vm4  ;;  %v5996_v63 = vor.u32 1.1754944e-38, %v5995_v41 }
 0x50b   :  { %v6001_v32 = vsub.f32 1.0, %v6000_v27  ;;  %vm6021_vm9 = vmor %vm6019_vm3, %vm6020_vm6  ;;  %vm5994_vm1 = vcmp.eq.f32.partialorder %v5993_v48, 8.507059e+37 }
 0x50c   :  { %v6016_v34 = vsub.f32 1.0, %v6015_v31  ;;  %v8580_v12 = vmul.f32 -1.442695, %v5946_v53 }
 0x50d   :  { %v9231_v5 = vpop.eup %9230  ;;  %v6002_v36 = vmul.f32 %v9227_v57, %v6001_v32 }
 0x50e   :  { %v9233_v14 = vpop.eup %9232  ;;  %v6017_v20 = vmul.f32 %v9229_v56, %v6016_v34  ;;  %v5970_v19 = vmul.f32 %v9231_v5, %v12423_v26  ;;  %9234 = vpow2.f32 %v8580_v12  ;;  %vm5975_vm10 = vweird.f32 %v9231_v5 }
 0x50f   :  { %v6003_v39 = vadd.f32 %v9227_v57, %v6002_v36  ;;  %v5985_v59 = vmul.f32 %v9233_v14, %v12425_v51  ;;  %vm5990_vm11 = vweird.f32 %v9233_v14  ;;  %vm5976_vm13 = vmor %vm5974_vm12, %vm5975_vm10 }
 0x510   :  { %v6018_v9 = vadd.f32 %v9229_v56, %v6017_v20  ;;  %v5971_v22 = vsub.f32 1.0, %v5970_v19  ;;  %vm5991_vm0 = vmor %vm5989_vm14, %vm5990_vm11 }
 0x511   :  { %v6007_v21 = vsel %vm6006_vm8, %v9227_v57, %v6003_v39  ;;  %v5986_v4 = vsub.f32 1.0, %v5985_v59  ;;  %v5947_v42 = vpop.f32.mrf.mxu2 }
 0x512   :  { %v6012_v44 = vsel %vm12429_vm5, %v6011_v38, %v6007_v21  ;;  %v6022_v58 = vsel %vm6021_vm9, %v9229_v56, %v6018_v9  ;;  %v5972_v45 = vmul.f32 %v9231_v5, %v5971_v22 }
 0x513   :  { %6046 = vst [vmem:[%s12479_s12 + $0x10] sm:$0xff] %v6012_v44  ;;  %v6027_v46 = vsel %vm12434_vm7, %v6026_v43, %v6022_v58  ;;  %v5987_v47 = vmul.f32 %v9233_v14, %v5986_v4 }
 0x514   :  { %6047 = vst [vmem:[%s12479_s12 + $0x18] sm:$0xff] %v6027_v46  ;;  %v5973_v49 = vadd.f32 %v9231_v5, %v5972_v45  ;;  %v9235_v52 = vpop.eup %9234 }
 0x515   :  { %v5988_v60 = vadd.f32 %v9233_v14, %v5987_v47  ;;  %v5968_v0 = vadd.f32 1.0, %v9235_v52 }
 0x516   :  { %v5977_v61 = vsel %vm5976_vm13, %v9231_v5, %v5973_v49 }
 0x517   :  { %v5982_v1 = vsel %vm5979_vm15, %v5981_v55, %v5977_v61  ;;  %v5992_v2 = vsel %vm5991_vm0, %v9233_v14, %v5988_v60  ;;  %9236 = vrcp.f32 %v5968_v0  ;;  %v6040_v10 = vand.u32 2147483648, %v5968_v0 }
 0x518   :  { %6044 = vst [vmem:[%s12479_s12] sm:$0xff] %v5982_v1  ;;  %v5997_v3 = vsel %vm5994_vm1, %v5996_v63, %v5992_v2  ;;  %v6038_v13 = vand.u32 2147483647, %v5968_v0  ;;  %vm6034_vm3 = vweird.f32 %v5968_v0 }
 0x519   :  { %6045 = vst [vmem:[%s12479_s12 + $0x8] sm:$0xff] %v5997_v3  ;;  %v6041_v16 = vor.u32 1.1754944e-38, %v6040_v10 }
 0x51a   :  { %vm6039_vm5 = vcmp.eq.f32.partialorder %v6038_v13, 8.507059e+37 }
 0x51d   :  { %v9237_v6 = vpop.eup %9236 }
 0x51e   :  { %v6030_v7 = vmul.f32 %v9237_v6, %v5968_v0  ;;  %vm6035_vm2 = vweird.f32 %v9237_v6 }
 0x51f   :  { %vm6036_vm4 = vmor %vm6034_vm3, %vm6035_vm2 }
 0x520   :  { %v6031_v8 = vsub.f32 1.0, %v6030_v7 }
 0x522   :  { %v6032_v11 = vmul.f32 %v9237_v6, %v6031_v8 }
 0x524   :  { %v6033_v15 = vadd.f32 %v9237_v6, %v6032_v11 }
 0x526   :  { %v6037_v17 = vsel %vm6036_vm4, %v9237_v6, %v6033_v15 }
 0x527   :  { %v6042_v18 = vsel %vm6039_vm5, %v6041_v16, %v6037_v17 }
 0x528   :  { %6048 = vst [vmem:[%s12479_s12 + $0x20] sm:$0xff] %v6042_v18 }

</bundles_post_ra>
